<compile_context>
chip_gen: v5e
topology: v5e:2x2
jax: 0.10.0
libtpu: 0.0.40
codegen_flags: <defaults>
</compile_context>

<pallas_src>
import functools
from itertools import combinations

import jax
import jax.numpy as jnp
from jax.experimental import pallas as pl
from jax.experimental.pallas import tpu as pltpu

EPS = 1e-5  # PyTorch BatchNorm default eps


# ----------------------------- in-kernel helpers ----------------------------

def _dot(a, w):
    # bf16 MXU matmul, f32 accumulation. Weights are passed pre-cast to bf16.
    return jnp.dot(a.astype(jnp.bfloat16), w, preferred_element_type=jnp.float32)


def _bn_groups(y, groups, gamma, beta, relu):
    # BatchNorm1d (train mode, biased batch statistics), computed independently per
    # row-group (== per view / per orthmix batch, matching the per-call stats of the
    # PyTorch reference). Static row slices keep everything 2-D and lane-dense.
    n = y.shape[0] // groups
    parts = []
    for g in range(groups):
        yg = y[g * n:(g + 1) * n, :]
        mean = jnp.mean(yg, axis=0, keepdims=True)
        var = jnp.mean((yg - mean) ** 2, axis=0, keepdims=True)
        parts.append((yg - mean) * jax.lax.rsqrt(var + EPS))
    y = jnp.concatenate(parts, axis=0) if groups > 1 else parts[0]
    y = y * gamma + beta
    return jnp.maximum(y, 0.0) if relu else y


def _projector(feat, groups, w1, b1, g1, be1, w2, b2, g2, be2, w3, b3, g3, be3):
    # projection_MLP: 3 x (Linear + BN), ReLU after the first two.
    h = _bn_groups(_dot(feat, w1[...]) + b1[...], groups, g1[...], be1[...], True)
    h = _bn_groups(_dot(h, w2[...]) + b2[...], groups, g2[...], be2[...], True)
    return _bn_groups(_dot(h, w3[...]) + b3[...], groups, g3[...], be3[...], False)


# ------------------------------- Pallas kernels ------------------------------

def _online_kernel(x_ref, wbe_ref, bb_ref,
                   pw1, pb1, pg1, pbe1, pw2, pb2, pg2, pbe2, pw3, pb3, pg3, pbe3,
                   hw1, hb1, hg1, hbe1, hw2, hb2,
                   p_ref, *, views):
    # Online encoder (GAP-folded fc + projector) + predictor, all views in one operand.
    feat = _dot(x_ref[...], wbe_ref[...]) + bb_ref[...]             # (V*N, dim_fc)
    z = _projector(feat, views,
                   pw1, pb1, pg1, pbe1, pw2, pb2, pg2, pbe2, pw3, pb3, pg3, pbe3)
    q = _bn_groups(_dot(z, hw1[...]) + hb1[...], views, hg1[...], hbe1[...], True)
    p_ref[...] = _dot(q, hw2[...]) + hb2[...]                       # (V*N, out_dim)


def _split_kernel(xp_ref, wbp_ref, bb_ref,
                  w1, b1, g1, be1, w2, b2, g2, be2, w3, b3, g3, be3,
                  k_ref, *, ns, n, combos, inv_combs):
    # Local-split backbone (GAP folded) + orthogonal combination mixing + projector.
    kpre = _dot(xp_ref[...], wbp_ref[...]) + bb_ref[...]            # (2*ns*n, dim_fc)
    mixes = []
    for v in range(2):                                              # 2 views
        base = v * ns * n
        for cmb in combos:                                          # C(ns, combs) combos
            acc = kpre[base + cmb[0] * n: base + cmb[0] * n + n, :]
            for c in cmb[1:]:
                acc = acc + kpre[base + c * n: base + c * n + n, :]
            mixes.append(acc * inv_combs)
    kmix = jnp.concatenate(mixes, axis=0)                           # (2*ncomb*n, dim_fc)
    k_ref[...] = _projector(kmix, 2,
                            w1, b1, g1, be1, w2, b2, g2, be2, w3, b3, g3, be3)


def _ema_nn_kernel(x_ref, wbe_ref, bb_ref,
                   w1, b1, g1, be1, w2, b2, g2, be2, w3, b3, g3, be3,
                   bank_ref, inv_ref, idx_ref, *, views):
    # EMA/target encoder + cosine-similarity nearest-neighbour index over the memory bank.
    feat = _dot(x_ref[...], wbe_ref[...]) + bb_ref[...]
    j = _projector(feat, views,
                   w1, b1, g1, be1, w2, b2, g2, be2, w3, b3, g3, be3)   # (Nq, D) f32
    jn = j * jax.lax.rsqrt(jnp.sum(j * j, axis=-1, keepdims=True) + 1e-12)
    sim = jax.lax.dot_general(jn.astype(jnp.bfloat16), bank_ref[...],
                              (((1,), (1,)), ((), ())),
                              preferred_element_type=jnp.float32)       # (Nq, M)
    sim = sim * inv_ref[...]                                            # / ||bank row||
    best = jnp.max(sim, axis=-1, keepdims=True)
    cols = jax.lax.broadcasted_iota(jnp.int32, sim.shape, 1)
    idx_ref[...] = jnp.min(jnp.where(sim >= best, cols, sim.shape[1]),
                           axis=-1, keepdims=True)                      # first argmax


# ------------------------------ kernel wrappers -----------------------------

def _proj_args(pj):
    return (pj["w1"].astype(jnp.bfloat16), pj["b1"], pj["g1"], pj["be1"],
            pj["w2"].astype(jnp.bfloat16), pj["b2"], pj["g2"], pj["be2"],
            pj["w3"].astype(jnp.bfloat16), pj["b3"], pj["g3"], pj["be3"])


def _gap_folded_weight(wb, hw):
    # GAP (mean over HW) folded into the backbone fc: x.reshape(N, C*HW) @ W_exp + b.
    return jnp.repeat(wb * (1.0 / hw), hw, axis=0).astype(jnp.bfloat16)


def online_forward(x_flat, enc, pred, hw, views):
    """x_flat: (V*N, C*HW) -> p: (V*N, out_dim). Encoder + predictor fused, BN per view."""
    vn = x_flat.shape[0]
    odim = pred["w2"].shape[1]
    args = (x_flat, _gap_folded_weight(enc["backbone"]["w"], hw), enc["backbone"]["b"],
            *_proj_args(enc["projector"]),
            pred["w1"].astype(jnp.bfloat16), pred["b1"], pred["g1"], pred["be1"],
            pred["w2"].astype(jnp.bfloat16), pred["b2"])
    return pl.pallas_call(
        functools.partial(_online_kernel, views=views),
        out_shape=jax.ShapeDtypeStruct((vn, odim), jnp.float32),
    )(*args)


def split_forward(xp_flat, enc, hw_patch, ns, n, combos, combs):
    """xp_flat: (2*ns*N, C*hw_patch) -> k: (2*ncomb*N, out_dim). Backbone+orthmix+projector."""
    odim = enc["projector"]["w3"].shape[1]
    ncomb = len(combos)
    args = (xp_flat, _gap_folded_weight(enc["backbone"]["w"], hw_patch),
            enc["backbone"]["b"], *_proj_args(enc["projector"]))
    return pl.pallas_call(
        functools.partial(_split_kernel, ns=ns, n=n, combos=combos,
                          inv_combs=1.0 / combs),
        out_shape=jax.ShapeDtypeStruct((2 * ncomb * n, odim), jnp.float32),
    )(*args)


def ema_nn_forward(x_flat, ema, bank, hw, views):
    """x_flat: (2N, C*HW) -> (2N, D): EMA encoder + NN-bank lookup (returns stored rows)."""
    nq = x_flat.shape[0]
    m, d = bank.shape
    inv_norm = jax.lax.rsqrt(jnp.sum(bank * bank, axis=-1) + 1e-12)[None, :]   # (1, M)
    bank_bf = bank.astype(jnp.bfloat16)
    cost = pl.CostEstimate(flops=2 * nq * d * m,
                           transcendentals=2 * nq,
                           bytes_accessed=int(bank_bf.size) * 2 + int(x_flat.size) * 4
                                          + nq * (d * 4 + 4))
    args = (x_flat, _gap_folded_weight(ema["backbone"]["w"], hw), ema["backbone"]["b"],
            *_proj_args(ema["projector"]), bank_bf, inv_norm)
    idx = pl.pallas_call(
        functools.partial(_ema_nn_kernel, views=views),
        out_shape=jax.ShapeDtypeStruct((nq, 1), jnp.int32),
        cost_estimate=cost,
        compiler_params=pltpu.CompilerParams(vmem_limit_bytes=32 * 1024 * 1024),
    )(*args)
    # Gather the winning (un-normalized, as stored) bank rows once, outside the kernel.
    return jnp.take(bank, idx[:, 0], axis=0)


# ------------------------------ forward (glue) -------------------------------

def _local_split_flat(x, split_num):
    # FastMoCo._local_split ordering: split columns (dim=3) first, then rows (dim=2)
    # within each column, concat along batch; flattened to (ns*N, C*hs*ws) for the
    # GAP-folded backbone fc.
    n, c, h, w = x.shape
    hs, ws = h // split_num, w // split_num
    x = x.reshape(n, c, split_num, hs, split_num, ws)
    x = x.transpose(4, 2, 0, 1, 3, 5)                 # (col_blk, row_blk, N, C, hs, ws)
    return x.reshape(split_num * split_num * n, c * hs * ws)


def fastmoco_forward(params, inp, *, split_num=2, combs=2, m=0.99):
    n, _, h, w = inp.shape
    c = 3
    hw = h * w
    x1, x2, x3 = inp[:, 0:3], inp[:, 3:6], inp[:, 6:9]   # torch.split(input, [3,3,3], dim=1)
    enc, pred = params["encoder"], params["predictor"]

    # ----- online branch ('comb_patch'): encoder + predictor fused, 3 views in one operand
    x_on = jnp.concatenate([x1, x2, x3], axis=0).reshape(3 * n, c * hw)
    p = online_forward(x_on, enc, pred, hw, views=3)      # (3N, O)
    p1, p2, p3 = p[:n], p[n:2 * n], p[2 * n:]

    # ----- momentum update of the EMA (target) encoder (f32 master params)
    ema = jax.tree_util.tree_map(lambda t, q: m * t + (1.0 - m) * q,
                                 params["encoder_ema"], enc)

    # ----- local split -> backbone -> orthmix -> projector (one fused kernel, both views)
    ns = split_num ** 2
    combos = tuple(combinations(range(ns), combs))
    xp = jnp.concatenate([_local_split_flat(x1, split_num),
                          _local_split_flat(x2, split_num)], axis=0)
    k = split_forward(xp, enc, (h // split_num) * (w // split_num), ns, n, combos, combs)
    ncomb = len(combos)
    k1, k2 = k[:ncomb * n], k[ncomb * n:]

    # ----- target branch: EMA encoder + NN memory-bank lookup fused (x1 & x3)
    x13 = jnp.concatenate([x1, x3], axis=0).reshape(2 * n, c * hw)
    nn = ema_nn_forward(x13, ema, params["bank"], hw, views=2)   # (2N, O)
    j1, j3 = nn[:n], nn[n:]

    return p1, k1, p2, k2, p3, j3, j1


# ------------------------------- param init ----------------------------------

def _linear_params(key, in_dim, out_dim):
    # stored pre-transposed (in, out): kernels compute x @ w with no in-kernel transpose
    w = 0.05 * jax.random.normal(key, (in_dim, out_dim), jnp.float32)
    b = jnp.zeros((1, out_dim), jnp.float32)
    return w, b


def init_projector(key, in_dim, hidden_dim, out_dim):
    k1, k2, k3 = jax.random.split(key, 3)
    w1, b1 = _linear_params(k1, in_dim, hidden_dim)
    w2, b2 = _linear_params(k2, hidden_dim, hidden_dim)
    w3, b3 = _linear_params(k3, hidden_dim, out_dim)
    return dict(
        w1=w1, b1=b1,
        g1=jnp.ones((1, hidden_dim), jnp.float32), be1=jnp.zeros((1, hidden_dim), jnp.float32),
        w2=w2, b2=b2,
        g2=jnp.ones((1, hidden_dim), jnp.float32), be2=jnp.zeros((1, hidden_dim), jnp.float32),
        w3=w3, b3=b3,
        g3=jnp.ones((1, out_dim), jnp.float32), be3=jnp.zeros((1, out_dim), jnp.float32),
    )


def init_predictor(key, in_dim, hidden_dim, out_dim):
    k1, k2 = jax.random.split(key)
    w1, b1 = _linear_params(k1, in_dim, hidden_dim)
    w2, b2 = _linear_params(k2, hidden_dim, out_dim)
    return dict(w1=w1, b1=b1,
                g1=jnp.ones((1, hidden_dim), jnp.float32),
                be1=jnp.zeros((1, hidden_dim), jnp.float32),
                w2=w2, b2=b2)


def init_encoder(key, c_in, dim_fc, hidden_dim, out_dim):
    kb, kp = jax.random.split(key)
    wb, bb = _linear_params(kb, c_in, dim_fc)
    return dict(backbone=dict(w=wb, b=bb),
                projector=init_projector(kp, dim_fc, hidden_dim, out_dim))


# --------------------------------- main ---------------------------------------

if __name__ == "__main__":
    batch, height, width = 2, 16, 16
    c_view = 3                        # each of the 3 views has 3 channels (NCHW)
    dim_fc = 128                      # lane-dense feature widths (multiples of 128)
    proj_hidden, proj_out = 128, 128
    pred_hidden = 128
    bank_size = 1024                  # NNMemoryBankModule (scaled down from 16384)

    key = jax.random.PRNGKey(0)
    k_enc, k_ema, k_pred, k_bank, k_x = jax.random.split(key, 5)

    params = dict(
        encoder=init_encoder(k_enc, c_view, dim_fc, proj_hidden, proj_out),
        encoder_ema=init_encoder(k_ema, c_view, dim_fc, proj_hidden, proj_out),
        predictor=init_predictor(k_pred, proj_out, pred_hidden, proj_out),
        bank=jax.random.normal(k_bank, (bank_size, proj_out), jnp.float32),
    )
    params["bank"] = params["bank"] / jnp.linalg.norm(
        params["bank"], axis=-1, keepdims=True)

    x = jax.random.normal(k_x, (batch, 9, height, width), jnp.float32)

    fwd = jax.jit(functools.partial(fastmoco_forward, split_num=2, combs=2, m=0.99))
    outs = fwd(params, x)
    jax.block_until_ready(outs)

    p1, k1, p2, k2, p3, j3, j1 = outs
    assert p1.shape == (batch, proj_out)
    assert p2.shape == (batch, proj_out) and p3.shape == (batch, proj_out)
    assert k1.shape == (6 * batch, proj_out)   # C(4,2)=6 combinations
    assert k2.shape == (6 * batch, proj_out)
    assert j1.shape == (batch, proj_out) and j3.shape == (batch, proj_out)
    print("KERNEL_OK")
</pallas_src>

<mosaic_0001>
module attributes {stable_mosaic.version = 11 : i64} {
  func.func @_online_kernel(%arg0: memref<6x768xf32, #tpu.memory_space<vmem>>, %arg1: memref<768x128xbf16, #tpu.memory_space<vmem>>, %arg2: memref<1x128xf32, #tpu.memory_space<vmem>>, %arg3: memref<128x128xbf16, #tpu.memory_space<vmem>>, %arg4: memref<1x128xf32, #tpu.memory_space<vmem>>, %arg5: memref<1x128xf32, #tpu.memory_space<vmem>>, %arg6: memref<1x128xf32, #tpu.memory_space<vmem>>, %arg7: memref<128x128xbf16, #tpu.memory_space<vmem>>, %arg8: memref<1x128xf32, #tpu.memory_space<vmem>>, %arg9: memref<1x128xf32, #tpu.memory_space<vmem>>, %arg10: memref<1x128xf32, #tpu.memory_space<vmem>>, %arg11: memref<128x128xbf16, #tpu.memory_space<vmem>>, %arg12: memref<1x128xf32, #tpu.memory_space<vmem>>, %arg13: memref<1x128xf32, #tpu.memory_space<vmem>>, %arg14: memref<1x128xf32, #tpu.memory_space<vmem>>, %arg15: memref<128x128xbf16, #tpu.memory_space<vmem>>, %arg16: memref<1x128xf32, #tpu.memory_space<vmem>>, %arg17: memref<1x128xf32, #tpu.memory_space<vmem>>, %arg18: memref<1x128xf32, #tpu.memory_space<vmem>>, %arg19: memref<128x128xbf16, #tpu.memory_space<vmem>>, %arg20: memref<1x128xf32, #tpu.memory_space<vmem>>, %arg21: memref<6x128xf32, #tpu.memory_space<vmem>>) attributes {dimension_semantics = [], scalar_prefetch = 0 : i64, scratch_operands = 0 : i64, tpu.core_type = #tpu.core_type<tc>} {
    %c0 = arith.constant 0 : index
    %c0_0 = arith.constant 0 : index
    %0 = vector.load %arg0[%c0, %c0_0] : memref<6x768xf32, #tpu.memory_space<vmem>>, vector<6x768xf32>
    %c0_1 = arith.constant 0 : index
    %c0_2 = arith.constant 0 : index
    %1 = vector.load %arg1[%c0_1, %c0_2] : memref<768x128xbf16, #tpu.memory_space<vmem>>, vector<768x128xbf16>
    %2 = arith.truncf %0 : vector<6x768xf32> to vector<6x768xbf16>
    %cst = arith.constant dense<0.000000e+00> : vector<6x128xf32>
    %3 = tpu.matmul %2, %1, %cst {dimension_numbers = #tpu.dot_dimension_numbers<[1], [0], [0], [1], [0, 0, 1, 1], [], []>} : vector<6x768xbf16>, vector<768x128xbf16>, vector<6x128xf32> -> vector<6x128xf32>
    %c0_3 = arith.constant 0 : index
    %c0_4 = arith.constant 0 : index
    %4 = vector.load %arg2[%c0_3, %c0_4] : memref<1x128xf32, #tpu.memory_space<vmem>>, vector<1x128xf32>
    %5 = vector.broadcast %4 : vector<1x128xf32> to vector<6x128xf32>
    %6 = arith.addf %3, %5 : vector<6x128xf32>
    %c0_5 = arith.constant 0 : index
    %c0_6 = arith.constant 0 : index
    %7 = vector.load %arg3[%c0_5, %c0_6] : memref<128x128xbf16, #tpu.memory_space<vmem>>, vector<128x128xbf16>
    %8 = arith.truncf %6 : vector<6x128xf32> to vector<6x128xbf16>
    %cst_7 = arith.constant dense<0.000000e+00> : vector<6x128xf32>
    %9 = tpu.matmul %8, %7, %cst_7 {dimension_numbers = #tpu.dot_dimension_numbers<[1], [0], [0], [1], [0, 0, 1, 1], [], []>} : vector<6x128xbf16>, vector<128x128xbf16>, vector<6x128xf32> -> vector<6x128xf32>
    %c0_8 = arith.constant 0 : index
    %c0_9 = arith.constant 0 : index
    %10 = vector.load %arg4[%c0_8, %c0_9] : memref<1x128xf32, #tpu.memory_space<vmem>>, vector<1x128xf32>
    %11 = vector.broadcast %10 : vector<1x128xf32> to vector<6x128xf32>
    %12 = arith.addf %9, %11 : vector<6x128xf32>
    %c0_10 = arith.constant 0 : index
    %c0_11 = arith.constant 0 : index
    %13 = vector.load %arg5[%c0_10, %c0_11] : memref<1x128xf32, #tpu.memory_space<vmem>>, vector<1x128xf32>
    %c0_12 = arith.constant 0 : index
    %c0_13 = arith.constant 0 : index
    %14 = vector.load %arg6[%c0_12, %c0_13] : memref<1x128xf32, #tpu.memory_space<vmem>>, vector<1x128xf32>
    %15 = vector.extract_strided_slice %12 {offsets = [0, 0], sizes = [2, 128], strides = [1, 1]} : vector<6x128xf32> to vector<2x128xf32>
    %cst_14 = arith.constant dense<0.000000e+00> : vector<128xf32>
    %16 = vector.multi_reduction <add>, %15, %cst_14 [0] : vector<2x128xf32> to vector<128xf32>
    %17 = vector.shape_cast %16 : vector<128xf32> to vector<1x128xf32>
    %cst_15 = arith.constant 2.000000e+00 : f32
    %18 = vector.broadcast %cst_15 : f32 to vector<1x128xf32>
    %19 = arith.divf %17, %18 : vector<1x128xf32>
    %20 = vector.broadcast %19 : vector<1x128xf32> to vector<2x128xf32>
    %21 = arith.subf %15, %20 : vector<2x128xf32>
    %22 = arith.mulf %21, %21 : vector<2x128xf32>
    %cst_16 = arith.constant dense<0.000000e+00> : vector<128xf32>
    %23 = vector.multi_reduction <add>, %22, %cst_16 [0] : vector<2x128xf32> to vector<128xf32>
    %24 = vector.shape_cast %23 : vector<128xf32> to vector<1x128xf32>
    %cst_17 = arith.constant 2.000000e+00 : f32
    %25 = vector.broadcast %cst_17 : f32 to vector<1x128xf32>
    %26 = arith.divf %24, %25 : vector<1x128xf32>
    %27 = vector.broadcast %19 : vector<1x128xf32> to vector<2x128xf32>
    %28 = arith.subf %15, %27 : vector<2x128xf32>
    %cst_18 = arith.constant 9.99999974E-6 : f32
    %29 = vector.broadcast %cst_18 : f32 to vector<1x128xf32>
    %30 = arith.addf %26, %29 : vector<1x128xf32>
    %31 = math.rsqrt %30 : vector<1x128xf32>
    %32 = vector.broadcast %31 : vector<1x128xf32> to vector<2x128xf32>
    %33 = arith.mulf %28, %32 : vector<2x128xf32>
    %34 = vector.extract_strided_slice %12 {offsets = [2, 0], sizes = [2, 128], strides = [1, 1]} : vector<6x128xf32> to vector<2x128xf32>
    %cst_19 = arith.constant dense<0.000000e+00> : vector<128xf32>
    %35 = vector.multi_reduction <add>, %34, %cst_19 [0] : vector<2x128xf32> to vector<128xf32>
    %36 = vector.shape_cast %35 : vector<128xf32> to vector<1x128xf32>
    %cst_20 = arith.constant 2.000000e+00 : f32
    %37 = vector.broadcast %cst_20 : f32 to vector<1x128xf32>
    %38 = arith.divf %36, %37 : vector<1x128xf32>
    %39 = vector.broadcast %38 : vector<1x128xf32> to vector<2x128xf32>
    %40 = arith.subf %34, %39 : vector<2x128xf32>
    %41 = arith.mulf %40, %40 : vector<2x128xf32>
    %cst_21 = arith.constant dense<0.000000e+00> : vector<128xf32>
    %42 = vector.multi_reduction <add>, %41, %cst_21 [0] : vector<2x128xf32> to vector<128xf32>
    %43 = vector.shape_cast %42 : vector<128xf32> to vector<1x128xf32>
    %cst_22 = arith.constant 2.000000e+00 : f32
    %44 = vector.broadcast %cst_22 : f32 to vector<1x128xf32>
    %45 = arith.divf %43, %44 : vector<1x128xf32>
    %46 = vector.broadcast %38 : vector<1x128xf32> to vector<2x128xf32>
    %47 = arith.subf %34, %46 : vector<2x128xf32>
    %cst_23 = arith.constant 9.99999974E-6 : f32
    %48 = vector.broadcast %cst_23 : f32 to vector<1x128xf32>
    %49 = arith.addf %45, %48 : vector<1x128xf32>
    %50 = math.rsqrt %49 : vector<1x128xf32>
    %51 = vector.broadcast %50 : vector<1x128xf32> to vector<2x128xf32>
    %52 = arith.mulf %47, %51 : vector<2x128xf32>
    %53 = vector.extract_strided_slice %12 {offsets = [4, 0], sizes = [2, 128], strides = [1, 1]} : vector<6x128xf32> to vector<2x128xf32>
    %cst_24 = arith.constant dense<0.000000e+00> : vector<128xf32>
    %54 = vector.multi_reduction <add>, %53, %cst_24 [0] : vector<2x128xf32> to vector<128xf32>
    %55 = vector.shape_cast %54 : vector<128xf32> to vector<1x128xf32>
    %cst_25 = arith.constant 2.000000e+00 : f32
    %56 = vector.broadcast %cst_25 : f32 to vector<1x128xf32>
    %57 = arith.divf %55, %56 : vector<1x128xf32>
    %58 = vector.broadcast %57 : vector<1x128xf32> to vector<2x128xf32>
    %59 = arith.subf %53, %58 : vector<2x128xf32>
    %60 = arith.mulf %59, %59 : vector<2x128xf32>
    %cst_26 = arith.constant dense<0.000000e+00> : vector<128xf32>
    %61 = vector.multi_reduction <add>, %60, %cst_26 [0] : vector<2x128xf32> to vector<128xf32>
    %62 = vector.shape_cast %61 : vector<128xf32> to vector<1x128xf32>
    %cst_27 = arith.constant 2.000000e+00 : f32
    %63 = vector.broadcast %cst_27 : f32 to vector<1x128xf32>
    %64 = arith.divf %62, %63 : vector<1x128xf32>
    %65 = vector.broadcast %57 : vector<1x128xf32> to vector<2x128xf32>
    %66 = arith.subf %53, %65 : vector<2x128xf32>
    %cst_28 = arith.constant 9.99999974E-6 : f32
    %67 = vector.broadcast %cst_28 : f32 to vector<1x128xf32>
    %68 = arith.addf %64, %67 : vector<1x128xf32>
    %69 = math.rsqrt %68 : vector<1x128xf32>
    %70 = vector.broadcast %69 : vector<1x128xf32> to vector<2x128xf32>
    %71 = arith.mulf %66, %70 : vector<2x128xf32>
    %72 = tpu.concatenate %33, %52, %71 in 0 : vector<2x128xf32>, vector<2x128xf32>, vector<2x128xf32> -> vector<6x128xf32>
    %73 = vector.broadcast %13 : vector<1x128xf32> to vector<6x128xf32>
    %74 = arith.mulf %72, %73 : vector<6x128xf32>
    %75 = vector.broadcast %14 : vector<1x128xf32> to vector<6x128xf32>
    %76 = arith.addf %74, %75 : vector<6x128xf32>
    %cst_29 = arith.constant 0.000000e+00 : f32
    %77 = vector.broadcast %cst_29 : f32 to vector<6x128xf32>
    %78 = arith.maximumf %76, %77 : vector<6x128xf32>
    %c0_30 = arith.constant 0 : index
    %c0_31 = arith.constant 0 : index
    %79 = vector.load %arg7[%c0_30, %c0_31] : memref<128x128xbf16, #tpu.memory_space<vmem>>, vector<128x128xbf16>
    %80 = arith.truncf %78 : vector<6x128xf32> to vector<6x128xbf16>
    %cst_32 = arith.constant dense<0.000000e+00> : vector<6x128xf32>
    %81 = tpu.matmul %80, %79, %cst_32 {dimension_numbers = #tpu.dot_dimension_numbers<[1], [0], [0], [1], [0, 0, 1, 1], [], []>} : vector<6x128xbf16>, vector<128x128xbf16>, vector<6x128xf32> -> vector<6x128xf32>
    %c0_33 = arith.constant 0 : index
    %c0_34 = arith.constant 0 : index
    %82 = vector.load %arg8[%c0_33, %c0_34] : memref<1x128xf32, #tpu.memory_space<vmem>>, vector<1x128xf32>
    %83 = vector.broadcast %82 : vector<1x128xf32> to vector<6x128xf32>
    %84 = arith.addf %81, %83 : vector<6x128xf32>
    %c0_35 = arith.constant 0 : index
    %c0_36 = arith.constant 0 : index
    %85 = vector.load %arg9[%c0_35, %c0_36] : memref<1x128xf32, #tpu.memory_space<vmem>>, vector<1x128xf32>
    %c0_37 = arith.constant 0 : index
    %c0_38 = arith.constant 0 : index
    %86 = vector.load %arg10[%c0_37, %c0_38] : memref<1x128xf32, #tpu.memory_space<vmem>>, vector<1x128xf32>
    %87 = vector.extract_strided_slice %84 {offsets = [0, 0], sizes = [2, 128], strides = [1, 1]} : vector<6x128xf32> to vector<2x128xf32>
    %cst_39 = arith.constant dense<0.000000e+00> : vector<128xf32>
    %88 = vector.multi_reduction <add>, %87, %cst_39 [0] : vector<2x128xf32> to vector<128xf32>
    %89 = vector.shape_cast %88 : vector<128xf32> to vector<1x128xf32>
    %cst_40 = arith.constant 2.000000e+00 : f32
    %90 = vector.broadcast %cst_40 : f32 to vector<1x128xf32>
    %91 = arith.divf %89, %90 : vector<1x128xf32>
    %92 = vector.broadcast %91 : vector<1x128xf32> to vector<2x128xf32>
    %93 = arith.subf %87, %92 : vector<2x128xf32>
    %94 = arith.mulf %93, %93 : vector<2x128xf32>
    %cst_41 = arith.constant dense<0.000000e+00> : vector<128xf32>
    %95 = vector.multi_reduction <add>, %94, %cst_41 [0] : vector<2x128xf32> to vector<128xf32>
    %96 = vector.shape_cast %95 : vector<128xf32> to vector<1x128xf32>
    %cst_42 = arith.constant 2.000000e+00 : f32
    %97 = vector.broadcast %cst_42 : f32 to vector<1x128xf32>
    %98 = arith.divf %96, %97 : vector<1x128xf32>
    %99 = vector.broadcast %91 : vector<1x128xf32> to vector<2x128xf32>
    %100 = arith.subf %87, %99 : vector<2x128xf32>
    %cst_43 = arith.constant 9.99999974E-6 : f32
    %101 = vector.broadcast %cst_43 : f32 to vector<1x128xf32>
    %102 = arith.addf %98, %101 : vector<1x128xf32>
    %103 = math.rsqrt %102 : vector<1x128xf32>
    %104 = vector.broadcast %103 : vector<1x128xf32> to vector<2x128xf32>
    %105 = arith.mulf %100, %104 : vector<2x128xf32>
    %106 = vector.extract_strided_slice %84 {offsets = [2, 0], sizes = [2, 128], strides = [1, 1]} : vector<6x128xf32> to vector<2x128xf32>
    %cst_44 = arith.constant dense<0.000000e+00> : vector<128xf32>
    %107 = vector.multi_reduction <add>, %106, %cst_44 [0] : vector<2x128xf32> to vector<128xf32>
    %108 = vector.shape_cast %107 : vector<128xf32> to vector<1x128xf32>
    %cst_45 = arith.constant 2.000000e+00 : f32
    %109 = vector.broadcast %cst_45 : f32 to vector<1x128xf32>
    %110 = arith.divf %108, %109 : vector<1x128xf32>
    %111 = vector.broadcast %110 : vector<1x128xf32> to vector<2x128xf32>
    %112 = arith.subf %106, %111 : vector<2x128xf32>
    %113 = arith.mulf %112, %112 : vector<2x128xf32>
    %cst_46 = arith.constant dense<0.000000e+00> : vector<128xf32>
    %114 = vector.multi_reduction <add>, %113, %cst_46 [0] : vector<2x128xf32> to vector<128xf32>
    %115 = vector.shape_cast %114 : vector<128xf32> to vector<1x128xf32>
    %cst_47 = arith.constant 2.000000e+00 : f32
    %116 = vector.broadcast %cst_47 : f32 to vector<1x128xf32>
    %117 = arith.divf %115, %116 : vector<1x128xf32>
    %118 = vector.broadcast %110 : vector<1x128xf32> to vector<2x128xf32>
    %119 = arith.subf %106, %118 : vector<2x128xf32>
    %cst_48 = arith.constant 9.99999974E-6 : f32
    %120 = vector.broadcast %cst_48 : f32 to vector<1x128xf32>
    %121 = arith.addf %117, %120 : vector<1x128xf32>
    %122 = math.rsqrt %121 : vector<1x128xf32>
    %123 = vector.broadcast %122 : vector<1x128xf32> to vector<2x128xf32>
    %124 = arith.mulf %119, %123 : vector<2x128xf32>
    %125 = vector.extract_strided_slice %84 {offsets = [4, 0], sizes = [2, 128], strides = [1, 1]} : vector<6x128xf32> to vector<2x128xf32>
    %cst_49 = arith.constant dense<0.000000e+00> : vector<128xf32>
    %126 = vector.multi_reduction <add>, %125, %cst_49 [0] : vector<2x128xf32> to vector<128xf32>
    %127 = vector.shape_cast %126 : vector<128xf32> to vector<1x128xf32>
    %cst_50 = arith.constant 2.000000e+00 : f32
    %128 = vector.broadcast %cst_50 : f32 to vector<1x128xf32>
    %129 = arith.divf %127, %128 : vector<1x128xf32>
    %130 = vector.broadcast %129 : vector<1x128xf32> to vector<2x128xf32>
    %131 = arith.subf %125, %130 : vector<2x128xf32>
    %132 = arith.mulf %131, %131 : vector<2x128xf32>
    %cst_51 = arith.constant dense<0.000000e+00> : vector<128xf32>
    %133 = vector.multi_reduction <add>, %132, %cst_51 [0] : vector<2x128xf32> to vector<128xf32>
    %134 = vector.shape_cast %133 : vector<128xf32> to vector<1x128xf32>
    %cst_52 = arith.constant 2.000000e+00 : f32
    %135 = vector.broadcast %cst_52 : f32 to vector<1x128xf32>
    %136 = arith.divf %134, %135 : vector<1x128xf32>
    %137 = vector.broadcast %129 : vector<1x128xf32> to vector<2x128xf32>
    %138 = arith.subf %125, %137 : vector<2x128xf32>
    %cst_53 = arith.constant 9.99999974E-6 : f32
    %139 = vector.broadcast %cst_53 : f32 to vector<1x128xf32>
    %140 = arith.addf %136, %139 : vector<1x128xf32>
    %141 = math.rsqrt %140 : vector<1x128xf32>
    %142 = vector.broadcast %141 : vector<1x128xf32> to vector<2x128xf32>
    %143 = arith.mulf %138, %142 : vector<2x128xf32>
    %144 = tpu.concatenate %105, %124, %143 in 0 : vector<2x128xf32>, vector<2x128xf32>, vector<2x128xf32> -> vector<6x128xf32>
    %145 = vector.broadcast %85 : vector<1x128xf32> to vector<6x128xf32>
    %146 = arith.mulf %144, %145 : vector<6x128xf32>
    %147 = vector.broadcast %86 : vector<1x128xf32> to vector<6x128xf32>
    %148 = arith.addf %146, %147 : vector<6x128xf32>
    %cst_54 = arith.constant 0.000000e+00 : f32
    %149 = vector.broadcast %cst_54 : f32 to vector<6x128xf32>
    %150 = arith.maximumf %148, %149 : vector<6x128xf32>
    %c0_55 = arith.constant 0 : index
    %c0_56 = arith.constant 0 : index
    %151 = vector.load %arg11[%c0_55, %c0_56] : memref<128x128xbf16, #tpu.memory_space<vmem>>, vector<128x128xbf16>
    %152 = arith.truncf %150 : vector<6x128xf32> to vector<6x128xbf16>
    %cst_57 = arith.constant dense<0.000000e+00> : vector<6x128xf32>
    %153 = tpu.matmul %152, %151, %cst_57 {dimension_numbers = #tpu.dot_dimension_numbers<[1], [0], [0], [1], [0, 0, 1, 1], [], []>} : vector<6x128xbf16>, vector<128x128xbf16>, vector<6x128xf32> -> vector<6x128xf32>
    %c0_58 = arith.constant 0 : index
    %c0_59 = arith.constant 0 : index
    %154 = vector.load %arg12[%c0_58, %c0_59] : memref<1x128xf32, #tpu.memory_space<vmem>>, vector<1x128xf32>
    %155 = vector.broadcast %154 : vector<1x128xf32> to vector<6x128xf32>
    %156 = arith.addf %153, %155 : vector<6x128xf32>
    %c0_60 = arith.constant 0 : index
    %c0_61 = arith.constant 0 : index
    %157 = vector.load %arg13[%c0_60, %c0_61] : memref<1x128xf32, #tpu.memory_space<vmem>>, vector<1x128xf32>
    %c0_62 = arith.constant 0 : index
    %c0_63 = arith.constant 0 : index
    %158 = vector.load %arg14[%c0_62, %c0_63] : memref<1x128xf32, #tpu.memory_space<vmem>>, vector<1x128xf32>
    %159 = vector.extract_strided_slice %156 {offsets = [0, 0], sizes = [2, 128], strides = [1, 1]} : vector<6x128xf32> to vector<2x128xf32>
    %cst_64 = arith.constant dense<0.000000e+00> : vector<128xf32>
    %160 = vector.multi_reduction <add>, %159, %cst_64 [0] : vector<2x128xf32> to vector<128xf32>
    %161 = vector.shape_cast %160 : vector<128xf32> to vector<1x128xf32>
    %cst_65 = arith.constant 2.000000e+00 : f32
    %162 = vector.broadcast %cst_65 : f32 to vector<1x128xf32>
    %163 = arith.divf %161, %162 : vector<1x128xf32>
    %164 = vector.broadcast %163 : vector<1x128xf32> to vector<2x128xf32>
    %165 = arith.subf %159, %164 : vector<2x128xf32>
    %166 = arith.mulf %165, %165 : vector<2x128xf32>
    %cst_66 = arith.constant dense<0.000000e+00> : vector<128xf32>
    %167 = vector.multi_reduction <add>, %166, %cst_66 [0] : vector<2x128xf32> to vector<128xf32>
    %168 = vector.shape_cast %167 : vector<128xf32> to vector<1x128xf32>
    %cst_67 = arith.constant 2.000000e+00 : f32
    %169 = vector.broadcast %cst_67 : f32 to vector<1x128xf32>
    %170 = arith.divf %168, %169 : vector<1x128xf32>
    %171 = vector.broadcast %163 : vector<1x128xf32> to vector<2x128xf32>
    %172 = arith.subf %159, %171 : vector<2x128xf32>
    %cst_68 = arith.constant 9.99999974E-6 : f32
    %173 = vector.broadcast %cst_68 : f32 to vector<1x128xf32>
    %174 = arith.addf %170, %173 : vector<1x128xf32>
    %175 = math.rsqrt %174 : vector<1x128xf32>
    %176 = vector.broadcast %175 : vector<1x128xf32> to vector<2x128xf32>
    %177 = arith.mulf %172, %176 : vector<2x128xf32>
    %178 = vector.extract_strided_slice %156 {offsets = [2, 0], sizes = [2, 128], strides = [1, 1]} : vector<6x128xf32> to vector<2x128xf32>
    %cst_69 = arith.constant dense<0.000000e+00> : vector<128xf32>
    %179 = vector.multi_reduction <add>, %178, %cst_69 [0] : vector<2x128xf32> to vector<128xf32>
    %180 = vector.shape_cast %179 : vector<128xf32> to vector<1x128xf32>
    %cst_70 = arith.constant 2.000000e+00 : f32
    %181 = vector.broadcast %cst_70 : f32 to vector<1x128xf32>
    %182 = arith.divf %180, %181 : vector<1x128xf32>
    %183 = vector.broadcast %182 : vector<1x128xf32> to vector<2x128xf32>
    %184 = arith.subf %178, %183 : vector<2x128xf32>
    %185 = arith.mulf %184, %184 : vector<2x128xf32>
    %cst_71 = arith.constant dense<0.000000e+00> : vector<128xf32>
    %186 = vector.multi_reduction <add>, %185, %cst_71 [0] : vector<2x128xf32> to vector<128xf32>
    %187 = vector.shape_cast %186 : vector<128xf32> to vector<1x128xf32>
    %cst_72 = arith.constant 2.000000e+00 : f32
    %188 = vector.broadcast %cst_72 : f32 to vector<1x128xf32>
    %189 = arith.divf %187, %188 : vector<1x128xf32>
    %190 = vector.broadcast %182 : vector<1x128xf32> to vector<2x128xf32>
    %191 = arith.subf %178, %190 : vector<2x128xf32>
    %cst_73 = arith.constant 9.99999974E-6 : f32
    %192 = vector.broadcast %cst_73 : f32 to vector<1x128xf32>
    %193 = arith.addf %189, %192 : vector<1x128xf32>
    %194 = math.rsqrt %193 : vector<1x128xf32>
    %195 = vector.broadcast %194 : vector<1x128xf32> to vector<2x128xf32>
    %196 = arith.mulf %191, %195 : vector<2x128xf32>
    %197 = vector.extract_strided_slice %156 {offsets = [4, 0], sizes = [2, 128], strides = [1, 1]} : vector<6x128xf32> to vector<2x128xf32>
    %cst_74 = arith.constant dense<0.000000e+00> : vector<128xf32>
    %198 = vector.multi_reduction <add>, %197, %cst_74 [0] : vector<2x128xf32> to vector<128xf32>
    %199 = vector.shape_cast %198 : vector<128xf32> to vector<1x128xf32>
    %cst_75 = arith.constant 2.000000e+00 : f32
    %200 = vector.broadcast %cst_75 : f32 to vector<1x128xf32>
    %201 = arith.divf %199, %200 : vector<1x128xf32>
    %202 = vector.broadcast %201 : vector<1x128xf32> to vector<2x128xf32>
    %203 = arith.subf %197, %202 : vector<2x128xf32>
    %204 = arith.mulf %203, %203 : vector<2x128xf32>
    %cst_76 = arith.constant dense<0.000000e+00> : vector<128xf32>
    %205 = vector.multi_reduction <add>, %204, %cst_76 [0] : vector<2x128xf32> to vector<128xf32>
    %206 = vector.shape_cast %205 : vector<128xf32> to vector<1x128xf32>
    %cst_77 = arith.constant 2.000000e+00 : f32
    %207 = vector.broadcast %cst_77 : f32 to vector<1x128xf32>
    %208 = arith.divf %206, %207 : vector<1x128xf32>
    %209 = vector.broadcast %201 : vector<1x128xf32> to vector<2x128xf32>
    %210 = arith.subf %197, %209 : vector<2x128xf32>
    %cst_78 = arith.constant 9.99999974E-6 : f32
    %211 = vector.broadcast %cst_78 : f32 to vector<1x128xf32>
    %212 = arith.addf %208, %211 : vector<1x128xf32>
    %213 = math.rsqrt %212 : vector<1x128xf32>
    %214 = vector.broadcast %213 : vector<1x128xf32> to vector<2x128xf32>
    %215 = arith.mulf %210, %214 : vector<2x128xf32>
    %216 = tpu.concatenate %177, %196, %215 in 0 : vector<2x128xf32>, vector<2x128xf32>, vector<2x128xf32> -> vector<6x128xf32>
    %217 = vector.broadcast %157 : vector<1x128xf32> to vector<6x128xf32>
    %218 = arith.mulf %216, %217 : vector<6x128xf32>
    %219 = vector.broadcast %158 : vector<1x128xf32> to vector<6x128xf32>
    %220 = arith.addf %218, %219 : vector<6x128xf32>
    %c0_79 = arith.constant 0 : index
    %c0_80 = arith.constant 0 : index
    %221 = vector.load %arg15[%c0_79, %c0_80] : memref<128x128xbf16, #tpu.memory_space<vmem>>, vector<128x128xbf16>
    %222 = arith.truncf %220 : vector<6x128xf32> to vector<6x128xbf16>
    %cst_81 = arith.constant dense<0.000000e+00> : vector<6x128xf32>
    %223 = tpu.matmul %222, %221, %cst_81 {dimension_numbers = #tpu.dot_dimension_numbers<[1], [0], [0], [1], [0, 0, 1, 1], [], []>} : vector<6x128xbf16>, vector<128x128xbf16>, vector<6x128xf32> -> vector<6x128xf32>
    %c0_82 = arith.constant 0 : index
    %c0_83 = arith.constant 0 : index
    %224 = vector.load %arg16[%c0_82, %c0_83] : memref<1x128xf32, #tpu.memory_space<vmem>>, vector<1x128xf32>
    %225 = vector.broadcast %224 : vector<1x128xf32> to vector<6x128xf32>
    %226 = arith.addf %223, %225 : vector<6x128xf32>
    %c0_84 = arith.constant 0 : index
    %c0_85 = arith.constant 0 : index
    %227 = vector.load %arg17[%c0_84, %c0_85] : memref<1x128xf32, #tpu.memory_space<vmem>>, vector<1x128xf32>
    %c0_86 = arith.constant 0 : index
    %c0_87 = arith.constant 0 : index
    %228 = vector.load %arg18[%c0_86, %c0_87] : memref<1x128xf32, #tpu.memory_space<vmem>>, vector<1x128xf32>
    %229 = vector.extract_strided_slice %226 {offsets = [0, 0], sizes = [2, 128], strides = [1, 1]} : vector<6x128xf32> to vector<2x128xf32>
    %cst_88 = arith.constant dense<0.000000e+00> : vector<128xf32>
    %230 = vector.multi_reduction <add>, %229, %cst_88 [0] : vector<2x128xf32> to vector<128xf32>
    %231 = vector.shape_cast %230 : vector<128xf32> to vector<1x128xf32>
    %cst_89 = arith.constant 2.000000e+00 : f32
    %232 = vector.broadcast %cst_89 : f32 to vector<1x128xf32>
    %233 = arith.divf %231, %232 : vector<1x128xf32>
    %234 = vector.broadcast %233 : vector<1x128xf32> to vector<2x128xf32>
    %235 = arith.subf %229, %234 : vector<2x128xf32>
    %236 = arith.mulf %235, %235 : vector<2x128xf32>
    %cst_90 = arith.constant dense<0.000000e+00> : vector<128xf32>
    %237 = vector.multi_reduction <add>, %236, %cst_90 [0] : vector<2x128xf32> to vector<128xf32>
    %238 = vector.shape_cast %237 : vector<128xf32> to vector<1x128xf32>
    %cst_91 = arith.constant 2.000000e+00 : f32
    %239 = vector.broadcast %cst_91 : f32 to vector<1x128xf32>
    %240 = arith.divf %238, %239 : vector<1x128xf32>
    %241 = vector.broadcast %233 : vector<1x128xf32> to vector<2x128xf32>
    %242 = arith.subf %229, %241 : vector<2x128xf32>
    %cst_92 = arith.constant 9.99999974E-6 : f32
    %243 = vector.broadcast %cst_92 : f32 to vector<1x128xf32>
    %244 = arith.addf %240, %243 : vector<1x128xf32>
    %245 = math.rsqrt %244 : vector<1x128xf32>
    %246 = vector.broadcast %245 : vector<1x128xf32> to vector<2x128xf32>
    %247 = arith.mulf %242, %246 : vector<2x128xf32>
    %248 = vector.extract_strided_slice %226 {offsets = [2, 0], sizes = [2, 128], strides = [1, 1]} : vector<6x128xf32> to vector<2x128xf32>
    %cst_93 = arith.constant dense<0.000000e+00> : vector<128xf32>
    %249 = vector.multi_reduction <add>, %248, %cst_93 [0] : vector<2x128xf32> to vector<128xf32>
    %250 = vector.shape_cast %249 : vector<128xf32> to vector<1x128xf32>
    %cst_94 = arith.constant 2.000000e+00 : f32
    %251 = vector.broadcast %cst_94 : f32 to vector<1x128xf32>
    %252 = arith.divf %250, %251 : vector<1x128xf32>
    %253 = vector.broadcast %252 : vector<1x128xf32> to vector<2x128xf32>
    %254 = arith.subf %248, %253 : vector<2x128xf32>
    %255 = arith.mulf %254, %254 : vector<2x128xf32>
    %cst_95 = arith.constant dense<0.000000e+00> : vector<128xf32>
    %256 = vector.multi_reduction <add>, %255, %cst_95 [0] : vector<2x128xf32> to vector<128xf32>
    %257 = vector.shape_cast %256 : vector<128xf32> to vector<1x128xf32>
    %cst_96 = arith.constant 2.000000e+00 : f32
    %258 = vector.broadcast %cst_96 : f32 to vector<1x128xf32>
    %259 = arith.divf %257, %258 : vector<1x128xf32>
    %260 = vector.broadcast %252 : vector<1x128xf32> to vector<2x128xf32>
    %261 = arith.subf %248, %260 : vector<2x128xf32>
    %cst_97 = arith.constant 9.99999974E-6 : f32
    %262 = vector.broadcast %cst_97 : f32 to vector<1x128xf32>
    %263 = arith.addf %259, %262 : vector<1x128xf32>
    %264 = math.rsqrt %263 : vector<1x128xf32>
    %265 = vector.broadcast %264 : vector<1x128xf32> to vector<2x128xf32>
    %266 = arith.mulf %261, %265 : vector<2x128xf32>
    %267 = vector.extract_strided_slice %226 {offsets = [4, 0], sizes = [2, 128], strides = [1, 1]} : vector<6x128xf32> to vector<2x128xf32>
    %cst_98 = arith.constant dense<0.000000e+00> : vector<128xf32>
    %268 = vector.multi_reduction <add>, %267, %cst_98 [0] : vector<2x128xf32> to vector<128xf32>
    %269 = vector.shape_cast %268 : vector<128xf32> to vector<1x128xf32>
    %cst_99 = arith.constant 2.000000e+00 : f32
    %270 = vector.broadcast %cst_99 : f32 to vector<1x128xf32>
    %271 = arith.divf %269, %270 : vector<1x128xf32>
    %272 = vector.broadcast %271 : vector<1x128xf32> to vector<2x128xf32>
    %273 = arith.subf %267, %272 : vector<2x128xf32>
    %274 = arith.mulf %273, %273 : vector<2x128xf32>
    %cst_100 = arith.constant dense<0.000000e+00> : vector<128xf32>
    %275 = vector.multi_reduction <add>, %274, %cst_100 [0] : vector<2x128xf32> to vector<128xf32>
    %276 = vector.shape_cast %275 : vector<128xf32> to vector<1x128xf32>
    %cst_101 = arith.constant 2.000000e+00 : f32
    %277 = vector.broadcast %cst_101 : f32 to vector<1x128xf32>
    %278 = arith.divf %276, %277 : vector<1x128xf32>
    %279 = vector.broadcast %271 : vector<1x128xf32> to vector<2x128xf32>
    %280 = arith.subf %267, %279 : vector<2x128xf32>
    %cst_102 = arith.constant 9.99999974E-6 : f32
    %281 = vector.broadcast %cst_102 : f32 to vector<1x128xf32>
    %282 = arith.addf %278, %281 : vector<1x128xf32>
    %283 = math.rsqrt %282 : vector<1x128xf32>
    %284 = vector.broadcast %283 : vector<1x128xf32> to vector<2x128xf32>
    %285 = arith.mulf %280, %284 : vector<2x128xf32>
    %286 = tpu.concatenate %247, %266, %285 in 0 : vector<2x128xf32>, vector<2x128xf32>, vector<2x128xf32> -> vector<6x128xf32>
    %287 = vector.broadcast %227 : vector<1x128xf32> to vector<6x128xf32>
    %288 = arith.mulf %286, %287 : vector<6x128xf32>
    %289 = vector.broadcast %228 : vector<1x128xf32> to vector<6x128xf32>
    %290 = arith.addf %288, %289 : vector<6x128xf32>
    %cst_103 = arith.constant 0.000000e+00 : f32
    %291 = vector.broadcast %cst_103 : f32 to vector<6x128xf32>
    %292 = arith.maximumf %290, %291 : vector<6x128xf32>
    %c0_104 = arith.constant 0 : index
    %c0_105 = arith.constant 0 : index
    %293 = vector.load %arg19[%c0_104, %c0_105] : memref<128x128xbf16, #tpu.memory_space<vmem>>, vector<128x128xbf16>
    %294 = arith.truncf %292 : vector<6x128xf32> to vector<6x128xbf16>
    %cst_106 = arith.constant dense<0.000000e+00> : vector<6x128xf32>
    %295 = tpu.matmul %294, %293, %cst_106 {dimension_numbers = #tpu.dot_dimension_numbers<[1], [0], [0], [1], [0, 0, 1, 1], [], []>} : vector<6x128xbf16>, vector<128x128xbf16>, vector<6x128xf32> -> vector<6x128xf32>
    %c0_107 = arith.constant 0 : index
    %c0_108 = arith.constant 0 : index
    %296 = vector.load %arg20[%c0_107, %c0_108] : memref<1x128xf32, #tpu.memory_space<vmem>>, vector<1x128xf32>
    %297 = vector.broadcast %296 : vector<1x128xf32> to vector<6x128xf32>
    %298 = arith.addf %295, %297 : vector<6x128xf32>
    %c0_109 = arith.constant 0 : index
    %c0_110 = arith.constant 0 : index
    %299 = vector.load %arg21[%c0_109, %c0_110] : memref<6x128xf32, #tpu.memory_space<vmem>>, vector<6x128xf32>
    tpu.vector_store %arg21[%c0_109, %c0_110], %298 {strides = array<i32>} : memref<6x128xf32, #tpu.memory_space<vmem>>, vector<6x128xf32>,
    return
  }
}

module attributes {stable_mosaic.version = 11 : i64} {
  func.func @_split_kernel(%arg0: memref<16x192xf32, #tpu.memory_space<vmem>>, %arg1: memref<192x128xbf16, #tpu.memory_space<vmem>>, %arg2: memref<1x128xf32, #tpu.memory_space<vmem>>, %arg3: memref<128x128xbf16, #tpu.memory_space<vmem>>, %arg4: memref<1x128xf32, #tpu.memory_space<vmem>>, %arg5: memref<1x128xf32, #tpu.memory_space<vmem>>, %arg6: memref<1x128xf32, #tpu.memory_space<vmem>>, %arg7: memref<128x128xbf16, #tpu.memory_space<vmem>>, %arg8: memref<1x128xf32, #tpu.memory_space<vmem>>, %arg9: memref<1x128xf32, #tpu.memory_space<vmem>>, %arg10: memref<1x128xf32, #tpu.memory_space<vmem>>, %arg11: memref<128x128xbf16, #tpu.memory_space<vmem>>, %arg12: memref<1x128xf32, #tpu.memory_space<vmem>>, %arg13: memref<1x128xf32, #tpu.memory_space<vmem>>, %arg14: memref<1x128xf32, #tpu.memory_space<vmem>>, %arg15: memref<24x128xf32, #tpu.memory_space<vmem>>) attributes {dimension_semantics = [], scalar_prefetch = 0 : i64, scratch_operands = 0 : i64, tpu.core_type = #tpu.core_type<tc>} {
    %c0 = arith.constant 0 : index
    %c0_0 = arith.constant 0 : index
    %0 = vector.load %arg0[%c0, %c0_0] : memref<16x192xf32, #tpu.memory_space<vmem>>, vector<16x192xf32>
    %c0_1 = arith.constant 0 : index
    %c0_2 = arith.constant 0 : index
    %1 = vector.load %arg1[%c0_1, %c0_2] : memref<192x128xbf16, #tpu.memory_space<vmem>>, vector<192x128xbf16>
    %2 = arith.truncf %0 : vector<16x192xf32> to vector<16x192xbf16>
    %cst = arith.constant dense<0.000000e+00> : vector<16x128xf32>
    %3 = tpu.matmul %2, %1, %cst {dimension_numbers = #tpu.dot_dimension_numbers<[1], [0], [0], [1], [0, 0, 1, 1], [], []>} : vector<16x192xbf16>, vector<192x128xbf16>, vector<16x128xf32> -> vector<16x128xf32>
    %c0_3 = arith.constant 0 : index
    %c0_4 = arith.constant 0 : index
    %4 = vector.load %arg2[%c0_3, %c0_4] : memref<1x128xf32, #tpu.memory_space<vmem>>, vector<1x128xf32>
    %5 = vector.broadcast %4 : vector<1x128xf32> to vector<16x128xf32>
    %6 = arith.addf %3, %5 : vector<16x128xf32>
    %7 = vector.extract_strided_slice %6 {offsets = [0, 0], sizes = [2, 128], strides = [1, 1]} : vector<16x128xf32> to vector<2x128xf32>
    %8 = vector.extract_strided_slice %6 {offsets = [2, 0], sizes = [2, 128], strides = [1, 1]} : vector<16x128xf32> to vector<2x128xf32>
    %9 = arith.addf %7, %8 : vector<2x128xf32>
    %cst_5 = arith.constant 5.000000e-01 : f32
    %10 = vector.broadcast %cst_5 : f32 to vector<2x128xf32>
    %11 = arith.mulf %9, %10 : vector<2x128xf32>
    %12 = vector.extract_strided_slice %6 {offsets = [0, 0], sizes = [2, 128], strides = [1, 1]} : vector<16x128xf32> to vector<2x128xf32>
    %13 = vector.extract_strided_slice %6 {offsets = [4, 0], sizes = [2, 128], strides = [1, 1]} : vector<16x128xf32> to vector<2x128xf32>
    %14 = arith.addf %12, %13 : vector<2x128xf32>
    %cst_6 = arith.constant 5.000000e-01 : f32
    %15 = vector.broadcast %cst_6 : f32 to vector<2x128xf32>
    %16 = arith.mulf %14, %15 : vector<2x128xf32>
    %17 = vector.extract_strided_slice %6 {offsets = [0, 0], sizes = [2, 128], strides = [1, 1]} : vector<16x128xf32> to vector<2x128xf32>
    %18 = vector.extract_strided_slice %6 {offsets = [6, 0], sizes = [2, 128], strides = [1, 1]} : vector<16x128xf32> to vector<2x128xf32>
    %19 = arith.addf %17, %18 : vector<2x128xf32>
    %cst_7 = arith.constant 5.000000e-01 : f32
    %20 = vector.broadcast %cst_7 : f32 to vector<2x128xf32>
    %21 = arith.mulf %19, %20 : vector<2x128xf32>
    %22 = vector.extract_strided_slice %6 {offsets = [2, 0], sizes = [2, 128], strides = [1, 1]} : vector<16x128xf32> to vector<2x128xf32>
    %23 = vector.extract_strided_slice %6 {offsets = [4, 0], sizes = [2, 128], strides = [1, 1]} : vector<16x128xf32> to vector<2x128xf32>
    %24 = arith.addf %22, %23 : vector<2x128xf32>
    %cst_8 = arith.constant 5.000000e-01 : f32
    %25 = vector.broadcast %cst_8 : f32 to vector<2x128xf32>
    %26 = arith.mulf %24, %25 : vector<2x128xf32>
    %27 = vector.extract_strided_slice %6 {offsets = [2, 0], sizes = [2, 128], strides = [1, 1]} : vector<16x128xf32> to vector<2x128xf32>
    %28 = vector.extract_strided_slice %6 {offsets = [6, 0], sizes = [2, 128], strides = [1, 1]} : vector<16x128xf32> to vector<2x128xf32>
    %29 = arith.addf %27, %28 : vector<2x128xf32>
    %cst_9 = arith.constant 5.000000e-01 : f32
    %30 = vector.broadcast %cst_9 : f32 to vector<2x128xf32>
    %31 = arith.mulf %29, %30 : vector<2x128xf32>
    %32 = vector.extract_strided_slice %6 {offsets = [4, 0], sizes = [2, 128], strides = [1, 1]} : vector<16x128xf32> to vector<2x128xf32>
    %33 = vector.extract_strided_slice %6 {offsets = [6, 0], sizes = [2, 128], strides = [1, 1]} : vector<16x128xf32> to vector<2x128xf32>
    %34 = arith.addf %32, %33 : vector<2x128xf32>
    %cst_10 = arith.constant 5.000000e-01 : f32
    %35 = vector.broadcast %cst_10 : f32 to vector<2x128xf32>
    %36 = arith.mulf %34, %35 : vector<2x128xf32>
    %37 = vector.extract_strided_slice %6 {offsets = [8, 0], sizes = [2, 128], strides = [1, 1]} : vector<16x128xf32> to vector<2x128xf32>
    %38 = vector.extract_strided_slice %6 {offsets = [10, 0], sizes = [2, 128], strides = [1, 1]} : vector<16x128xf32> to vector<2x128xf32>
    %39 = arith.addf %37, %38 : vector<2x128xf32>
    %cst_11 = arith.constant 5.000000e-01 : f32
    %40 = vector.broadcast %cst_11 : f32 to vector<2x128xf32>
    %41 = arith.mulf %39, %40 : vector<2x128xf32>
    %42 = vector.extract_strided_slice %6 {offsets = [8, 0], sizes = [2, 128], strides = [1, 1]} : vector<16x128xf32> to vector<2x128xf32>
    %43 = vector.extract_strided_slice %6 {offsets = [12, 0], sizes = [2, 128], strides = [1, 1]} : vector<16x128xf32> to vector<2x128xf32>
    %44 = arith.addf %42, %43 : vector<2x128xf32>
    %cst_12 = arith.constant 5.000000e-01 : f32
    %45 = vector.broadcast %cst_12 : f32 to vector<2x128xf32>
    %46 = arith.mulf %44, %45 : vector<2x128xf32>
    %47 = vector.extract_strided_slice %6 {offsets = [8, 0], sizes = [2, 128], strides = [1, 1]} : vector<16x128xf32> to vector<2x128xf32>
    %48 = vector.extract_strided_slice %6 {offsets = [14, 0], sizes = [2, 128], strides = [1, 1]} : vector<16x128xf32> to vector<2x128xf32>
    %49 = arith.addf %47, %48 : vector<2x128xf32>
    %cst_13 = arith.constant 5.000000e-01 : f32
    %50 = vector.broadcast %cst_13 : f32 to vector<2x128xf32>
    %51 = arith.mulf %49, %50 : vector<2x128xf32>
    %52 = vector.extract_strided_slice %6 {offsets = [10, 0], sizes = [2, 128], strides = [1, 1]} : vector<16x128xf32> to vector<2x128xf32>
    %53 = vector.extract_strided_slice %6 {offsets = [12, 0], sizes = [2, 128], strides = [1, 1]} : vector<16x128xf32> to vector<2x128xf32>
    %54 = arith.addf %52, %53 : vector<2x128xf32>
    %cst_14 = arith.constant 5.000000e-01 : f32
    %55 = vector.broadcast %cst_14 : f32 to vector<2x128xf32>
    %56 = arith.mulf %54, %55 : vector<2x128xf32>
    %57 = vector.extract_strided_slice %6 {offsets = [10, 0], sizes = [2, 128], strides = [1, 1]} : vector<16x128xf32> to vector<2x128xf32>
    %58 = vector.extract_strided_slice %6 {offsets = [14, 0], sizes = [2, 128], strides = [1, 1]} : vector<16x128xf32> to vector<2x128xf32>
    %59 = arith.addf %57, %58 : vector<2x128xf32>
    %cst_15 = arith.constant 5.000000e-01 : f32
    %60 = vector.broadcast %cst_15 : f32 to vector<2x128xf32>
    %61 = arith.mulf %59, %60 : vector<2x128xf32>
    %62 = vector.extract_strided_slice %6 {offsets = [12, 0], sizes = [2, 128], strides = [1, 1]} : vector<16x128xf32> to vector<2x128xf32>
    %63 = vector.extract_strided_slice %6 {offsets = [14, 0], sizes = [2, 128], strides = [1, 1]} : vector<16x128xf32> to vector<2x128xf32>
    %64 = arith.addf %62, %63 : vector<2x128xf32>
    %cst_16 = arith.constant 5.000000e-01 : f32
    %65 = vector.broadcast %cst_16 : f32 to vector<2x128xf32>
    %66 = arith.mulf %64, %65 : vector<2x128xf32>
    %67 = tpu.concatenate %11, %16, %21, %26, %31, %36, %41, %46, %51, %56, %61, %66 in 0 : vector<2x128xf32>, vector<2x128xf32>, vector<2x128xf32>, vector<2x128xf32>, vector<2x128xf32>, vector<2x128xf32>, vector<2x128xf32>, vector<2x128xf32>, vector<2x128xf32>, vector<2x128xf32>, vector<2x128xf32>, vector<2x128xf32> -> vector<24x128xf32>
    %c0_17 = arith.constant 0 : index
    %c0_18 = arith.constant 0 : index
    %68 = vector.load %arg3[%c0_17, %c0_18] : memref<128x128xbf16, #tpu.memory_space<vmem>>, vector<128x128xbf16>
    %69 = arith.truncf %67 : vector<24x128xf32> to vector<24x128xbf16>
    %cst_19 = arith.constant dense<0.000000e+00> : vector<24x128xf32>
    %70 = tpu.matmul %69, %68, %cst_19 {dimension_numbers = #tpu.dot_dimension_numbers<[1], [0], [0], [1], [0, 0, 1, 1], [], []>} : vector<24x128xbf16>, vector<128x128xbf16>, vector<24x128xf32> -> vector<24x128xf32>
    %c0_20 = arith.constant 0 : index
    %c0_21 = arith.constant 0 : index
    %71 = vector.load %arg4[%c0_20, %c0_21] : memref<1x128xf32, #tpu.memory_space<vmem>>, vector<1x128xf32>
    %72 = vector.broadcast %71 : vector<1x128xf32> to vector<24x128xf32>
    %73 = arith.addf %70, %72 : vector<24x128xf32>
    %c0_22 = arith.constant 0 : index
    %c0_23 = arith.constant 0 : index
    %74 = vector.load %arg5[%c0_22, %c0_23] : memref<1x128xf32, #tpu.memory_space<vmem>>, vector<1x128xf32>
    %c0_24 = arith.constant 0 : index
    %c0_25 = arith.constant 0 : index
    %75 = vector.load %arg6[%c0_24, %c0_25] : memref<1x128xf32, #tpu.memory_space<vmem>>, vector<1x128xf32>
    %76 = vector.extract_strided_slice %73 {offsets = [0, 0], sizes = [12, 128], strides = [1, 1]} : vector<24x128xf32> to vector<12x128xf32>
    %cst_26 = arith.constant dense<0.000000e+00> : vector<128xf32>
    %77 = vector.multi_reduction <add>, %76, %cst_26 [0] : vector<12x128xf32> to vector<128xf32>
    %78 = vector.shape_cast %77 : vector<128xf32> to vector<1x128xf32>
    %cst_27 = arith.constant 1.200000e+01 : f32
    %79 = vector.broadcast %cst_27 : f32 to vector<1x128xf32>
    %80 = arith.divf %78, %79 : vector<1x128xf32>
    %81 = vector.broadcast %80 : vector<1x128xf32> to vector<12x128xf32>
    %82 = arith.subf %76, %81 : vector<12x128xf32>
    %83 = arith.mulf %82, %82 : vector<12x128xf32>
    %cst_28 = arith.constant dense<0.000000e+00> : vector<128xf32>
    %84 = vector.multi_reduction <add>, %83, %cst_28 [0] : vector<12x128xf32> to vector<128xf32>
    %85 = vector.shape_cast %84 : vector<128xf32> to vector<1x128xf32>
    %cst_29 = arith.constant 1.200000e+01 : f32
    %86 = vector.broadcast %cst_29 : f32 to vector<1x128xf32>
    %87 = arith.divf %85, %86 : vector<1x128xf32>
    %88 = vector.broadcast %80 : vector<1x128xf32> to vector<12x128xf32>
    %89 = arith.subf %76, %88 : vector<12x128xf32>
    %cst_30 = arith.constant 9.99999974E-6 : f32
    %90 = vector.broadcast %cst_30 : f32 to vector<1x128xf32>
    %91 = arith.addf %87, %90 : vector<1x128xf32>
    %92 = math.rsqrt %91 : vector<1x128xf32>
    %93 = vector.broadcast %92 : vector<1x128xf32> to vector<12x128xf32>
    %94 = arith.mulf %89, %93 : vector<12x128xf32>
    %95 = vector.extract_strided_slice %73 {offsets = [12, 0], sizes = [12, 128], strides = [1, 1]} : vector<24x128xf32> to vector<12x128xf32>
    %cst_31 = arith.constant dense<0.000000e+00> : vector<128xf32>
    %96 = vector.multi_reduction <add>, %95, %cst_31 [0] : vector<12x128xf32> to vector<128xf32>
    %97 = vector.shape_cast %96 : vector<128xf32> to vector<1x128xf32>
    %cst_32 = arith.constant 1.200000e+01 : f32
    %98 = vector.broadcast %cst_32 : f32 to vector<1x128xf32>
    %99 = arith.divf %97, %98 : vector<1x128xf32>
    %100 = vector.broadcast %99 : vector<1x128xf32> to vector<12x128xf32>
    %101 = arith.subf %95, %100 : vector<12x128xf32>
    %102 = arith.mulf %101, %101 : vector<12x128xf32>
    %cst_33 = arith.constant dense<0.000000e+00> : vector<128xf32>
    %103 = vector.multi_reduction <add>, %102, %cst_33 [0] : vector<12x128xf32> to vector<128xf32>
    %104 = vector.shape_cast %103 : vector<128xf32> to vector<1x128xf32>
    %cst_34 = arith.constant 1.200000e+01 : f32
    %105 = vector.broadcast %cst_34 : f32 to vector<1x128xf32>
    %106 = arith.divf %104, %105 : vector<1x128xf32>
    %107 = vector.broadcast %99 : vector<1x128xf32> to vector<12x128xf32>
    %108 = arith.subf %95, %107 : vector<12x128xf32>
    %cst_35 = arith.constant 9.99999974E-6 : f32
    %109 = vector.broadcast %cst_35 : f32 to vector<1x128xf32>
    %110 = arith.addf %106, %109 : vector<1x128xf32>
    %111 = math.rsqrt %110 : vector<1x128xf32>
    %112 = vector.broadcast %111 : vector<1x128xf32> to vector<12x128xf32>
    %113 = arith.mulf %108, %112 : vector<12x128xf32>
    %114 = tpu.concatenate %94, %113 in 0 : vector<12x128xf32>, vector<12x128xf32> -> vector<24x128xf32>
    %115 = vector.broadcast %74 : vector<1x128xf32> to vector<24x128xf32>
    %116 = arith.mulf %114, %115 : vector<24x128xf32>
    %117 = vector.broadcast %75 : vector<1x128xf32> to vector<24x128xf32>
    %118 = arith.addf %116, %117 : vector<24x128xf32>
    %cst_36 = arith.constant 0.000000e+00 : f32
    %119 = vector.broadcast %cst_36 : f32 to vector<24x128xf32>
    %120 = arith.maximumf %118, %119 : vector<24x128xf32>
    %c0_37 = arith.constant 0 : index
    %c0_38 = arith.constant 0 : index
    %121 = vector.load %arg7[%c0_37, %c0_38] : memref<128x128xbf16, #tpu.memory_space<vmem>>, vector<128x128xbf16>
    %122 = arith.truncf %120 : vector<24x128xf32> to vector<24x128xbf16>
    %cst_39 = arith.constant dense<0.000000e+00> : vector<24x128xf32>
    %123 = tpu.matmul %122, %121, %cst_39 {dimension_numbers = #tpu.dot_dimension_numbers<[1], [0], [0], [1], [0, 0, 1, 1], [], []>} : vector<24x128xbf16>, vector<128x128xbf16>, vector<24x128xf32> -> vector<24x128xf32>
    %c0_40 = arith.constant 0 : index
    %c0_41 = arith.constant 0 : index
    %124 = vector.load %arg8[%c0_40, %c0_41] : memref<1x128xf32, #tpu.memory_space<vmem>>, vector<1x128xf32>
    %125 = vector.broadcast %124 : vector<1x128xf32> to vector<24x128xf32>
    %126 = arith.addf %123, %125 : vector<24x128xf32>
    %c0_42 = arith.constant 0 : index
    %c0_43 = arith.constant 0 : index
    %127 = vector.load %arg9[%c0_42, %c0_43] : memref<1x128xf32, #tpu.memory_space<vmem>>, vector<1x128xf32>
    %c0_44 = arith.constant 0 : index
    %c0_45 = arith.constant 0 : index
    %128 = vector.load %arg10[%c0_44, %c0_45] : memref<1x128xf32, #tpu.memory_space<vmem>>, vector<1x128xf32>
    %129 = vector.extract_strided_slice %126 {offsets = [0, 0], sizes = [12, 128], strides = [1, 1]} : vector<24x128xf32> to vector<12x128xf32>
    %cst_46 = arith.constant dense<0.000000e+00> : vector<128xf32>
    %130 = vector.multi_reduction <add>, %129, %cst_46 [0] : vector<12x128xf32> to vector<128xf32>
    %131 = vector.shape_cast %130 : vector<128xf32> to vector<1x128xf32>
    %cst_47 = arith.constant 1.200000e+01 : f32
    %132 = vector.broadcast %cst_47 : f32 to vector<1x128xf32>
    %133 = arith.divf %131, %132 : vector<1x128xf32>
    %134 = vector.broadcast %133 : vector<1x128xf32> to vector<12x128xf32>
    %135 = arith.subf %129, %134 : vector<12x128xf32>
    %136 = arith.mulf %135, %135 : vector<12x128xf32>
    %cst_48 = arith.constant dense<0.000000e+00> : vector<128xf32>
    %137 = vector.multi_reduction <add>, %136, %cst_48 [0] : vector<12x128xf32> to vector<128xf32>
    %138 = vector.shape_cast %137 : vector<128xf32> to vector<1x128xf32>
    %cst_49 = arith.constant 1.200000e+01 : f32
    %139 = vector.broadcast %cst_49 : f32 to vector<1x128xf32>
    %140 = arith.divf %138, %139 : vector<1x128xf32>
    %141 = vector.broadcast %133 : vector<1x128xf32> to vector<12x128xf32>
    %142 = arith.subf %129, %141 : vector<12x128xf32>
    %cst_50 = arith.constant 9.99999974E-6 : f32
    %143 = vector.broadcast %cst_50 : f32 to vector<1x128xf32>
    %144 = arith.addf %140, %143 : vector<1x128xf32>
    %145 = math.rsqrt %144 : vector<1x128xf32>
    %146 = vector.broadcast %145 : vector<1x128xf32> to vector<12x128xf32>
    %147 = arith.mulf %142, %146 : vector<12x128xf32>
    %148 = vector.extract_strided_slice %126 {offsets = [12, 0], sizes = [12, 128], strides = [1, 1]} : vector<24x128xf32> to vector<12x128xf32>
    %cst_51 = arith.constant dense<0.000000e+00> : vector<128xf32>
    %149 = vector.multi_reduction <add>, %148, %cst_51 [0] : vector<12x128xf32> to vector<128xf32>
    %150 = vector.shape_cast %149 : vector<128xf32> to vector<1x128xf32>
    %cst_52 = arith.constant 1.200000e+01 : f32
    %151 = vector.broadcast %cst_52 : f32 to vector<1x128xf32>
    %152 = arith.divf %150, %151 : vector<1x128xf32>
    %153 = vector.broadcast %152 : vector<1x128xf32> to vector<12x128xf32>
    %154 = arith.subf %148, %153 : vector<12x128xf32>
    %155 = arith.mulf %154, %154 : vector<12x128xf32>
    %cst_53 = arith.constant dense<0.000000e+00> : vector<128xf32>
    %156 = vector.multi_reduction <add>, %155, %cst_53 [0] : vector<12x128xf32> to vector<128xf32>
    %157 = vector.shape_cast %156 : vector<128xf32> to vector<1x128xf32>
    %cst_54 = arith.constant 1.200000e+01 : f32
    %158 = vector.broadcast %cst_54 : f32 to vector<1x128xf32>
    %159 = arith.divf %157, %158 : vector<1x128xf32>
    %160 = vector.broadcast %152 : vector<1x128xf32> to vector<12x128xf32>
    %161 = arith.subf %148, %160 : vector<12x128xf32>
    %cst_55 = arith.constant 9.99999974E-6 : f32
    %162 = vector.broadcast %cst_55 : f32 to vector<1x128xf32>
    %163 = arith.addf %159, %162 : vector<1x128xf32>
    %164 = math.rsqrt %163 : vector<1x128xf32>
    %165 = vector.broadcast %164 : vector<1x128xf32> to vector<12x128xf32>
    %166 = arith.mulf %161, %165 : vector<12x128xf32>
    %167 = tpu.concatenate %147, %166 in 0 : vector<12x128xf32>, vector<12x128xf32> -> vector<24x128xf32>
    %168 = vector.broadcast %127 : vector<1x128xf32> to vector<24x128xf32>
    %169 = arith.mulf %167, %168 : vector<24x128xf32>
    %170 = vector.broadcast %128 : vector<1x128xf32> to vector<24x128xf32>
    %171 = arith.addf %169, %170 : vector<24x128xf32>
    %cst_56 = arith.constant 0.000000e+00 : f32
    %172 = vector.broadcast %cst_56 : f32 to vector<24x128xf32>
    %173 = arith.maximumf %171, %172 : vector<24x128xf32>
    %c0_57 = arith.constant 0 : index
    %c0_58 = arith.constant 0 : index
    %174 = vector.load %arg11[%c0_57, %c0_58] : memref<128x128xbf16, #tpu.memory_space<vmem>>, vector<128x128xbf16>
    %175 = arith.truncf %173 : vector<24x128xf32> to vector<24x128xbf16>
    %cst_59 = arith.constant dense<0.000000e+00> : vector<24x128xf32>
    %176 = tpu.matmul %175, %174, %cst_59 {dimension_numbers = #tpu.dot_dimension_numbers<[1], [0], [0], [1], [0, 0, 1, 1], [], []>} : vector<24x128xbf16>, vector<128x128xbf16>, vector<24x128xf32> -> vector<24x128xf32>
    %c0_60 = arith.constant 0 : index
    %c0_61 = arith.constant 0 : index
    %177 = vector.load %arg12[%c0_60, %c0_61] : memref<1x128xf32, #tpu.memory_space<vmem>>, vector<1x128xf32>
    %178 = vector.broadcast %177 : vector<1x128xf32> to vector<24x128xf32>
    %179 = arith.addf %176, %178 : vector<24x128xf32>
    %c0_62 = arith.constant 0 : index
    %c0_63 = arith.constant 0 : index
    %180 = vector.load %arg13[%c0_62, %c0_63] : memref<1x128xf32, #tpu.memory_space<vmem>>, vector<1x128xf32>
    %c0_64 = arith.constant 0 : index
    %c0_65 = arith.constant 0 : index
    %181 = vector.load %arg14[%c0_64, %c0_65] : memref<1x128xf32, #tpu.memory_space<vmem>>, vector<1x128xf32>
    %182 = vector.extract_strided_slice %179 {offsets = [0, 0], sizes = [12, 128], strides = [1, 1]} : vector<24x128xf32> to vector<12x128xf32>
    %cst_66 = arith.constant dense<0.000000e+00> : vector<128xf32>
    %183 = vector.multi_reduction <add>, %182, %cst_66 [0] : vector<12x128xf32> to vector<128xf32>
    %184 = vector.shape_cast %183 : vector<128xf32> to vector<1x128xf32>
    %cst_67 = arith.constant 1.200000e+01 : f32
    %185 = vector.broadcast %cst_67 : f32 to vector<1x128xf32>
    %186 = arith.divf %184, %185 : vector<1x128xf32>
    %187 = vector.broadcast %186 : vector<1x128xf32> to vector<12x128xf32>
    %188 = arith.subf %182, %187 : vector<12x128xf32>
    %189 = arith.mulf %188, %188 : vector<12x128xf32>
    %cst_68 = arith.constant dense<0.000000e+00> : vector<128xf32>
    %190 = vector.multi_reduction <add>, %189, %cst_68 [0] : vector<12x128xf32> to vector<128xf32>
    %191 = vector.shape_cast %190 : vector<128xf32> to vector<1x128xf32>
    %cst_69 = arith.constant 1.200000e+01 : f32
    %192 = vector.broadcast %cst_69 : f32 to vector<1x128xf32>
    %193 = arith.divf %191, %192 : vector<1x128xf32>
    %194 = vector.broadcast %186 : vector<1x128xf32> to vector<12x128xf32>
    %195 = arith.subf %182, %194 : vector<12x128xf32>
    %cst_70 = arith.constant 9.99999974E-6 : f32
    %196 = vector.broadcast %cst_70 : f32 to vector<1x128xf32>
    %197 = arith.addf %193, %196 : vector<1x128xf32>
    %198 = math.rsqrt %197 : vector<1x128xf32>
    %199 = vector.broadcast %198 : vector<1x128xf32> to vector<12x128xf32>
    %200 = arith.mulf %195, %199 : vector<12x128xf32>
    %201 = vector.extract_strided_slice %179 {offsets = [12, 0], sizes = [12, 128], strides = [1, 1]} : vector<24x128xf32> to vector<12x128xf32>
    %cst_71 = arith.constant dense<0.000000e+00> : vector<128xf32>
    %202 = vector.multi_reduction <add>, %201, %cst_71 [0] : vector<12x128xf32> to vector<128xf32>
    %203 = vector.shape_cast %202 : vector<128xf32> to vector<1x128xf32>
    %cst_72 = arith.constant 1.200000e+01 : f32
    %204 = vector.broadcast %cst_72 : f32 to vector<1x128xf32>
    %205 = arith.divf %203, %204 : vector<1x128xf32>
    %206 = vector.broadcast %205 : vector<1x128xf32> to vector<12x128xf32>
    %207 = arith.subf %201, %206 : vector<12x128xf32>
    %208 = arith.mulf %207, %207 : vector<12x128xf32>
    %cst_73 = arith.constant dense<0.000000e+00> : vector<128xf32>
    %209 = vector.multi_reduction <add>, %208, %cst_73 [0] : vector<12x128xf32> to vector<128xf32>
    %210 = vector.shape_cast %209 : vector<128xf32> to vector<1x128xf32>
    %cst_74 = arith.constant 1.200000e+01 : f32
    %211 = vector.broadcast %cst_74 : f32 to vector<1x128xf32>
    %212 = arith.divf %210, %211 : vector<1x128xf32>
    %213 = vector.broadcast %205 : vector<1x128xf32> to vector<12x128xf32>
    %214 = arith.subf %201, %213 : vector<12x128xf32>
    %cst_75 = arith.constant 9.99999974E-6 : f32
    %215 = vector.broadcast %cst_75 : f32 to vector<1x128xf32>
    %216 = arith.addf %212, %215 : vector<1x128xf32>
    %217 = math.rsqrt %216 : vector<1x128xf32>
    %218 = vector.broadcast %217 : vector<1x128xf32> to vector<12x128xf32>
    %219 = arith.mulf %214, %218 : vector<12x128xf32>
    %220 = tpu.concatenate %200, %219 in 0 : vector<12x128xf32>, vector<12x128xf32> -> vector<24x128xf32>
    %221 = vector.broadcast %180 : vector<1x128xf32> to vector<24x128xf32>
    %222 = arith.mulf %220, %221 : vector<24x128xf32>
    %223 = vector.broadcast %181 : vector<1x128xf32> to vector<24x128xf32>
    %224 = arith.addf %222, %223 : vector<24x128xf32>
    %c0_76 = arith.constant 0 : index
    %c0_77 = arith.constant 0 : index
    %225 = vector.load %arg15[%c0_76, %c0_77] : memref<24x128xf32, #tpu.memory_space<vmem>>, vector<24x128xf32>
    tpu.vector_store %arg15[%c0_76, %c0_77], %224 {strides = array<i32>} : memref<24x128xf32, #tpu.memory_space<vmem>>, vector<24x128xf32>,
    return
  }
}

module attributes {stable_mosaic.version = 11 : i64} {
  func.func @_ema_nn_kernel(%arg0: memref<4x768xf32, #tpu.memory_space<vmem>>, %arg1: memref<768x128xbf16, #tpu.memory_space<vmem>>, %arg2: memref<1x128xf32, #tpu.memory_space<vmem>>, %arg3: memref<128x128xbf16, #tpu.memory_space<vmem>>, %arg4: memref<1x128xf32, #tpu.memory_space<vmem>>, %arg5: memref<1x128xf32, #tpu.memory_space<vmem>>, %arg6: memref<1x128xf32, #tpu.memory_space<vmem>>, %arg7: memref<128x128xbf16, #tpu.memory_space<vmem>>, %arg8: memref<1x128xf32, #tpu.memory_space<vmem>>, %arg9: memref<1x128xf32, #tpu.memory_space<vmem>>, %arg10: memref<1x128xf32, #tpu.memory_space<vmem>>, %arg11: memref<128x128xbf16, #tpu.memory_space<vmem>>, %arg12: memref<1x128xf32, #tpu.memory_space<vmem>>, %arg13: memref<1x128xf32, #tpu.memory_space<vmem>>, %arg14: memref<1x128xf32, #tpu.memory_space<vmem>>, %arg15: memref<1024x128xbf16, #tpu.memory_space<vmem>>, %arg16: memref<1x1024xf32, #tpu.memory_space<vmem>>, %arg17: memref<4x1xi32, #tpu.memory_space<vmem>>) attributes {dimension_semantics = [], scalar_prefetch = 0 : i64, scratch_operands = 0 : i64, tpu.core_type = #tpu.core_type<tc>} {
    %c0 = arith.constant 0 : index
    %c0_0 = arith.constant 0 : index
    %0 = vector.load %arg0[%c0, %c0_0] : memref<4x768xf32, #tpu.memory_space<vmem>>, vector<4x768xf32>
    %c0_1 = arith.constant 0 : index
    %c0_2 = arith.constant 0 : index
    %1 = vector.load %arg1[%c0_1, %c0_2] : memref<768x128xbf16, #tpu.memory_space<vmem>>, vector<768x128xbf16>
    %2 = arith.truncf %0 : vector<4x768xf32> to vector<4x768xbf16>
    %cst = arith.constant dense<0.000000e+00> : vector<4x128xf32>
    %3 = tpu.matmul %2, %1, %cst {dimension_numbers = #tpu.dot_dimension_numbers<[1], [0], [0], [1], [0, 0, 1, 1], [], []>} : vector<4x768xbf16>, vector<768x128xbf16>, vector<4x128xf32> -> vector<4x128xf32>
    %c0_3 = arith.constant 0 : index
    %c0_4 = arith.constant 0 : index
    %4 = vector.load %arg2[%c0_3, %c0_4] : memref<1x128xf32, #tpu.memory_space<vmem>>, vector<1x128xf32>
    %5 = vector.broadcast %4 : vector<1x128xf32> to vector<4x128xf32>
    %6 = arith.addf %3, %5 : vector<4x128xf32>
    %c0_5 = arith.constant 0 : index
    %c0_6 = arith.constant 0 : index
    %7 = vector.load %arg3[%c0_5, %c0_6] : memref<128x128xbf16, #tpu.memory_space<vmem>>, vector<128x128xbf16>
    %8 = arith.truncf %6 : vector<4x128xf32> to vector<4x128xbf16>
    %cst_7 = arith.constant dense<0.000000e+00> : vector<4x128xf32>
    %9 = tpu.matmul %8, %7, %cst_7 {dimension_numbers = #tpu.dot_dimension_numbers<[1], [0], [0], [1], [0, 0, 1, 1], [], []>} : vector<4x128xbf16>, vector<128x128xbf16>, vector<4x128xf32> -> vector<4x128xf32>
    %c0_8 = arith.constant 0 : index
    %c0_9 = arith.constant 0 : index
    %10 = vector.load %arg4[%c0_8, %c0_9] : memref<1x128xf32, #tpu.memory_space<vmem>>, vector<1x128xf32>
    %11 = vector.broadcast %10 : vector<1x128xf32> to vector<4x128xf32>
    %12 = arith.addf %9, %11 : vector<4x128xf32>
    %c0_10 = arith.constant 0 : index
    %c0_11 = arith.constant 0 : index
    %13 = vector.load %arg5[%c0_10, %c0_11] : memref<1x128xf32, #tpu.memory_space<vmem>>, vector<1x128xf32>
    %c0_12 = arith.constant 0 : index
    %c0_13 = arith.constant 0 : index
    %14 = vector.load %arg6[%c0_12, %c0_13] : memref<1x128xf32, #tpu.memory_space<vmem>>, vector<1x128xf32>
    %15 = vector.extract_strided_slice %12 {offsets = [0, 0], sizes = [2, 128], strides = [1, 1]} : vector<4x128xf32> to vector<2x128xf32>
    %cst_14 = arith.constant dense<0.000000e+00> : vector<128xf32>
    %16 = vector.multi_reduction <add>, %15, %cst_14 [0] : vector<2x128xf32> to vector<128xf32>
    %17 = vector.shape_cast %16 : vector<128xf32> to vector<1x128xf32>
    %cst_15 = arith.constant 2.000000e+00 : f32
    %18 = vector.broadcast %cst_15 : f32 to vector<1x128xf32>
    %19 = arith.divf %17, %18 : vector<1x128xf32>
    %20 = vector.broadcast %19 : vector<1x128xf32> to vector<2x128xf32>
    %21 = arith.subf %15, %20 : vector<2x128xf32>
    %22 = arith.mulf %21, %21 : vector<2x128xf32>
    %cst_16 = arith.constant dense<0.000000e+00> : vector<128xf32>
    %23 = vector.multi_reduction <add>, %22, %cst_16 [0] : vector<2x128xf32> to vector<128xf32>
    %24 = vector.shape_cast %23 : vector<128xf32> to vector<1x128xf32>
    %cst_17 = arith.constant 2.000000e+00 : f32
    %25 = vector.broadcast %cst_17 : f32 to vector<1x128xf32>
    %26 = arith.divf %24, %25 : vector<1x128xf32>
    %27 = vector.broadcast %19 : vector<1x128xf32> to vector<2x128xf32>
    %28 = arith.subf %15, %27 : vector<2x128xf32>
    %cst_18 = arith.constant 9.99999974E-6 : f32
    %29 = vector.broadcast %cst_18 : f32 to vector<1x128xf32>
    %30 = arith.addf %26, %29 : vector<1x128xf32>
    %31 = math.rsqrt %30 : vector<1x128xf32>
    %32 = vector.broadcast %31 : vector<1x128xf32> to vector<2x128xf32>
    %33 = arith.mulf %28, %32 : vector<2x128xf32>
    %34 = vector.extract_strided_slice %12 {offsets = [2, 0], sizes = [2, 128], strides = [1, 1]} : vector<4x128xf32> to vector<2x128xf32>
    %cst_19 = arith.constant dense<0.000000e+00> : vector<128xf32>
    %35 = vector.multi_reduction <add>, %34, %cst_19 [0] : vector<2x128xf32> to vector<128xf32>
    %36 = vector.shape_cast %35 : vector<128xf32> to vector<1x128xf32>
    %cst_20 = arith.constant 2.000000e+00 : f32
    %37 = vector.broadcast %cst_20 : f32 to vector<1x128xf32>
    %38 = arith.divf %36, %37 : vector<1x128xf32>
    %39 = vector.broadcast %38 : vector<1x128xf32> to vector<2x128xf32>
    %40 = arith.subf %34, %39 : vector<2x128xf32>
    %41 = arith.mulf %40, %40 : vector<2x128xf32>
    %cst_21 = arith.constant dense<0.000000e+00> : vector<128xf32>
    %42 = vector.multi_reduction <add>, %41, %cst_21 [0] : vector<2x128xf32> to vector<128xf32>
    %43 = vector.shape_cast %42 : vector<128xf32> to vector<1x128xf32>
    %cst_22 = arith.constant 2.000000e+00 : f32
    %44 = vector.broadcast %cst_22 : f32 to vector<1x128xf32>
    %45 = arith.divf %43, %44 : vector<1x128xf32>
    %46 = vector.broadcast %38 : vector<1x128xf32> to vector<2x128xf32>
    %47 = arith.subf %34, %46 : vector<2x128xf32>
    %cst_23 = arith.constant 9.99999974E-6 : f32
    %48 = vector.broadcast %cst_23 : f32 to vector<1x128xf32>
    %49 = arith.addf %45, %48 : vector<1x128xf32>
    %50 = math.rsqrt %49 : vector<1x128xf32>
    %51 = vector.broadcast %50 : vector<1x128xf32> to vector<2x128xf32>
    %52 = arith.mulf %47, %51 : vector<2x128xf32>
    %53 = tpu.concatenate %33, %52 in 0 : vector<2x128xf32>, vector<2x128xf32> -> vector<4x128xf32>
    %54 = vector.broadcast %13 : vector<1x128xf32> to vector<4x128xf32>
    %55 = arith.mulf %53, %54 : vector<4x128xf32>
    %56 = vector.broadcast %14 : vector<1x128xf32> to vector<4x128xf32>
    %57 = arith.addf %55, %56 : vector<4x128xf32>
    %cst_24 = arith.constant 0.000000e+00 : f32
    %58 = vector.broadcast %cst_24 : f32 to vector<4x128xf32>
    %59 = arith.maximumf %57, %58 : vector<4x128xf32>
    %c0_25 = arith.constant 0 : index
    %c0_26 = arith.constant 0 : index
    %60 = vector.load %arg7[%c0_25, %c0_26] : memref<128x128xbf16, #tpu.memory_space<vmem>>, vector<128x128xbf16>
    %61 = arith.truncf %59 : vector<4x128xf32> to vector<4x128xbf16>
    %cst_27 = arith.constant dense<0.000000e+00> : vector<4x128xf32>
    %62 = tpu.matmul %61, %60, %cst_27 {dimension_numbers = #tpu.dot_dimension_numbers<[1], [0], [0], [1], [0, 0, 1, 1], [], []>} : vector<4x128xbf16>, vector<128x128xbf16>, vector<4x128xf32> -> vector<4x128xf32>
    %c0_28 = arith.constant 0 : index
    %c0_29 = arith.constant 0 : index
    %63 = vector.load %arg8[%c0_28, %c0_29] : memref<1x128xf32, #tpu.memory_space<vmem>>, vector<1x128xf32>
    %64 = vector.broadcast %63 : vector<1x128xf32> to vector<4x128xf32>
    %65 = arith.addf %62, %64 : vector<4x128xf32>
    %c0_30 = arith.constant 0 : index
    %c0_31 = arith.constant 0 : index
    %66 = vector.load %arg9[%c0_30, %c0_31] : memref<1x128xf32, #tpu.memory_space<vmem>>, vector<1x128xf32>
    %c0_32 = arith.constant 0 : index
    %c0_33 = arith.constant 0 : index
    %67 = vector.load %arg10[%c0_32, %c0_33] : memref<1x128xf32, #tpu.memory_space<vmem>>, vector<1x128xf32>
    %68 = vector.extract_strided_slice %65 {offsets = [0, 0], sizes = [2, 128], strides = [1, 1]} : vector<4x128xf32> to vector<2x128xf32>
    %cst_34 = arith.constant dense<0.000000e+00> : vector<128xf32>
    %69 = vector.multi_reduction <add>, %68, %cst_34 [0] : vector<2x128xf32> to vector<128xf32>
    %70 = vector.shape_cast %69 : vector<128xf32> to vector<1x128xf32>
    %cst_35 = arith.constant 2.000000e+00 : f32
    %71 = vector.broadcast %cst_35 : f32 to vector<1x128xf32>
    %72 = arith.divf %70, %71 : vector<1x128xf32>
    %73 = vector.broadcast %72 : vector<1x128xf32> to vector<2x128xf32>
    %74 = arith.subf %68, %73 : vector<2x128xf32>
    %75 = arith.mulf %74, %74 : vector<2x128xf32>
    %cst_36 = arith.constant dense<0.000000e+00> : vector<128xf32>
    %76 = vector.multi_reduction <add>, %75, %cst_36 [0] : vector<2x128xf32> to vector<128xf32>
    %77 = vector.shape_cast %76 : vector<128xf32> to vector<1x128xf32>
    %cst_37 = arith.constant 2.000000e+00 : f32
    %78 = vector.broadcast %cst_37 : f32 to vector<1x128xf32>
    %79 = arith.divf %77, %78 : vector<1x128xf32>
    %80 = vector.broadcast %72 : vector<1x128xf32> to vector<2x128xf32>
    %81 = arith.subf %68, %80 : vector<2x128xf32>
    %cst_38 = arith.constant 9.99999974E-6 : f32
    %82 = vector.broadcast %cst_38 : f32 to vector<1x128xf32>
    %83 = arith.addf %79, %82 : vector<1x128xf32>
    %84 = math.rsqrt %83 : vector<1x128xf32>
    %85 = vector.broadcast %84 : vector<1x128xf32> to vector<2x128xf32>
    %86 = arith.mulf %81, %85 : vector<2x128xf32>
    %87 = vector.extract_strided_slice %65 {offsets = [2, 0], sizes = [2, 128], strides = [1, 1]} : vector<4x128xf32> to vector<2x128xf32>
    %cst_39 = arith.constant dense<0.000000e+00> : vector<128xf32>
    %88 = vector.multi_reduction <add>, %87, %cst_39 [0] : vector<2x128xf32> to vector<128xf32>
    %89 = vector.shape_cast %88 : vector<128xf32> to vector<1x128xf32>
    %cst_40 = arith.constant 2.000000e+00 : f32
    %90 = vector.broadcast %cst_40 : f32 to vector<1x128xf32>
    %91 = arith.divf %89, %90 : vector<1x128xf32>
    %92 = vector.broadcast %91 : vector<1x128xf32> to vector<2x128xf32>
    %93 = arith.subf %87, %92 : vector<2x128xf32>
    %94 = arith.mulf %93, %93 : vector<2x128xf32>
    %cst_41 = arith.constant dense<0.000000e+00> : vector<128xf32>
    %95 = vector.multi_reduction <add>, %94, %cst_41 [0] : vector<2x128xf32> to vector<128xf32>
    %96 = vector.shape_cast %95 : vector<128xf32> to vector<1x128xf32>
    %cst_42 = arith.constant 2.000000e+00 : f32
    %97 = vector.broadcast %cst_42 : f32 to vector<1x128xf32>
    %98 = arith.divf %96, %97 : vector<1x128xf32>
    %99 = vector.broadcast %91 : vector<1x128xf32> to vector<2x128xf32>
    %100 = arith.subf %87, %99 : vector<2x128xf32>
    %cst_43 = arith.constant 9.99999974E-6 : f32
    %101 = vector.broadcast %cst_43 : f32 to vector<1x128xf32>
    %102 = arith.addf %98, %101 : vector<1x128xf32>
    %103 = math.rsqrt %102 : vector<1x128xf32>
    %104 = vector.broadcast %103 : vector<1x128xf32> to vector<2x128xf32>
    %105 = arith.mulf %100, %104 : vector<2x128xf32>
    %106 = tpu.concatenate %86, %105 in 0 : vector<2x128xf32>, vector<2x128xf32> -> vector<4x128xf32>
    %107 = vector.broadcast %66 : vector<1x128xf32> to vector<4x128xf32>
    %108 = arith.mulf %106, %107 : vector<4x128xf32>
    %109 = vector.broadcast %67 : vector<1x128xf32> to vector<4x128xf32>
    %110 = arith.addf %108, %109 : vector<4x128xf32>
    %cst_44 = arith.constant 0.000000e+00 : f32
    %111 = vector.broadcast %cst_44 : f32 to vector<4x128xf32>
    %112 = arith.maximumf %110, %111 : vector<4x128xf32>
    %c0_45 = arith.constant 0 : index
    %c0_46 = arith.constant 0 : index
    %113 = vector.load %arg11[%c0_45, %c0_46] : memref<128x128xbf16, #tpu.memory_space<vmem>>, vector<128x128xbf16>
    %114 = arith.truncf %112 : vector<4x128xf32> to vector<4x128xbf16>
    %cst_47 = arith.constant dense<0.000000e+00> : vector<4x128xf32>
    %115 = tpu.matmul %114, %113, %cst_47 {dimension_numbers = #tpu.dot_dimension_numbers<[1], [0], [0], [1], [0, 0, 1, 1], [], []>} : vector<4x128xbf16>, vector<128x128xbf16>, vector<4x128xf32> -> vector<4x128xf32>
    %c0_48 = arith.constant 0 : index
    %c0_49 = arith.constant 0 : index
    %116 = vector.load %arg12[%c0_48, %c0_49] : memref<1x128xf32, #tpu.memory_space<vmem>>, vector<1x128xf32>
    %117 = vector.broadcast %116 : vector<1x128xf32> to vector<4x128xf32>
    %118 = arith.addf %115, %117 : vector<4x128xf32>
    %c0_50 = arith.constant 0 : index
    %c0_51 = arith.constant 0 : index
    %119 = vector.load %arg13[%c0_50, %c0_51] : memref<1x128xf32, #tpu.memory_space<vmem>>, vector<1x128xf32>
    %c0_52 = arith.constant 0 : index
    %c0_53 = arith.constant 0 : index
    %120 = vector.load %arg14[%c0_52, %c0_53] : memref<1x128xf32, #tpu.memory_space<vmem>>, vector<1x128xf32>
    %121 = vector.extract_strided_slice %118 {offsets = [0, 0], sizes = [2, 128], strides = [1, 1]} : vector<4x128xf32> to vector<2x128xf32>
    %cst_54 = arith.constant dense<0.000000e+00> : vector<128xf32>
    %122 = vector.multi_reduction <add>, %121, %cst_54 [0] : vector<2x128xf32> to vector<128xf32>
    %123 = vector.shape_cast %122 : vector<128xf32> to vector<1x128xf32>
    %cst_55 = arith.constant 2.000000e+00 : f32
    %124 = vector.broadcast %cst_55 : f32 to vector<1x128xf32>
    %125 = arith.divf %123, %124 : vector<1x128xf32>
    %126 = vector.broadcast %125 : vector<1x128xf32> to vector<2x128xf32>
    %127 = arith.subf %121, %126 : vector<2x128xf32>
    %128 = arith.mulf %127, %127 : vector<2x128xf32>
    %cst_56 = arith.constant dense<0.000000e+00> : vector<128xf32>
    %129 = vector.multi_reduction <add>, %128, %cst_56 [0] : vector<2x128xf32> to vector<128xf32>
    %130 = vector.shape_cast %129 : vector<128xf32> to vector<1x128xf32>
    %cst_57 = arith.constant 2.000000e+00 : f32
    %131 = vector.broadcast %cst_57 : f32 to vector<1x128xf32>
    %132 = arith.divf %130, %131 : vector<1x128xf32>
    %133 = vector.broadcast %125 : vector<1x128xf32> to vector<2x128xf32>
    %134 = arith.subf %121, %133 : vector<2x128xf32>
    %cst_58 = arith.constant 9.99999974E-6 : f32
    %135 = vector.broadcast %cst_58 : f32 to vector<1x128xf32>
    %136 = arith.addf %132, %135 : vector<1x128xf32>
    %137 = math.rsqrt %136 : vector<1x128xf32>
    %138 = vector.broadcast %137 : vector<1x128xf32> to vector<2x128xf32>
    %139 = arith.mulf %134, %138 : vector<2x128xf32>
    %140 = vector.extract_strided_slice %118 {offsets = [2, 0], sizes = [2, 128], strides = [1, 1]} : vector<4x128xf32> to vector<2x128xf32>
    %cst_59 = arith.constant dense<0.000000e+00> : vector<128xf32>
    %141 = vector.multi_reduction <add>, %140, %cst_59 [0] : vector<2x128xf32> to vector<128xf32>
    %142 = vector.shape_cast %141 : vector<128xf32> to vector<1x128xf32>
    %cst_60 = arith.constant 2.000000e+00 : f32
    %143 = vector.broadcast %cst_60 : f32 to vector<1x128xf32>
    %144 = arith.divf %142, %143 : vector<1x128xf32>
    %145 = vector.broadcast %144 : vector<1x128xf32> to vector<2x128xf32>
    %146 = arith.subf %140, %145 : vector<2x128xf32>
    %147 = arith.mulf %146, %146 : vector<2x128xf32>
    %cst_61 = arith.constant dense<0.000000e+00> : vector<128xf32>
    %148 = vector.multi_reduction <add>, %147, %cst_61 [0] : vector<2x128xf32> to vector<128xf32>
    %149 = vector.shape_cast %148 : vector<128xf32> to vector<1x128xf32>
    %cst_62 = arith.constant 2.000000e+00 : f32
    %150 = vector.broadcast %cst_62 : f32 to vector<1x128xf32>
    %151 = arith.divf %149, %150 : vector<1x128xf32>
    %152 = vector.broadcast %144 : vector<1x128xf32> to vector<2x128xf32>
    %153 = arith.subf %140, %152 : vector<2x128xf32>
    %cst_63 = arith.constant 9.99999974E-6 : f32
    %154 = vector.broadcast %cst_63 : f32 to vector<1x128xf32>
    %155 = arith.addf %151, %154 : vector<1x128xf32>
    %156 = math.rsqrt %155 : vector<1x128xf32>
    %157 = vector.broadcast %156 : vector<1x128xf32> to vector<2x128xf32>
    %158 = arith.mulf %153, %157 : vector<2x128xf32>
    %159 = tpu.concatenate %139, %158 in 0 : vector<2x128xf32>, vector<2x128xf32> -> vector<4x128xf32>
    %160 = vector.broadcast %119 : vector<1x128xf32> to vector<4x128xf32>
    %161 = arith.mulf %159, %160 : vector<4x128xf32>
    %162 = vector.broadcast %120 : vector<1x128xf32> to vector<4x128xf32>
    %163 = arith.addf %161, %162 : vector<4x128xf32>
    %164 = arith.mulf %163, %163 : vector<4x128xf32>
    %cst_64 = arith.constant dense<0.000000e+00> : vector<4xf32>
    %165 = vector.multi_reduction <add>, %164, %cst_64 [1] : vector<4x128xf32> to vector<4xf32>
    %166 = vector.shape_cast %165 : vector<4xf32> to vector<4x1xf32>
    %cst_65 = arith.constant 9.99999996E-13 : f32
    %167 = vector.broadcast %cst_65 : f32 to vector<4x1xf32>
    %168 = arith.addf %166, %167 : vector<4x1xf32>
    %169 = math.rsqrt %168 : vector<4x1xf32>
    %170 = vector.broadcast %169 : vector<4x1xf32> to vector<4x128xf32>
    %171 = arith.mulf %163, %170 : vector<4x128xf32>
    %172 = arith.truncf %171 : vector<4x128xf32> to vector<4x128xbf16>
    %c0_66 = arith.constant 0 : index
    %c0_67 = arith.constant 0 : index
    %173 = vector.load %arg15[%c0_66, %c0_67] : memref<1024x128xbf16, #tpu.memory_space<vmem>>, vector<1024x128xbf16>
    %cst_68 = arith.constant dense<0.000000e+00> : vector<4x1024xf32>
    %174 = tpu.matmul %172, %173, %cst_68 {dimension_numbers = #tpu.dot_dimension_numbers<[1], [1], [0], [0], [0, 0, 1, 0], [], []>} : vector<4x128xbf16>, vector<1024x128xbf16>, vector<4x1024xf32> -> vector<4x1024xf32>
    %c0_69 = arith.constant 0 : index
    %c0_70 = arith.constant 0 : index
    %175 = vector.load %arg16[%c0_69, %c0_70] : memref<1x1024xf32, #tpu.memory_space<vmem>>, vector<1x1024xf32>
    %176 = vector.broadcast %175 : vector<1x1024xf32> to vector<4x1024xf32>
    %177 = arith.mulf %174, %176 : vector<4x1024xf32>
    %cst_71 = arith.constant dense<0xFF800000> : vector<4xf32>
    %178 = vector.multi_reduction <maximumf>, %177, %cst_71 [1] : vector<4x1024xf32> to vector<4xf32>
    %179 = vector.shape_cast %178 : vector<4xf32> to vector<4x1xf32>
    %180 = tpu.iota {dimensions = array<i32: 1>} : vector<4x1024xi32>
    %181 = vector.broadcast %179 : vector<4x1xf32> to vector<4x1024xf32>
    %182 = arith.cmpf oge, %177, %181 : vector<4x1024xf32>
    %c1024_i32 = arith.constant 1024 : i32
    %183 = vector.broadcast %c1024_i32 : i32 to vector<4x1024xi32>
    %184 = arith.select %182, %180, %183 : vector<4x1024xi1>, vector<4x1024xi32>
    %cst_72 = arith.constant dense<2147483647> : vector<4xi32>
    %185 = vector.multi_reduction <minsi>, %184, %cst_72 [1] : vector<4x1024xi32> to vector<4xi32>
    %186 = vector.shape_cast %185 : vector<4xi32> to vector<4x1xi32>
    %c0_73 = arith.constant 0 : index
    %c0_74 = arith.constant 0 : index
    %187 = vector.load %arg17[%c0_73, %c0_74] : memref<4x1xi32, #tpu.memory_space<vmem>>, vector<4x1xi32>
    tpu.vector_store %arg17[%c0_73, %c0_74], %186 {strides = array<i32>} : memref<4x1xi32, #tpu.memory_space<vmem>>, vector<4x1xi32>,
    return
  }
}

</mosaic_0001>

<bundles_post_ra>
// kernel: fastmoco_forward.4
= control target key start
LH: loop header
LB: loop body
LE: loop exit
PB: predicated region body
PF: predicated region fallthrough
CT: control target
= control target key end

     0   :  { %vm157_vm0 = vcmask 523264   ;;  %vm238_vm1 = vcmask 1041408   ;;  %vm240_vm2 = vcmask 1043456   ;;  %vm242_vm3 = vcmask 1045504   ;;  %s1353_s1 = inlined_call_operand.vmem [shape: bf16[192,128], index: 1, kind: input, shape index: {}]   ;;  %s1354_s2 = inlined_call_operand.vmem [shape: f32[1,128], index: 2, kind: input, shape index: {}]   ;;  %s1355_s0 = inlined_call_operand.vmem [shape: f32[16,192], index: 0, kind: input, shape index: {}]   ;;  %s1356_s4 = inlined_call_operand.vmem [shape: f32[1,128], index: 4, kind: input, shape index: {}]   ;;  %s1357_s3 = inlined_call_operand.vmem [shape: bf16[128,128], index: 3, kind: input, shape index: {}]   ;;  %s1358_s5 = inlined_call_operand.vmem [shape: f32[1,128], index: 5, kind: input, shape index: {}]   ;;  %s1359_s6 = inlined_call_operand.vmem [shape: f32[1,128], index: 6, kind: input, shape index: {}]   ;;  %s1360_s8 = inlined_call_operand.vmem [shape: f32[1,128], index: 8, kind: input, shape index: {}]   ;;  %s1361_s7 = inlined_call_operand.vmem [shape: bf16[128,128], index: 7, kind: input, shape index: {}]   ;;  %s1362_s9 = inlined_call_operand.vmem [shape: f32[1,128], index: 9, kind: input, shape index: {}]   ;;  %s1363_s10 = inlined_call_operand.vmem [shape: f32[1,128], index: 10, kind: input, shape index: {}]   ;;  %s1364_s12 = inlined_call_operand.vmem [shape: f32[1,128], index: 12, kind: input, shape index: {}]   ;;  %s1365_s11 = inlined_call_operand.vmem [shape: bf16[128,128], index: 11, kind: input, shape index: {}]   ;;  %s1366_s13 = inlined_call_operand.vmem [shape: f32[1,128], index: 13, kind: input, shape index: {}]   ;;  %s1367_s14 = inlined_call_operand.vmem [shape: f32[1,128], index: 14, kind: input, shape index: {}]   ;;  %s1368_s15 = inlined_call_operand.vmem [shape: f32[24,128], index: 15, kind: output, shape index: {}]  }
   0x1   :  { %v983_v0 = vld [vmem:[%s1353_s1 + $0x38] sm:$0xff]  ;;  %v982_v1 = vld [vmem:[%s1353_s1 + $0x30] sm:$0xff]  ;;  %v981_v2 = vld [vmem:[%s1353_s1 + $0x28] sm:$0xff] }
   0x2   :  { %161 = vmatpush.bf16.msra.mxu0 %v983_v0  ;;  %v980_v3 = vld [vmem:[%s1353_s1 + $0x20] sm:$0xff]  ;;  %v979_v4 = vld [vmem:[%s1353_s1 + $0x18] sm:$0xff]  ;;  %v978_v5 = vld [vmem:[%s1353_s1 + $0x10] sm:$0xff] }
   0x3   :  { %v977_v6 = vld [vmem:[%s1353_s1 + $0x8] sm:$0xff]  ;;  %v976_v7 = vld [vmem:[%s1353_s1] sm:$0xff]  ;;  %v53_v9 = vld [vmem:[%s1355_s0 + $0x10] sm:$0xff] }
   0x4   :  { %v51_v8 = vld [vmem:[%s1355_s0] sm:$0xff]  ;;  %v987_v10 = vld [vmem:[%s1353_s1 + $0x58] sm:$0xff]  ;;  %v986_v12 = vld [vmem:[%s1353_s1 + $0x50] sm:$0xff] }
   0x5   :  { %v79_v11 = vpack.c.bf16 %v53_v9, %v51_v8  ;;  %v985_v13 = vld [vmem:[%s1353_s1 + $0x48] sm:$0xff]  ;;  %v984_v14 = vld [vmem:[%s1353_s1 + $0x40] sm:$0xff]  ;;  %v54_v16 = vld [vmem:[%s1355_s0 + $0x18] sm:$0xff]  ;;  %v1037_v9 = vmov 12.0  }
   0x6   :  { %162 = vmatpush.bf16.msra.mxu0 %v982_v1  ;;  %v52_v15 = vld [vmem:[%s1355_s0 + $0x8] sm:$0xff]  ;;  %v995_v18 = vld [vmem:[%s1357_s3 + $0x38] sm:$0xff]  ;;  %v994_v19 = vld [vmem:[%s1357_s3 + $0x30] sm:$0xff]  ;;  %1023 = vrcp.f32 %v1037_v9 }
   0x7   :  { %v80_v17 = vpack.c.bf16 %v54_v16, %v52_v15  ;;  %320 = vmatpush.bf16.msra.mxu2 %v995_v18  ;;  %v993_v20 = vld [vmem:[%s1357_s3 + $0x28] sm:$0xff]  ;;  %v992_v21 = vld [vmem:[%s1357_s3 + $0x20] sm:$0xff]  ;;  %v991_v22 = vld [vmem:[%s1357_s3 + $0x18] sm:$0xff] }
   0x8   :  { %v990_v23 = vld [vmem:[%s1357_s3 + $0x10] sm:$0xff]  ;;  %v989_v24 = vld [vmem:[%s1357_s3 + $0x8] sm:$0xff]  ;;  %v988_v26 = vld [vmem:[%s1357_s3] sm:$0xff] }
   0x9   :  { %v1013_v28 = vld [vmem:[%s1354_s2] ss:$0 sm:$0xff]  ;;  %v998_v9 = vld [vmem:[%s1361_s7 + $0x10] sm:$0xff] }
   0xa   :  { %163 = vmatpush.bf16.msra.mxu0 %v981_v2 }
   0xb   :  { %321 = vmatpush.bf16.msra.mxu2 %v994_v19 }
   0xe   :  { %164 = vmatpush.bf16.msra.mxu0 %v980_v3 }
   0xf   :  { %322 = vmatpush.bf16.msra.mxu2 %v993_v20 }
  0x12   :  { %165 = vmatpush.bf16.msra.mxu0 %v979_v4 }
  0x13   :  { %323 = vmatpush.bf16.msra.mxu2 %v992_v21 }
  0x16   :  { %166 = vmatpush.bf16.msra.mxu0 %v978_v5 }
  0x17   :  { %324 = vmatpush.bf16.msra.mxu2 %v991_v22 }
  0x1a   :  { %167 = vmatpush.bf16.msra.mxu0 %v977_v6 }
  0x1b   :  { %325 = vmatpush.bf16.msra.mxu2 %v990_v23 }
  0x1e   :  { %168 = vmatpush.bf16.msra.mxu0 %v976_v7 }
  0x1f   :  { %326 = vmatpush.bf16.msra.mxu2 %v989_v24 }
  0x21   :  { %169 = vmatmul.bf16.vlgmr.msra.gmra.mxu0 %v79_v11  ;;  %v1024_v11 = vpop.eup %1023 }
  0x22   :  { %179 = vmatpush.bf16.msrb.mxu0 %v987_v10  ;;  %vm353_vm4 = vweird.f32 %v1024_v11 }
  0x23   :  { %327 = vmatpush.bf16.msra.mxu2 %v988_v26 }
  0x26   :  { %180 = vmatpush.bf16.msrb.mxu0 %v986_v12  ;;  %v1014_v12 = vld [vmem:[%s1356_s4] ss:$0 sm:$0xff] }
  0x2a   :  { %181 = vmatpush.bf16.msrb.mxu0 %v985_v13  ;;  %v349_v13 = vmul.f32 12.0, %v1024_v11 }
  0x2c   :  { %v350_v18 = vsub.f32 1.0, %v349_v13 }
  0x2e   :  { %182 = vmatpush.bf16.msrb.mxu0 %v984_v14  ;;  %v351_v21 = vmul.f32 %v1024_v11, %v350_v18 }
  0x30   :  { %v352_v26 = vadd.f32 %v1024_v11, %v351_v21 }
  0x31   :  { %879 = vmatmul.msk.bf16.vlgmr.msrb.gmra.mxu0 %vm157_vm0, %v80_v17 }
  0x9e   :  { %v170_v25 = vpop.f32.mrf.mxu0 }
  0x9f   :  { %v171_v29 = vadd.f32 %v1013_v28, %v170_v25 }
  0xa6   :  { %v172_v27 = vpop.f32.mrf.mxu0 }
  0xa7   :  { %v173_v38 = vadd.f32 %v1013_v28, %v172_v27 }
  0xae   :  { %v184_v30 = vpop.f32.mrf.mxu0 }
  0xaf   :  { %v185_v31 = vadd.f32 %v184_v30, %v171_v29 }
  0xb1   :  { %v190_v32 = vrot.slane %v185_v31, 2  ;;  %v194_v33 = vrot.slane %v185_v31, 4  ;;  %v198_v34 = vrot.slane %v185_v31, 6 }
  0xb3   :  { %v196_v35 = vadd.f32 %v194_v33, %v185_v31  ;;  %v200_v36 = vadd.f32 %v198_v34, %v185_v31  ;;  %v192_v37 = vadd.f32 %v190_v32, %v185_v31  ;;  %v1205_v34 = vsel %vm353_vm4, %v1024_v11, %v352_v26 }
  0xb5   :  { %v197_v39 = vmul.f32 0.5, %v196_v35  ;;  %v201_v42 = vmul.f32 0.5, %v200_v36  ;;  %v193_v43 = vmul.f32 0.5, %v192_v37 }
  0xb6   :  { %v186_v40 = vpop.f32.mrf.mxu0 }
  0xb7   :  { %v187_v41 = vadd.f32 %v186_v40, %v173_v38  ;;  %v216_v44 = vrot.slane %v197_v39, 6  ;;  %v219_v49 = vrot.slane %v201_v42, 4  ;;  %v224_v50 = vrot.slane %v197_v39, 2  ;;  %v1003_v42 = vld [vmem:[%s1361_s7 + $0x38] sm:$0xff] }
  0xb8   :  { %v226_v51 = vrot.slane %v193_v43, 2  ;;  %v222_v59 = vrot.slane %v193_v43, 4  ;;  %517 = vmatpush.bf16.msra.mxu3 %v1003_v42 }
  0xb9   :  { %v203_v45 = vrot.slane %v187_v41, 2  ;;  %v207_v46 = vrot.slane %v187_v41, 4  ;;  %v239_v52 = vsel %vm238_vm1, %v193_v43, %v216_v44  ;;  %v211_v55 = vrot.slane %v187_v41, 6 }
  0xba   :  { %v241_v58 = vsel %vm240_vm2, %v239_v52, %v219_v49  ;;  %v244_v60 = vsel %vm238_vm1, %v224_v50, %v226_v51  ;;  %v1002_v49 = vld [vmem:[%s1361_s7 + $0x30] sm:$0xff] }
  0xbb   :  { %v205_v47 = vadd.f32 %v203_v45, %v187_v41  ;;  %v209_v48 = vadd.f32 %v207_v46, %v187_v41  ;;  %v243_v62 = vsel %vm242_vm3, %v241_v58, %v222_v59  ;;  %v213_v0 = vadd.f32 %v211_v55, %v187_v41 }
  0xbc   :  { %518 = vmatpush.bf16.msra.mxu3 %v1002_v49 }
  0xbd   :  { %v206_v53 = vmul.f32 0.5, %v205_v47  ;;  %v210_v54 = vmul.f32 0.5, %v209_v48  ;;  %v214_v2 = vmul.f32 0.5, %v213_v0 }
  0xbf   :  { %v229_v56 = vrot.slane %v206_v53, 4  ;;  %v232_v57 = vrot.slane %v210_v54, 2  ;;  %v234_v3 = vrot.slane %v210_v54, 6  ;;  %v247_v4 = vsel %vm238_vm1, %v214_v2, %v206_v53  ;;  %v1001_v54 = vld [vmem:[%s1361_s7 + $0x28] sm:$0xff] }
  0xc0   :  { %v236_v5 = vrot.slane %v206_v53, 6  ;;  %519 = vmatpush.bf16.msra.mxu3 %v1001_v54 }
  0xc1   :  { %v245_v61 = vsel %vm240_vm2, %v244_v60, %v229_v56  ;;  %v248_v6 = vsel %vm240_vm2, %v247_v4, %v234_v3  ;;  %v999_v4 = vld [vmem:[%s1361_s7 + $0x18] sm:$0xff] }
  0xc2   :  { %v246_v63 = vsel %vm242_vm3, %v245_v61, %v232_v57  ;;  %v249_v7 = vsel %vm242_vm3, %v248_v6, %v236_v5  ;;  %v1000_v61 = vld [vmem:[%s1361_s7 + $0x20] sm:$0xff] }
  0xc3   :  { %v266_v1 = vpack.c.bf16 %v246_v63, %v243_v62  ;;  %v267_v8 = vpack.c.bf16 %v249_v7, %v249_v7 }
  0xc4   :  { %520 = vmatpush.bf16.msra.mxu3 %v1000_v61 }
  0xc5   :  { %328 = vmatmul.bf16.vlgmr.msra.gmra.mxu2 %v266_v1 }
  0xc8   :  { %521 = vmatpush.bf16.msra.mxu3 %v999_v4 }
  0xcc   :  { %522 = vmatpush.bf16.msra.mxu3 %v998_v9 }
  0xd5   :  { %333 = vmatmul.bf16.gmra.mxu2 %v267_v8 }
 0x148   :  { %v329_v10 = vpop.f32.mrf.mxu2 }
 0x149   :  { %v330_v16 = vadd.f32 %v1014_v12, %v329_v10 }
 0x150   :  { %v331_v14 = vpop.f32.mrf.mxu2 }
 0x151   :  { %v332_v15 = vadd.f32 %v1014_v12, %v331_v14 }
 0x153   :  { %v340_v17 = vsel %vm240_vm2, %v332_v15, 0.0  ;;  %v384_v27 = vrot.slane %v332_v15, 4 }
 0x154   :  { %v341_v19 = vadd.f32 %v340_v17, %v330_v16 }
 0x156   :  { %v342_v20 = vrot.slane %v341_v19, 4 }
 0x158   :  { %v343_v22 = vadd.f32 %v342_v20, %v341_v19  ;;  %v334_v23 = vpop.f32.mrf.mxu2 }
 0x159   :  { %v335_v24 = vadd.f32 %v1014_v12, %v334_v23  ;;  %v997_v12 = vld [vmem:[%s1361_s7 + $0x8] sm:$0xff] }
 0x15a   :  { %v344_v25 = vrot.slane %v343_v22, 2  ;;  %523 = vmatpush.bf16.msra.mxu3 %v997_v12 }
 0x15b   :  { %v385_v28 = vrot.slane %v335_v24, 4 }
 0x15c   :  { %v345_v29 = vadd.f32 %v344_v25, %v343_v22 }
 0x15d   :  { %v386_v30 = vsel %vm240_vm2, %v384_v27, %v385_v28  ;;  %v389_v31 = vsel %vm240_vm2, %v385_v28, 0.0 }
 0x15e   :  { %v346_v32 = vrot.slane %v345_v29, 1  ;;  %v390_v33 = vadd.f32 %v389_v31, %v386_v30 }
 0x160   :  { %v347_v35 = vadd.f32 %v346_v32, %v345_v29  ;;  %v391_v36 = vrot.slane %v390_v33, 4  ;;  %v336_v37 = vpop.f32.mrf.mxu2 }
 0x162   :  { %v355_v38 = vmul.f32 %v1205_v34, %v347_v35  ;;  %v392_v39 = vadd.f32 %v391_v36, %v390_v33  ;;  %v1015_v33 = vld [vmem:[%s1358_s5] ss:$0 sm:$0xff] }
 0x164   :  { %v1208_v40 = vsub.f32 %v332_v15, %v355_v38  ;;  %v393_v41 = vrot.slane %v392_v39, 2  ;;  %v1213_v43 = vsub.f32 %v330_v16, %v355_v38  ;;  %v1016_v38 = vld [vmem:[%s1359_s6] ss:$0 sm:$0xff] }
 0x166   :  { %v359_v44 = vmul.f32 %v1208_v40, %v1208_v40  ;;  %v394_v45 = vadd.f32 %v393_v41, %v392_v39  ;;  %v358_v46 = vmul.f32 %v1213_v43, %v1213_v43 }
 0x168   :  { %v360_v47 = vsel %vm240_vm2, %v359_v44, 0.0  ;;  %v395_v48 = vrot.slane %v394_v45, 1 }
 0x169   :  { %v361_v50 = vadd.f32 %v360_v47, %v358_v46 }
 0x16a   :  { %v396_v51 = vadd.f32 %v395_v48, %v394_v45 }
 0x16b   :  { %v362_v52 = vrot.slane %v361_v50, 4 }
 0x16c   :  { %v397_v53 = vmul.f32 %v396_v51, %v1205_v34 }
 0x16d   :  { %v363_v55 = vadd.f32 %v362_v52, %v361_v50 }
 0x16e   :  { %v398_v56 = vsub.f32 %v332_v15, %v397_v53  ;;  %v1227_v57 = vsub.f32 %v335_v24, %v397_v53  ;;  %v996_v15 = vld [vmem:[%s1361_s7] sm:$0xff] }
 0x16f   :  { %v364_v58 = vrot.slane %v363_v55, 2  ;;  %524 = vmatpush.bf16.msra.mxu3 %v996_v15  ;;  %v1011_v15 = vld [vmem:[%s1365_s11 + $0x38] sm:$0xff] }
 0x170   :  { %v400_v59 = vmul.f32 %v398_v56, %v398_v56  ;;  %v401_v60 = vmul.f32 %v1227_v57, %v1227_v57  ;;  %707 = vmatpush.bf16.msra.mxu1 %v1011_v15 }
 0x171   :  { %v365_v62 = vadd.f32 %v364_v58, %v363_v55 }
 0x172   :  { %v404_v63 = vrot.slane %v400_v59, 4  ;;  %v405_v0 = vrot.slane %v401_v60, 4 }
 0x173   :  { %v366_v1 = vrot.slane %v365_v62, 1 }
 0x174   :  { %v406_v2 = vsel %vm240_vm2, %v404_v63, %v405_v0  ;;  %v409_v3 = vsel %vm240_vm2, %v405_v0, 0.0 }
 0x175   :  { %v410_v5 = vadd.f32 %v409_v3, %v406_v2  ;;  %v367_v6 = vadd.f32 %v366_v1, %v365_v62 }
 0x177   :  { %v411_v7 = vrot.slane %v410_v5, 4  ;;  %v368_v8 = vmul.f32 %v367_v6, %v1205_v34 }
 0x179   :  { %v412_v10 = vadd.f32 %v411_v7, %v410_v5  ;;  %v369_v11 = vadd.f32 1e-05, %v368_v8 }
 0x17b   :  { %v413_v13 = vrot.slane %v412_v10, 2  ;;  %1025 = vrsqrt.f32 %v369_v11  ;;  %vm376_vm6 = vweird.f32 %v369_v11 }
 0x17d   :  { %v414_v14 = vadd.f32 %v413_v13, %v412_v10 }
 0x17f   :  { %v415_v16 = vrot.slane %v414_v14, 1 }
 0x181   :  { %v1026_v17 = vpop.eup %1025  ;;  %v416_v18 = vadd.f32 %v415_v16, %v414_v14 }
 0x182   :  { %v371_v19 = vmul.f32 %v1026_v17, %v369_v11  ;;  %vm377_vm5 = vweird.f32 %v1026_v17 }
 0x183   :  { %v417_v20 = vmul.f32 %v416_v18, %v1205_v34  ;;  %vm378_vm7 = vmor %vm376_vm6, %vm377_vm5 }
 0x184   :  { %v372_v21 = vmul.f32 %v1026_v17, %v371_v19 }
 0x185   :  { %v418_v22 = vadd.f32 1e-05, %v417_v20 }
 0x186   :  { %v373_v23 = vmul.f32 0.5, %v372_v21 }
 0x187   :  { %1027 = vrsqrt.f32 %v418_v22  ;;  %vm425_vm9 = vweird.f32 %v418_v22 }
 0x188   :  { %v374_v24 = vsub.f32 1.5, %v373_v23 }
 0x18a   :  { %v375_v26 = vmul.f32 %v1026_v17, %v374_v24 }
 0x18c   :  { %v379_v29 = vsel %vm378_vm7, %v1026_v17, %v375_v26 }
 0x18d   :  { %v1028_v25 = vpop.eup %1027  ;;  %v380_v32 = vmul.f32 %v379_v29, %v1213_v43  ;;  %v381_v41 = vmul.f32 %v379_v29, %v1208_v40  ;;  %v1017_v40 = vld [vmem:[%s1360_s8] ss:$0 sm:$0xff] }
 0x18e   :  { %v420_v27 = vmul.f32 %v1028_v25, %v418_v22  ;;  %vm426_vm8 = vweird.f32 %v1028_v25  ;;  %v1010_v22 = vld [vmem:[%s1365_s11 + $0x30] sm:$0xff] }
 0x18f   :  { %vm427_vm10 = vmor %vm425_vm9, %vm426_vm8  ;;  %v435_v37 = vmul.f32 %v1015_v33, %v380_v32  ;;  %708 = vmatpush.bf16.msra.mxu1 %v1010_v22 }
 0x190   :  { %v421_v28 = vmul.f32 %v1028_v25, %v420_v27  ;;  %v1009_v27 = vld [vmem:[%s1365_s11 + $0x28] sm:$0xff] }
 0x191   :  { %v441_v43 = vadd.f32 %v1016_v38, %v435_v37 }
 0x192   :  { %v422_v30 = vmul.f32 0.5, %v421_v28 }
 0x193   :  { %v444_v46 = vmax.f32 %v441_v43, 0.0  ;;  %709 = vmatpush.bf16.msra.mxu1 %v1009_v27 }
 0x194   :  { %v423_v31 = vsub.f32 1.5, %v422_v30 }
 0x196   :  { %v424_v35 = vmul.f32 %v1028_v25, %v423_v31 }
 0x198   :  { %v428_v36 = vsel %vm427_vm10, %v1028_v25, %v424_v35  ;;  %v1008_v35 = vld [vmem:[%s1365_s11 + $0x20] sm:$0xff] }
 0x199   :  { %v429_v39 = vmul.f32 %v428_v36, %v398_v56  ;;  %v430_v48 = vmul.f32 %v428_v36, %v1227_v57  ;;  %710 = vmatpush.bf16.msra.mxu1 %v1008_v35 }
 0x19b   :  { %v431_v42 = vsel %vm240_vm2, %v381_v41, %v429_v39  ;;  %v437_v50 = vmul.f32 %v1015_v33, %v430_v48  ;;  %v1006_v48 = vld [vmem:[%s1365_s11 + $0x10] sm:$0xff] }
 0x19c   :  { %v436_v44 = vmul.f32 %v1015_v33, %v431_v42 }
 0x19d   :  { %v443_v51 = vadd.f32 %v1016_v38, %v437_v50 }
 0x19e   :  { %v442_v45 = vadd.f32 %v1016_v38, %v436_v44  ;;  %v1007_v44 = vld [vmem:[%s1365_s11 + $0x18] sm:$0xff] }
 0x19f   :  { %v446_v52 = vmax.f32 %v443_v51, 0.0  ;;  %711 = vmatpush.bf16.msra.mxu1 %v1007_v44  ;;  %v1005_v51 = vld [vmem:[%s1365_s11 + $0x8] sm:$0xff] }
 0x1a0   :  { %v445_v47 = vmax.f32 %v442_v45, 0.0 }
 0x1a1   :  { %v464_v53 = vpack.c.bf16 %v446_v52, %v446_v52 }
 0x1a2   :  { %v463_v49 = vpack.c.bf16 %v445_v47, %v444_v46 }
 0x1a3   :  { %712 = vmatpush.bf16.msra.mxu1 %v1006_v48 }
 0x1a4   :  { %525 = vmatmul.bf16.vlgmr.msra.gmra.mxu3 %v463_v49 }
 0x1a7   :  { %713 = vmatpush.bf16.msra.mxu1 %v1005_v51 }
 0x1b4   :  { %530 = vmatmul.bf16.gmra.mxu3 %v464_v53 }
 0x227   :  { %v526_v54 = vpop.f32.mrf.mxu3 }
 0x228   :  { %v527_v58 = vadd.f32 %v1017_v40, %v526_v54  ;;  %v1004_v54 = vld [vmem:[%s1365_s11] sm:$0xff] }
 0x229   :  { %714 = vmatpush.bf16.msra.mxu1 %v1004_v54 }
 0x22f   :  { %v528_v55 = vpop.f32.mrf.mxu3 }
 0x230   :  { %v529_v56 = vadd.f32 %v1017_v40, %v528_v55 }
 0x232   :  { %v537_v59 = vsel %vm240_vm2, %v529_v56, 0.0  ;;  %v574_v1 = vrot.slane %v529_v56, 4 }
 0x233   :  { %v538_v60 = vadd.f32 %v537_v59, %v527_v58 }
 0x235   :  { %v539_v61 = vrot.slane %v538_v60, 4 }
 0x237   :  { %v540_v57 = vadd.f32 %v539_v61, %v538_v60  ;;  %v531_v62 = vpop.f32.mrf.mxu3 }
 0x238   :  { %v532_v63 = vadd.f32 %v1017_v40, %v531_v62 }
 0x239   :  { %v541_v0 = vrot.slane %v540_v57, 2 }
 0x23a   :  { %v575_v2 = vrot.slane %v532_v63, 4 }
 0x23b   :  { %v542_v3 = vadd.f32 %v541_v0, %v540_v57 }
 0x23c   :  { %v576_v4 = vsel %vm240_vm2, %v574_v1, %v575_v2  ;;  %v579_v5 = vsel %vm240_vm2, %v575_v2, 0.0 }
 0x23d   :  { %v543_v6 = vrot.slane %v542_v3, 1  ;;  %v580_v7 = vadd.f32 %v579_v5, %v576_v4 }
 0x23f   :  { %v544_v8 = vadd.f32 %v543_v6, %v542_v3  ;;  %v581_v9 = vrot.slane %v580_v7, 4  ;;  %v533_v10 = vpop.f32.mrf.mxu3 }
 0x241   :  { %v545_v11 = vmul.f32 %v544_v8, %v1205_v34  ;;  %v582_v12 = vadd.f32 %v581_v9, %v580_v7  ;;  %v1018_v7 = vld [vmem:[%s1362_s9] ss:$0 sm:$0xff] }
 0x243   :  { %v1267_v13 = vsub.f32 %v529_v56, %v545_v11  ;;  %v583_v14 = vrot.slane %v582_v12, 2  ;;  %v1272_v16 = vsub.f32 %v527_v58, %v545_v11  ;;  %v1019_v11 = vld [vmem:[%s1363_s10] ss:$0 sm:$0xff] }
 0x245   :  { %v549_v17 = vmul.f32 %v1267_v13, %v1267_v13  ;;  %v584_v18 = vadd.f32 %v583_v14, %v582_v12  ;;  %v548_v19 = vmul.f32 %v1272_v16, %v1272_v16 }
 0x247   :  { %v550_v20 = vsel %vm240_vm2, %v549_v17, 0.0  ;;  %v585_v21 = vrot.slane %v584_v18, 1 }
 0x248   :  { %v551_v23 = vadd.f32 %v550_v20, %v548_v19 }
 0x249   :  { %v586_v24 = vadd.f32 %v585_v21, %v584_v18 }
 0x24a   :  { %v552_v25 = vrot.slane %v551_v23, 4 }
 0x24b   :  { %v587_v26 = vmul.f32 %v586_v24, %v1205_v34 }
 0x24c   :  { %v553_v28 = vadd.f32 %v552_v25, %v551_v23 }
 0x24d   :  { %v588_v29 = vsub.f32 %v529_v56, %v587_v26  ;;  %v1286_v30 = vsub.f32 %v532_v63, %v587_v26 }
 0x24e   :  { %v554_v31 = vrot.slane %v553_v28, 2 }
 0x24f   :  { %v590_v32 = vmul.f32 %v588_v29, %v588_v29  ;;  %v591_v33 = vmul.f32 %v1286_v30, %v1286_v30 }
 0x250   :  { %v555_v36 = vadd.f32 %v554_v31, %v553_v28 }
 0x251   :  { %v594_v37 = vrot.slane %v590_v32, 4  ;;  %v595_v38 = vrot.slane %v591_v33, 4 }
 0x252   :  { %v556_v39 = vrot.slane %v555_v36, 1 }
 0x253   :  { %v596_v41 = vsel %vm240_vm2, %v594_v37, %v595_v38  ;;  %v599_v42 = vsel %vm240_vm2, %v595_v38, 0.0 }
 0x254   :  { %v600_v43 = vadd.f32 %v599_v42, %v596_v41  ;;  %v557_v45 = vadd.f32 %v556_v39, %v555_v36 }
 0x256   :  { %v601_v46 = vrot.slane %v600_v43, 4  ;;  %v558_v47 = vmul.f32 %v557_v45, %v1205_v34 }
 0x258   :  { %v602_v49 = vadd.f32 %v601_v46, %v600_v43  ;;  %v559_v50 = vadd.f32 1e-05, %v558_v47 }
 0x25a   :  { %v603_v52 = vrot.slane %v602_v49, 2  ;;  %1029 = vrsqrt.f32 %v559_v50  ;;  %vm566_vm12 = vweird.f32 %v559_v50 }
 0x25c   :  { %v604_v53 = vadd.f32 %v603_v52, %v602_v49 }
 0x25e   :  { %v605_v40 = vrot.slane %v604_v53, 1 }
 0x260   :  { %v1030_v55 = vpop.eup %1029  ;;  %v606_v56 = vadd.f32 %v605_v40, %v604_v53 }
 0x261   :  { %v561_v58 = vmul.f32 %v1030_v55, %v559_v50  ;;  %vm567_vm11 = vweird.f32 %v1030_v55 }
 0x262   :  { %v607_v59 = vmul.f32 %v606_v56, %v1205_v34  ;;  %vm568_vm13 = vmor %vm566_vm12, %vm567_vm11 }
 0x263   :  { %v562_v60 = vmul.f32 %v1030_v55, %v561_v58 }
 0x264   :  { %v608_v61 = vadd.f32 1e-05, %v607_v59 }
 0x265   :  { %v563_v57 = vmul.f32 0.5, %v562_v60 }
 0x266   :  { %1031 = vrsqrt.f32 %v608_v61  ;;  %vm615_vm15 = vweird.f32 %v608_v61 }
 0x267   :  { %v564_v62 = vsub.f32 1.5, %v563_v57 }
 0x269   :  { %v565_v0 = vmul.f32 %v1030_v55, %v564_v62 }
 0x26b   :  { %v569_v3 = vsel %vm568_vm13, %v1030_v55, %v565_v0 }
 0x26c   :  { %v1032_v63 = vpop.eup %1031  ;;  %v570_v6 = vmul.f32 %v569_v3, %v1272_v16  ;;  %v571_v14 = vmul.f32 %v569_v3, %v1267_v13  ;;  %v1020_v13 = vld [vmem:[%s1364_s12] ss:$0 sm:$0xff] }
 0x26d   :  { %v610_v1 = vmul.f32 %v1032_v63, %v608_v61  ;;  %vm616_vm14 = vweird.f32 %v1032_v63 }
 0x26e   :  { %vm617_vm0 = vmor %vm615_vm15, %vm616_vm14  ;;  %v625_v10 = vmul.f32 %v1018_v7, %v570_v6 }
 0x26f   :  { %v611_v2 = vmul.f32 %v1032_v63, %v610_v1 }
 0x270   :  { %v631_v16 = vadd.f32 %v1019_v11, %v625_v10 }
 0x271   :  { %v612_v4 = vmul.f32 0.5, %v611_v2 }
 0x272   :  { %v634_v19 = vmax.f32 %v631_v16, 0.0 }
 0x273   :  { %v613_v5 = vsub.f32 1.5, %v612_v4 }
 0x275   :  { %v614_v8 = vmul.f32 %v1032_v63, %v613_v5 }
 0x277   :  { %v618_v9 = vsel %vm617_vm0, %v1032_v63, %v614_v8 }
 0x278   :  { %v619_v12 = vmul.f32 %v618_v9, %v588_v29  ;;  %v620_v21 = vmul.f32 %v618_v9, %v1286_v30 }
 0x27a   :  { %v621_v15 = vsel %vm240_vm2, %v571_v14, %v619_v12  ;;  %v627_v23 = vmul.f32 %v1018_v7, %v620_v21 }
 0x27b   :  { %v626_v17 = vmul.f32 %v1018_v7, %v621_v15 }
 0x27c   :  { %v633_v24 = vadd.f32 %v1019_v11, %v627_v23 }
 0x27d   :  { %v632_v18 = vadd.f32 %v1019_v11, %v626_v17 }
 0x27e   :  { %v636_v25 = vmax.f32 %v633_v24, 0.0 }
 0x27f   :  { %v635_v20 = vmax.f32 %v632_v18, 0.0 }
 0x280   :  { %v654_v26 = vpack.c.bf16 %v636_v25, %v636_v25 }
 0x281   :  { %v653_v22 = vpack.c.bf16 %v635_v20, %v634_v19 }
 0x283   :  { %715 = vmatmul.bf16.vlgmr.msra.gmra.mxu1 %v653_v22 }
 0x293   :  { %720 = vmatmul.bf16.gmra.mxu1 %v654_v26 }
 0x300   :  { %v716_v27 = vpop.f32.mrf.mxu1 }
 0x301   :  { %v717_v31 = vadd.f32 %v1020_v13, %v716_v27 }
 0x308   :  { %v718_v28 = vpop.f32.mrf.mxu1 }
 0x309   :  { %v719_v29 = vadd.f32 %v1020_v13, %v718_v28 }
 0x30b   :  { %v727_v32 = vsel %vm240_vm2, %v719_v29, 0.0  ;;  %v764_v39 = vrot.slane %v719_v29, 4 }
 0x30c   :  { %v728_v33 = vadd.f32 %v727_v32, %v717_v31 }
 0x30e   :  { %v729_v35 = vrot.slane %v728_v33, 4 }
 0x310   :  { %v730_v30 = vadd.f32 %v729_v35, %v728_v33  ;;  %v721_v36 = vpop.f32.mrf.mxu1 }
 0x311   :  { %v722_v37 = vadd.f32 %v1020_v13, %v721_v36 }
 0x312   :  { %v731_v38 = vrot.slane %v730_v30, 2 }
 0x313   :  { %v765_v41 = vrot.slane %v722_v37, 4 }
 0x314   :  { %v732_v42 = vadd.f32 %v731_v38, %v730_v30 }
 0x315   :  { %v766_v44 = vsel %vm240_vm2, %v764_v39, %v765_v41  ;;  %v769_v43 = vsel %vm240_vm2, %v765_v41, 0.0 }
 0x316   :  { %v733_v45 = vrot.slane %v732_v42, 1  ;;  %v770_v46 = vadd.f32 %v769_v43, %v766_v44 }
 0x318   :  { %v734_v47 = vadd.f32 %v733_v45, %v732_v42  ;;  %v771_v48 = vrot.slane %v770_v46, 4  ;;  %v723_v49 = vpop.f32.mrf.mxu1 }
 0x31a   :  { %v735_v50 = vmul.f32 %v734_v47, %v1205_v34  ;;  %v772_v51 = vadd.f32 %v771_v48, %v770_v46 }
 0x31c   :  { %v736_v52 = vsub.f32 %v717_v31, %v735_v50  ;;  %v1326_v53 = vsub.f32 %v719_v29, %v735_v50  ;;  %v773_v54 = vrot.slane %v772_v51, 2 }
 0x31e   :  { %v738_v40 = vmul.f32 %v736_v52, %v736_v52  ;;  %v739_v55 = vmul.f32 %v1326_v53, %v1326_v53  ;;  %v774_v56 = vadd.f32 %v773_v54, %v772_v51 }
 0x320   :  { %v740_v58 = vsel %vm240_vm2, %v739_v55, 0.0  ;;  %v775_v59 = vrot.slane %v774_v56, 1 }
 0x321   :  { %v741_v60 = vadd.f32 %v740_v58, %v738_v40 }
 0x322   :  { %v776_v61 = vadd.f32 %v775_v59, %v774_v56 }
 0x323   :  { %v742_v57 = vrot.slane %v741_v60, 4 }
 0x324   :  { %v777_v62 = vmul.f32 %v776_v61, %v1205_v34 }
 0x325   :  { %v743_v63 = vadd.f32 %v742_v57, %v741_v60 }
 0x326   :  { %v778_v0 = vsub.f32 %v719_v29, %v777_v62  ;;  %v779_v1 = vsub.f32 %v722_v37, %v777_v62  ;;  %v1021_v29 = vld [vmem:[%s1366_s13] ss:$0 sm:$0xff] }
 0x327   :  { %v744_v2 = vrot.slane %v743_v63, 2 }
 0x328   :  { %v780_v3 = vmul.f32 %v778_v0, %v778_v0  ;;  %v781_v4 = vmul.f32 %v779_v1, %v779_v1 }
 0x329   :  { %v745_v5 = vadd.f32 %v744_v2, %v743_v63 }
 0x32a   :  { %v784_v6 = vrot.slane %v780_v3, 4  ;;  %v785_v7 = vrot.slane %v781_v4, 4 }
 0x32b   :  { %v746_v8 = vrot.slane %v745_v5, 1 }
 0x32c   :  { %v786_v9 = vsel %vm240_vm2, %v784_v6, %v785_v7  ;;  %v789_v10 = vsel %vm240_vm2, %v785_v7, 0.0 }
 0x32d   :  { %v747_v11 = vadd.f32 %v746_v8, %v745_v5  ;;  %v790_v12 = vadd.f32 %v789_v10, %v786_v9 }
 0x32f   :  { %v748_v14 = vmul.f32 %v747_v11, %v1205_v34  ;;  %v791_v15 = vrot.slane %v790_v12, 4 }
 0x331   :  { %v749_v17 = vadd.f32 1e-05, %v748_v14  ;;  %v792_v16 = vadd.f32 %v791_v15, %v790_v12 }
 0x333   :  { %1033 = vrsqrt.f32 %v749_v17  ;;  %v793_v18 = vrot.slane %v792_v16, 2  ;;  %vm756_vm3 = vweird.f32 %v749_v17 }
 0x335   :  { %v794_v19 = vadd.f32 %v793_v18, %v792_v16 }
 0x337   :  { %v795_v20 = vrot.slane %v794_v19, 1 }
 0x339   :  { %v1034_v21 = vpop.eup %1033  ;;  %v796_v22 = vadd.f32 %v795_v20, %v794_v19 }
 0x33a   :  { %v751_v23 = vmul.f32 %v1034_v21, %v749_v17  ;;  %vm757_vm1 = vweird.f32 %v1034_v21 }
 0x33b   :  { %v797_v24 = vmul.f32 %v796_v22, %v1205_v34  ;;  %vm758_vm4 = vmor %vm756_vm3, %vm757_vm1  ;;  %v1022_v34 = vld [vmem:[%s1367_s14] ss:$0 sm:$0xff] }
 0x33c   :  { %v752_v25 = vmul.f32 %v1034_v21, %v751_v23 }
 0x33d   :  { %v798_v26 = vadd.f32 1e-05, %v797_v24 }
 0x33e   :  { %v753_v27 = vmul.f32 0.5, %v752_v25 }
 0x33f   :  { %1035 = vrsqrt.f32 %v798_v26  ;;  %vm805_vm6 = vweird.f32 %v798_v26 }
 0x340   :  { %v754_v13 = vsub.f32 1.5, %v753_v27 }
 0x342   :  { %v755_v28 = vmul.f32 %v1034_v21, %v754_v13 }
 0x344   :  { %v759_v31 = vsel %vm758_vm4, %v1034_v21, %v755_v28 }
 0x345   :  { %v1036_v32 = vpop.eup %1035  ;;  %v760_v33 = vmul.f32 %v759_v31, %v736_v52  ;;  %v761_v44 = vmul.f32 %v759_v31, %v1326_v53 }
 0x346   :  { %v800_v35 = vmul.f32 %v1036_v32, %v798_v26  ;;  %vm806_vm5 = vweird.f32 %v1036_v32 }
 0x347   :  { %v815_v30 = vmul.f32 %v1021_v29, %v760_v33  ;;  %vm807_vm7 = vmor %vm805_vm6, %vm806_vm5 }
 0x348   :  { %v801_v36 = vmul.f32 %v1036_v32, %v800_v35 }
 0x349   :  { %v821_v37 = vadd.f32 %v1022_v34, %v815_v30 }
 0x34a   :  { %v802_v38 = vmul.f32 0.5, %v801_v36 }
 0x34b   :  { %824 = vst [vmem:[%s1368_s15] sm:$0xff] %v821_v37 }
 0x34c   :  { %v803_v39 = vsub.f32 1.5, %v802_v38 }
 0x34e   :  { %v804_v41 = vmul.f32 %v1036_v32, %v803_v39 }
 0x350   :  { %v808_v42 = vsel %vm807_vm7, %v1036_v32, %v804_v41 }
 0x351   :  { %v809_v43 = vmul.f32 %v808_v42, %v778_v0  ;;  %v810_v45 = vmul.f32 %v808_v42, %v779_v1 }
 0x353   :  { %v811_v46 = vsel %vm240_vm2, %v761_v44, %v809_v43  ;;  %v817_v47 = vmul.f32 %v1021_v29, %v810_v45 }
 0x354   :  { %v816_v48 = vmul.f32 %v1021_v29, %v811_v46 }
 0x355   :  { %v823_v49 = vadd.f32 %v1022_v34, %v817_v47 }
 0x356   :  { %v822_v50 = vadd.f32 %v1022_v34, %v816_v48 }
 0x357   :  { %826 = vst [vmem:[%s1368_s15 + $0x10] sm:$0xff] %v823_v49 }
 0x358   :  { %825 = vst [vmem:[%s1368_s15 + $0x8] sm:$0xff] %v822_v50 }

// kernel: fastmoco_forward.3
= control target key start
LH: loop header
LB: loop body
LE: loop exit
PB: predicated region body
PF: predicated region fallthrough
CT: control target
= control target key end

     0   :  { %vm630_vm0 = vcmask 1041408   ;;  %vm740_vm11 = vcmask 1043456   ;;  %s2462_s1 = inlined_call_operand.vmem [shape: bf16[768,128], index: 1, kind: input, shape index: {}]   ;;  %s2463_s2 = inlined_call_operand.vmem [shape: f32[1,128], index: 2, kind: input, shape index: {}]   ;;  %s2464_s0 = inlined_call_operand.vmem [shape: f32[6,768], index: 0, kind: input, shape index: {}]   ;;  %s2465_s4 = inlined_call_operand.vmem [shape: f32[1,128], index: 4, kind: input, shape index: {}]   ;;  %s2466_s3 = inlined_call_operand.vmem [shape: bf16[128,128], index: 3, kind: input, shape index: {}]   ;;  %s2467_s5 = inlined_call_operand.vmem [shape: f32[1,128], index: 5, kind: input, shape index: {}]   ;;  %s2468_s6 = inlined_call_operand.vmem [shape: f32[1,128], index: 6, kind: input, shape index: {}]   ;;  %s2469_s8 = inlined_call_operand.vmem [shape: f32[1,128], index: 8, kind: input, shape index: {}]   ;;  %s2470_s7 = inlined_call_operand.vmem [shape: bf16[128,128], index: 7, kind: input, shape index: {}]   ;;  %s2471_s9 = inlined_call_operand.vmem [shape: f32[1,128], index: 9, kind: input, shape index: {}]   ;;  %s2472_s10 = inlined_call_operand.vmem [shape: f32[1,128], index: 10, kind: input, shape index: {}]   ;;  %s2473_s12 = inlined_call_operand.vmem [shape: f32[1,128], index: 12, kind: input, shape index: {}]   ;;  %s2474_s11 = inlined_call_operand.vmem [shape: bf16[128,128], index: 11, kind: input, shape index: {}]   ;;  %s2475_s13 = inlined_call_operand.vmem [shape: f32[1,128], index: 13, kind: input, shape index: {}]   ;;  %s2476_s14 = inlined_call_operand.vmem [shape: f32[1,128], index: 14, kind: input, shape index: {}]   ;;  %s2477_s16 = inlined_call_operand.vmem [shape: f32[1,128], index: 16, kind: input, shape index: {}]   ;;  %s2478_s15 = inlined_call_operand.vmem [shape: bf16[128,128], index: 15, kind: input, shape index: {}]   ;;  %s2479_s17 = inlined_call_operand.vmem [shape: f32[1,128], index: 17, kind: input, shape index: {}]   ;;  %s2480_s18 = inlined_call_operand.vmem [shape: f32[1,128], index: 18, kind: input, shape index: {}]   ;;  %s2481_s20 = inlined_call_operand.vmem [shape: f32[1,128], index: 20, kind: input, shape index: {}]   ;;  %s2482_s19 = inlined_call_operand.vmem [shape: bf16[128,128], index: 19, kind: input, shape index: {}]   ;;  %s2483_s21 = inlined_call_operand.vmem [shape: f32[6,128], index: 21, kind: output, shape index: {}]  }
   0x1   :  { %2487 = sst [smem:[#allocation2_spill]] %s2462_s1 }
   0x2   :  { %2488 = sst [smem:[#allocation3_spill]] %s2463_s2 }
   0x3   :  { %2489 = sst [smem:[#allocation4_spill]] %s2464_s0 }
   0x4   :  { %2490 = sst [smem:[#allocation5_spill]] %s2465_s4 }
   0x5   :  { %2491 = sst [smem:[#allocation6_spill]] %s2466_s3 }
   0x6   :  { %2492 = sst [smem:[#allocation7_spill]] %s2467_s5 }
   0x7   :  { %s2493_s26 = sld [smem:[#allocation2_spill]] }
   0x8   :  { %s2494_s1 = sld [smem:[#allocation4_spill]] }
   0x9   :  { %s2495_s27 = sld [smem:[#allocation6_spill]] }
   0xa   :  { %s2496_s28 = sld [smem:[#allocation3_spill]] }
   0xb   :  { %s2498_s5 = sld [smem:[#allocation7_spill]] }
   0xd   :  { %v1784_v0 = vld [vmem:[%s2493_s26 + $0x38] sm:$0xff]  ;;  %v1783_v2 = vld [vmem:[%s2493_s26 + $0x30] sm:$0xff]  ;;  %v1782_v8 = vld [vmem:[%s2493_s26 + $0x28] sm:$0xff] }
   0xe   :  { %v1792_v1 = vld [vmem:[%s2493_s26 + $0x78] sm:$0xff]  ;;  %468 = vmatpush.bf16.msra.mxu0 %v1784_v0  ;;  %v1791_v3 = vld [vmem:[%s2493_s26 + $0x70] sm:$0xff]  ;;  %v1790_v9 = vld [vmem:[%s2493_s26 + $0x68] sm:$0xff] }
   0xf   :  { %481 = vmatpush.bf16.msra.mxu1 %v1792_v1  ;;  %v1800_v4 = vld [vmem:[%s2493_s26 + $0xb8] sm:$0xff]  ;;  %v1799_v6 = vld [vmem:[%s2493_s26 + $0xb0] sm:$0xff]  ;;  %v1798_v10 = vld [vmem:[%s2493_s26 + $0xa8] sm:$0xff] }
  0x10   :  { %v1808_v5 = vld [vmem:[%s2493_s26 + $0xf8] sm:$0xff]  ;;  %494 = vmatpush.bf16.msra.mxu2 %v1800_v4  ;;  %v1807_v7 = vld [vmem:[%s2493_s26 + $0xf0] sm:$0xff]  ;;  %v1806_v11 = vld [vmem:[%s2493_s26 + $0xe8] sm:$0xff] }
  0x11   :  { %507 = vmatpush.bf16.msra.mxu3 %v1808_v5  ;;  %v1781_v12 = vld [vmem:[%s2493_s26 + $0x20] sm:$0xff]  ;;  %v1780_v16 = vld [vmem:[%s2493_s26 + $0x18] sm:$0xff]  ;;  %v1779_v20 = vld [vmem:[%s2493_s26 + $0x10] sm:$0xff] }
  0x12   :  { %469 = vmatpush.bf16.msra.mxu0 %v1783_v2  ;;  %v1789_v13 = vld [vmem:[%s2493_s26 + $0x60] sm:$0xff]  ;;  %v1788_v17 = vld [vmem:[%s2493_s26 + $0x58] sm:$0xff]  ;;  %v1787_v21 = vld [vmem:[%s2493_s26 + $0x50] sm:$0xff] }
  0x13   :  { %482 = vmatpush.bf16.msra.mxu1 %v1791_v3  ;;  %v1797_v14 = vld [vmem:[%s2493_s26 + $0xa0] sm:$0xff]  ;;  %v1796_v18 = vld [vmem:[%s2493_s26 + $0x98] sm:$0xff]  ;;  %v1795_v22 = vld [vmem:[%s2493_s26 + $0x90] sm:$0xff] }
  0x14   :  { %495 = vmatpush.bf16.msra.mxu2 %v1799_v6  ;;  %v1805_v15 = vld [vmem:[%s2493_s26 + $0xe0] sm:$0xff]  ;;  %v1804_v19 = vld [vmem:[%s2493_s26 + $0xd8] sm:$0xff]  ;;  %v1803_v23 = vld [vmem:[%s2493_s26 + $0xd0] sm:$0xff] }
  0x15   :  { %508 = vmatpush.bf16.msra.mxu3 %v1807_v7  ;;  %v1778_v24 = vld [vmem:[%s2493_s26 + $0x8] sm:$0xff]  ;;  %v1777_v27 = vld [vmem:[%s2493_s26] sm:$0xff]  ;;  %v1816_v32 = vld [vmem:[%s2493_s26 + $0x138] sm:$0xff] }
  0x16   :  { %470 = vmatpush.bf16.msra.mxu0 %v1782_v8  ;;  %v1786_v25 = vld [vmem:[%s2493_s26 + $0x48] sm:$0xff]  ;;  %v1785_v29 = vld [vmem:[%s2493_s26 + $0x40] sm:$0xff]  ;;  %v1824_v33 = vld [vmem:[%s2493_s26 + $0x178] sm:$0xff] }
  0x17   :  { %483 = vmatpush.bf16.msra.mxu1 %v1790_v9  ;;  %v1794_v26 = vld [vmem:[%s2493_s26 + $0x88] sm:$0xff]  ;;  %v68_v30 = vld [vmem:[%s2494_s1] sm:$0x3f]  ;;  %v70_v37 = vld [vmem:[%s2494_s1 + $0x10] sm:$0x3f] }
  0x18   :  { %496 = vmatpush.bf16.msra.mxu2 %v1798_v10  ;;  %v1802_v28 = vld [vmem:[%s2493_s26 + $0xc8] sm:$0xff]  ;;  %v1793_v34 = vld [vmem:[%s2493_s26 + $0x80] sm:$0xff]  ;;  %v170_v35 = vpack.c.bf16 %v68_v30, %v68_v30  ;;  %v71_v39 = vld [vmem:[%s2494_s1 + $0x18] sm:$0x3f]  ;;  %v172_v42 = vpack.c.bf16 %v70_v37, %v70_v37 }
  0x19   :  { %509 = vmatpush.bf16.msra.mxu3 %v1806_v11  ;;  %v69_v31 = vld [vmem:[%s2494_s1 + $0x8] sm:$0x3f]  ;;  %v1801_v38 = vld [vmem:[%s2493_s26 + $0xc0] sm:$0xff]  ;;  %v1815_v40 = vld [vmem:[%s2493_s26 + $0x130] sm:$0xff]  ;;  %v173_v43 = vpack.c.bf16 %v71_v39, %v71_v39 }
  0x1a   :  { %471 = vmatpush.bf16.msra.mxu0 %v1781_v12  ;;  %v171_v36 = vpack.c.bf16 %v69_v31, %v69_v31  ;;  %v1823_v41 = vld [vmem:[%s2493_s26 + $0x170] sm:$0xff]  ;;  %v1814_v44 = vld [vmem:[%s2493_s26 + $0x128] sm:$0xff]  ;;  %v1813_v46 = vld [vmem:[%s2493_s26 + $0x120] sm:$0xff] }
  0x1b   :  { %484 = vmatpush.bf16.msra.mxu1 %v1789_v13  ;;  %v1822_v45 = vld [vmem:[%s2493_s26 + $0x168] sm:$0xff]  ;;  %v1821_v47 = vld [vmem:[%s2493_s26 + $0x160] sm:$0xff]  ;;  %v1812_v48 = vld [vmem:[%s2493_s26 + $0x118] sm:$0xff] }
  0x1c   :  { %497 = vmatpush.bf16.msra.mxu2 %v1797_v14  ;;  %v1820_v49 = vld [vmem:[%s2493_s26 + $0x158] sm:$0xff]  ;;  %v1811_v50 = vld [vmem:[%s2493_s26 + $0x110] sm:$0xff]  ;;  %v1810_v52 = vld [vmem:[%s2493_s26 + $0x108] sm:$0xff] }
  0x1d   :  { %510 = vmatpush.bf16.msra.mxu3 %v1805_v15  ;;  %v1819_v51 = vld [vmem:[%s2493_s26 + $0x150] sm:$0xff]  ;;  %v1818_v53 = vld [vmem:[%s2493_s26 + $0x148] sm:$0xff]  ;;  %v1809_v54 = vld [vmem:[%s2493_s26 + $0x100] sm:$0xff] }
  0x1e   :  { %472 = vmatpush.bf16.msra.mxu0 %v1780_v16  ;;  %v1817_v55 = vld [vmem:[%s2493_s26 + $0x140] sm:$0xff]  ;;  %v73_v57 = vld [vmem:[%s2494_s1 + $0x28] sm:$0x3f]  ;;  %v1832_v60 = vld [vmem:[%s2495_s27 + $0x38] sm:$0xff] }
  0x1f   :  { %485 = vmatpush.bf16.msra.mxu1 %v1788_v17  ;;  %v72_v56 = vld [vmem:[%s2494_s1 + $0x20] sm:$0x3f]  ;;  %v175_v59 = vpack.c.bf16 %v73_v57, %v73_v57  ;;  %v1831_v61 = vld [vmem:[%s2495_s27 + $0x30] sm:$0xff]  ;;  %v1830_v62 = vld [vmem:[%s2495_s27 + $0x28] sm:$0xff] }
  0x20   :  { %498 = vmatpush.bf16.msra.mxu2 %v1796_v18  ;;  %v174_v58 = vpack.c.bf16 %v72_v56, %v72_v56  ;;  %v1829_v63 = vld [vmem:[%s2495_s27 + $0x20] sm:$0xff]  ;;  %v1828_v0 = vld [vmem:[%s2495_s27 + $0x18] sm:$0xff]  ;;  %v1827_v1 = vld [vmem:[%s2495_s27 + $0x10] sm:$0xff] }
  0x21   :  { %511 = vmatpush.bf16.msra.mxu3 %v1804_v19  ;;  %v1826_v2 = vld [vmem:[%s2495_s27 + $0x8] sm:$0xff]  ;;  %v1825_v3 = vld [vmem:[%s2495_s27] sm:$0xff]  ;;  %v1835_v31 = vld [vmem:[%s2470_s7 + $0x10] sm:$0xff] }
  0x22   :  { %473 = vmatpush.bf16.msra.mxu0 %v1779_v20  ;;  %v1866_v10 = vld [vmem:[%s2496_s28] ss:$0 sm:$0xff]  ;;  %s2497_s28 = sld [smem:[#allocation5_spill]] }
  0x23   :  { %486 = vmatpush.bf16.msra.mxu1 %v1787_v21 }
  0x24   :  { %499 = vmatpush.bf16.msra.mxu2 %v1795_v22 }
  0x25   :  { %512 = vmatpush.bf16.msra.mxu3 %v1803_v23 }
  0x26   :  { %474 = vmatpush.bf16.msra.mxu0 %v1778_v24  ;;  %v1840_v24 = vld [vmem:[%s2470_s7 + $0x38] sm:$0xff] }
  0x27   :  { %487 = vmatpush.bf16.msra.mxu1 %v1786_v25  ;;  %v1839_v25 = vld [vmem:[%s2470_s7 + $0x30] sm:$0xff] }
  0x28   :  { %500 = vmatpush.bf16.msra.mxu2 %v1794_v26  ;;  %v1838_v26 = vld [vmem:[%s2470_s7 + $0x28] sm:$0xff] }
  0x29   :  { %513 = vmatpush.bf16.msra.mxu3 %v1802_v28  ;;  %v1906_v28 = vmov 2.0  }
  0x2a   :  { %475 = vmatpush.bf16.msra.mxu0 %v1777_v27  ;;  %v1837_v27 = vld [vmem:[%s2470_s7 + $0x20] sm:$0xff]  ;;  %1880 = vrcp.f32 %v1906_v28 }
  0x2b   :  { %488 = vmatpush.bf16.msra.mxu1 %v1785_v29  ;;  %v1836_v29 = vld [vmem:[%s2470_s7 + $0x18] sm:$0xff] }
  0x2c   :  { %501 = vmatpush.bf16.msra.mxu2 %v1793_v34 }
  0x2d   :  { %476 = vmatmul.bf16.vlgmr.msra.gmra.mxu0 %v170_v35  ;;  %514 = vmatpush.bf16.msra.mxu3 %v1801_v38  ;;  %v1834_v35 = vld [vmem:[%s2470_s7 + $0x8] sm:$0xff] }
  0x2e   :  { %520 = vmatpush.bf16.msrb.mxu0 %v1816_v32  ;;  %489 = vmatmul.bf16.vlgmr.msra.gmra.mxu1 %v171_v36  ;;  %v1867_v32 = vld [vmem:[%s2497_s28] ss:$0 sm:$0xff] }
  0x2f   :  { %533 = vmatpush.bf16.msrb.mxu1 %v1824_v33  ;;  %502 = vmatmul.bf16.vlgmr.msra.gmra.mxu2 %v172_v42  ;;  %v1833_v42 = vld [vmem:[%s2470_s7] sm:$0xff] }
  0x30   :  { %515 = vmatmul.bf16.vlgmr.msra.gmra.mxu3 %v173_v43  ;;  %615 = vmatpush.bf16.msrb.mxu2 %v1832_v60  ;;  %v1881_v30 = vpop.eup %1880 }
  0x31   :  { %820 = vmatpush.bf16.msrb.mxu3 %v1840_v24  ;;  %v639_v33 = vmul.f32 2.0, %v1881_v30  ;;  %vm643_vm1 = vweird.f32 %v1881_v30 }
  0x32   :  { %521 = vmatpush.bf16.msrb.mxu0 %v1815_v40 }
  0x33   :  { %534 = vmatpush.bf16.msrb.mxu1 %v1823_v41  ;;  %v640_v37 = vsub.f32 1.0, %v639_v33 }
  0x34   :  { %616 = vmatpush.bf16.msrb.mxu2 %v1831_v61 }
  0x35   :  { %821 = vmatpush.bf16.msrb.mxu3 %v1839_v25 }
  0x36   :  { %522 = vmatpush.bf16.msrb.mxu0 %v1814_v44 }
  0x37   :  { %535 = vmatpush.bf16.msrb.mxu1 %v1822_v45  ;;  %v641_v45 = vmul.f32 %v1881_v30, %v640_v37 }
  0x38   :  { %617 = vmatpush.bf16.msrb.mxu2 %v1830_v62 }
  0x39   :  { %822 = vmatpush.bf16.msrb.mxu3 %v1838_v26 }
  0x3a   :  { %523 = vmatpush.bf16.msrb.mxu0 %v1813_v46 }
  0x3b   :  { %536 = vmatpush.bf16.msrb.mxu1 %v1821_v47 }
  0x3c   :  { %618 = vmatpush.bf16.msrb.mxu2 %v1829_v63 }
  0x3d   :  { %823 = vmatpush.bf16.msrb.mxu3 %v1837_v27 }
  0x3e   :  { %524 = vmatpush.bf16.msrb.mxu0 %v1812_v48 }
  0x3f   :  { %537 = vmatpush.bf16.msrb.mxu1 %v1820_v49 }
  0x40   :  { %619 = vmatpush.bf16.msrb.mxu2 %v1828_v0 }
  0x41   :  { %824 = vmatpush.bf16.msrb.mxu3 %v1836_v29 }
  0x42   :  { %525 = vmatpush.bf16.msrb.mxu0 %v1811_v50 }
  0x43   :  { %538 = vmatpush.bf16.msrb.mxu1 %v1819_v51 }
  0x44   :  { %620 = vmatpush.bf16.msrb.mxu2 %v1827_v1 }
  0x45   :  { %825 = vmatpush.bf16.msrb.mxu3 %v1835_v31 }
  0x46   :  { %526 = vmatpush.bf16.msrb.mxu0 %v1810_v52 }
  0x47   :  { %539 = vmatpush.bf16.msrb.mxu1 %v1818_v53  ;;  %v642_v53 = vadd.f32 %v1881_v30, %v641_v45 }
  0x48   :  { %621 = vmatpush.bf16.msrb.mxu2 %v1826_v2 }
  0x49   :  { %826 = vmatpush.bf16.msrb.mxu3 %v1834_v35  ;;  %v2236_v60 = vsel %vm643_vm1, %v1881_v30, %v642_v53 }
  0x4a   :  { %527 = vmatpush.bf16.msrb.mxu0 %v1809_v54 }
  0x4b   :  { %540 = vmatpush.bf16.msrb.mxu1 %v1817_v55 }
  0x4c   :  { %622 = vmatpush.bf16.msrb.mxu2 %v1825_v3 }
  0x4d   :  { %528 = vmatmul.bf16.vlgmr.msrb.gmra.mxu0 %v174_v58  ;;  %827 = vmatpush.bf16.msrb.mxu3 %v1833_v42 }
  0x4e   :  { %541 = vmatmul.bf16.vlgmr.msrb.gmra.mxu1 %v175_v59 }
  0xaa   :  { %v477_v4 = vpop.f32.mrf.mxu0 }
  0xab   :  { %v490_v5 = vpop.f32.mrf.mxu1  ;;  %v478_v11 = vadd.f32 %v1866_v10, %v477_v4 }
  0xad   :  { %v491_v14 = vadd.f32 %v490_v5, %v478_v11 }
  0xb2   :  { %v479_v6 = vpop.f32.mrf.mxu0  ;;  %v503_v8 = vpop.f32.mrf.mxu2 }
  0xb3   :  { %v492_v7 = vpop.f32.mrf.mxu1  ;;  %v516_v9 = vpop.f32.mrf.mxu3  ;;  %v504_v15 = vadd.f32 %v503_v8, %v491_v14 }
  0xb5   :  { %v517_v16 = vadd.f32 %v516_v9, %v504_v15 }
  0xba   :  { %v505_v12 = vpop.f32.mrf.mxu2 }
  0xbb   :  { %v518_v13 = vpop.f32.mrf.mxu3 }
  0xca   :  { %v529_v17 = vpop.f32.mrf.mxu0 }
  0xcb   :  { %v542_v18 = vpop.f32.mrf.mxu1  ;;  %v530_v19 = vadd.f32 %v529_v17, %v517_v16 }
  0xcd   :  { %v543_v20 = vadd.f32 %v542_v18, %v530_v19 }
  0xcf   :  { %v562_v21 = vpack.c.bf16 %v543_v20, %v543_v20 }
  0xd1   :  { %623 = vmatmul.bf16.vlgmr.msrb.gmra.mxu2 %v562_v21 }
  0xd2   :  { %v531_v22 = vpop.f32.mrf.mxu0 }
  0xd3   :  { %v544_v23 = vpop.f32.mrf.mxu1 }
 0x154   :  { %v624_v34 = vpop.f32.mrf.mxu2 }
 0x155   :  { %v625_v36 = vadd.f32 %v1867_v32, %v624_v34 }
 0x157   :  { %v631_v38 = vsel %vm630_vm0, %v625_v36, 0.0  ;;  %v669_v39 = vrot.slane %v625_v36, 2  ;;  %v704_v40 = vrot.slane %v625_v36, 4 }
 0x158   :  { %v632_v41 = vrot.slane %v631_v38, 4 }
 0x159   :  { %v671_v43 = vsel %vm630_vm0, %v669_v39, 0.0  ;;  %v706_v44 = vsel %vm630_vm0, %v704_v40, 0.0 }
 0x15a   :  { %v633_v46 = vadd.f32 %v632_v41, %v631_v38  ;;  %v672_v47 = vrot.slane %v671_v43, 4  ;;  %v707_v48 = vrot.slane %v706_v44, 4 }
 0x15c   :  { %v634_v49 = vrot.slane %v633_v46, 2  ;;  %v673_v50 = vadd.f32 %v672_v47, %v671_v43  ;;  %v708_v51 = vadd.f32 %v707_v48, %v706_v44  ;;  %v626_v52 = vpop.f32.mrf.mxu2 }
 0x15e   :  { %v635_v54 = vadd.f32 %v634_v49, %v633_v46  ;;  %v674_v55 = vrot.slane %v673_v50, 2  ;;  %v709_v56 = vrot.slane %v708_v51, 2 }
 0x160   :  { %v636_v57 = vrot.slane %v635_v54, 1  ;;  %v675_v58 = vadd.f32 %v674_v55, %v673_v50  ;;  %v710_v59 = vadd.f32 %v709_v56, %v708_v51 }
 0x162   :  { %v637_v61 = vadd.f32 %v636_v57, %v635_v54  ;;  %v676_v62 = vrot.slane %v675_v58, 1  ;;  %v711_v63 = vrot.slane %v710_v59, 1 }
 0x164   :  { %v645_v0 = vmul.f32 %v2236_v60, %v637_v61  ;;  %v677_v1 = vadd.f32 %v676_v62, %v675_v58  ;;  %v712_v2 = vadd.f32 %v711_v63, %v710_v59 }
 0x166   :  { %v2239_v3 = vsub.f32 %v625_v36, %v645_v0  ;;  %v678_v4 = vmul.f32 %v677_v1, %v2236_v60  ;;  %v713_v5 = vmul.f32 %v712_v2, %v2236_v60  ;;  %v1868_v0 = vld [vmem:[%s2498_s5] ss:$0 sm:$0xff] }
 0x168   :  { %v647_v6 = vmul.f32 %v2239_v3, %v2239_v3  ;;  %v2245_v7 = vsub.f32 %v625_v36, %v678_v4  ;;  %v2247_v8 = vsub.f32 %v625_v36, %v713_v5  ;;  %v1869_v4 = vld [vmem:[%s2468_s6] ss:$0 sm:$0xff] }
 0x16a   :  { %v648_v9 = vsel %vm630_vm0, %v647_v6, 0.0  ;;  %v680_v10 = vmul.f32 %v2245_v7, %v2245_v7  ;;  %v715_v11 = vmul.f32 %v2247_v8, %v2247_v8 }
 0x16b   :  { %v649_v12 = vrot.slane %v648_v9, 4 }
 0x16c   :  { %v682_v13 = vrot.slane %v680_v10, 2  ;;  %v717_v14 = vrot.slane %v715_v11, 4  ;;  %v1870_v10 = vld [vmem:[%s2469_s8] ss:$0 sm:$0xff] }
 0x16d   :  { %v650_v15 = vadd.f32 %v649_v12, %v648_v9 }
 0x16e   :  { %v684_v16 = vsel %vm630_vm0, %v682_v13, 0.0  ;;  %v719_v17 = vsel %vm630_vm0, %v717_v14, 0.0 }
 0x16f   :  { %v651_v18 = vrot.slane %v650_v15, 2  ;;  %v685_v19 = vrot.slane %v684_v16, 4  ;;  %v720_v20 = vrot.slane %v719_v17, 4 }
 0x171   :  { %v652_v21 = vadd.f32 %v651_v18, %v650_v15  ;;  %v686_v22 = vadd.f32 %v685_v19, %v684_v16  ;;  %v721_v23 = vadd.f32 %v720_v20, %v719_v17  ;;  %v1848_v18 = vld [vmem:[%s2474_s11 + $0x38] sm:$0xff] }
 0x172   :  { %1016 = vmatpush.bf16.msra.mxu0 %v1848_v18 }
 0x173   :  { %v653_v24 = vrot.slane %v652_v21, 1  ;;  %v687_v25 = vrot.slane %v686_v22, 2  ;;  %v722_v26 = vrot.slane %v721_v23, 2 }
 0x175   :  { %v654_v27 = vadd.f32 %v653_v24, %v652_v21  ;;  %v688_v28 = vadd.f32 %v687_v25, %v686_v22  ;;  %v723_v29 = vadd.f32 %v722_v26, %v721_v23  ;;  %v1847_v22 = vld [vmem:[%s2474_s11 + $0x30] sm:$0xff] }
 0x176   :  { %1017 = vmatpush.bf16.msra.mxu0 %v1847_v22 }
 0x177   :  { %v655_v30 = vmul.f32 %v654_v27, %v2236_v60  ;;  %v689_v31 = vrot.slane %v688_v28, 1  ;;  %v724_v32 = vrot.slane %v723_v29, 1 }
 0x179   :  { %v656_v33 = vadd.f32 1e-05, %v655_v30  ;;  %v690_v34 = vadd.f32 %v689_v31, %v688_v28  ;;  %v725_v35 = vadd.f32 %v724_v32, %v723_v29  ;;  %v1846_v30 = vld [vmem:[%s2474_s11 + $0x28] sm:$0xff] }
 0x17a   :  { %1018 = vmatpush.bf16.msra.mxu0 %v1846_v30 }
 0x17b   :  { %1882 = vrsqrt.f32 %v656_v33  ;;  %v691_v36 = vmul.f32 %v690_v34, %v2236_v60  ;;  %v726_v37 = vmul.f32 %v725_v35, %v2236_v60  ;;  %vm663_vm3 = vweird.f32 %v656_v33 }
 0x17d   :  { %v692_v38 = vadd.f32 1e-05, %v691_v36  ;;  %v727_v39 = vadd.f32 1e-05, %v726_v37  ;;  %v1845_v37 = vld [vmem:[%s2474_s11 + $0x20] sm:$0xff] }
 0x17e   :  { %1019 = vmatpush.bf16.msra.mxu0 %v1845_v37 }
 0x17f   :  { %1884 = vrsqrt.f32 %v692_v38  ;;  %vm699_vm7 = vweird.f32 %v692_v38  ;;  %vm734_vm9 = vweird.f32 %v727_v39 }
 0x180   :  { %1886 = vrsqrt.f32 %v727_v39 }
 0x181   :  { %v1883_v40 = vpop.eup %1882 }
 0x182   :  { %v658_v41 = vmul.f32 %v1883_v40, %v656_v33  ;;  %vm664_vm2 = vweird.f32 %v1883_v40 }
 0x183   :  { %vm665_vm5 = vmor %vm663_vm3, %vm664_vm2 }
 0x184   :  { %v659_v42 = vmul.f32 %v1883_v40, %v658_v41 }
 0x185   :  { %v1885_v43 = vpop.eup %1884 }
 0x186   :  { %v1887_v44 = vpop.eup %1886  ;;  %v660_v45 = vmul.f32 0.5, %v659_v42  ;;  %v694_v46 = vmul.f32 %v1885_v43, %v692_v38  ;;  %vm700_vm4 = vweird.f32 %v1885_v43 }
 0x187   :  { %v729_v47 = vmul.f32 %v1887_v44, %v727_v39  ;;  %vm735_vm6 = vweird.f32 %v1887_v44  ;;  %vm701_vm8 = vmor %vm699_vm7, %vm700_vm4 }
 0x188   :  { %v661_v48 = vsub.f32 1.5, %v660_v45  ;;  %v695_v49 = vmul.f32 %v1885_v43, %v694_v46  ;;  %vm736_vm10 = vmor %vm734_vm9, %vm735_vm6 }
 0x189   :  { %v730_v50 = vmul.f32 %v1887_v44, %v729_v47 }
 0x18a   :  { %v662_v51 = vmul.f32 %v1883_v40, %v661_v48  ;;  %v696_v52 = vmul.f32 0.5, %v695_v49 }
 0x18b   :  { %v731_v53 = vmul.f32 0.5, %v730_v50 }
 0x18c   :  { %v697_v54 = vsub.f32 1.5, %v696_v52  ;;  %v666_v56 = vsel %vm665_vm5, %v1883_v40, %v662_v51  ;;  %v1843_v52 = vld [vmem:[%s2474_s11 + $0x10] sm:$0xff] }
 0x18d   :  { %v732_v55 = vsub.f32 1.5, %v731_v53  ;;  %v667_v61 = vmul.f32 %v666_v56, %v2239_v3 }
 0x18e   :  { %v698_v57 = vmul.f32 %v1885_v43, %v697_v54 }
 0x18f   :  { %v733_v58 = vmul.f32 %v1887_v44, %v732_v55 }
 0x190   :  { %v702_v59 = vsel %vm701_vm8, %v1885_v43, %v698_v57 }
 0x191   :  { %v703_v62 = vmul.f32 %v702_v59, %v2245_v7  ;;  %v737_v63 = vsel %vm736_vm10, %v1887_v44, %v733_v58  ;;  %v1844_v44 = vld [vmem:[%s2474_s11 + $0x18] sm:$0xff] }
 0x192   :  { %v738_v1 = vmul.f32 %v737_v63, %v2247_v8  ;;  %1020 = vmatpush.bf16.msra.mxu0 %v1844_v44 }
 0x193   :  { %v739_v2 = vsel %vm630_vm0, %v667_v61, %v703_v62  ;;  %v1842_v61 = vld [vmem:[%s2474_s11 + $0x8] sm:$0xff] }
 0x194   :  { %v741_v5 = vsel %vm740_vm11, %v739_v2, %v738_v1 }
 0x195   :  { %v745_v6 = vmul.f32 %v1868_v0, %v741_v5  ;;  %v1841_v5 = vld [vmem:[%s2474_s11] sm:$0xff] }
 0x196   :  { %1021 = vmatpush.bf16.msra.mxu0 %v1843_v52 }
 0x197   :  { %v749_v3 = vadd.f32 %v1869_v4, %v745_v6 }
 0x199   :  { %v750_v9 = vmax.f32 %v749_v3, 0.0 }
 0x19a   :  { %1022 = vmatpush.bf16.msra.mxu0 %v1842_v61  ;;  %v1856_v61 = vld [vmem:[%s2478_s15 + $0x38] sm:$0xff] }
 0x19b   :  { %v767_v7 = vpack.c.bf16 %v750_v9, %v750_v9  ;;  %1211 = vmatpush.bf16.msra.mxu1 %v1856_v61 }
 0x19d   :  { %828 = vmatmul.bf16.vlgmr.msrb.gmra.mxu3 %v767_v7 }
 0x19e   :  { %1023 = vmatpush.bf16.msra.mxu0 %v1841_v5 }
 0x220   :  { %v829_v11 = vpop.f32.mrf.mxu3 }
 0x221   :  { %v830_v12 = vadd.f32 %v1870_v10, %v829_v11 }
 0x223   :  { %v835_v8 = vsel %vm630_vm0, %v830_v12, 0.0  ;;  %v866_v13 = vrot.slane %v830_v12, 2  ;;  %v901_v14 = vrot.slane %v830_v12, 4 }
 0x224   :  { %v836_v15 = vrot.slane %v835_v8, 4 }
 0x225   :  { %v868_v16 = vsel %vm630_vm0, %v866_v13, 0.0  ;;  %v903_v17 = vsel %vm630_vm0, %v901_v14, 0.0 }
 0x226   :  { %v837_v19 = vadd.f32 %v836_v15, %v835_v8  ;;  %v869_v20 = vrot.slane %v868_v16, 4  ;;  %v904_v21 = vrot.slane %v903_v17, 4 }
 0x228   :  { %v838_v23 = vrot.slane %v837_v19, 2  ;;  %v870_v24 = vadd.f32 %v869_v20, %v868_v16  ;;  %v905_v25 = vadd.f32 %v904_v21, %v903_v17  ;;  %v831_v26 = vpop.f32.mrf.mxu3 }
 0x22a   :  { %v839_v27 = vadd.f32 %v838_v23, %v837_v19  ;;  %v871_v28 = vrot.slane %v870_v24, 2  ;;  %v906_v29 = vrot.slane %v905_v25, 2 }
 0x22c   :  { %v840_v31 = vrot.slane %v839_v27, 1  ;;  %v872_v32 = vadd.f32 %v871_v28, %v870_v24  ;;  %v907_v33 = vadd.f32 %v906_v29, %v905_v25 }
 0x22e   :  { %v841_v34 = vadd.f32 %v840_v31, %v839_v27  ;;  %v873_v35 = vrot.slane %v872_v32, 1  ;;  %v908_v36 = vrot.slane %v907_v33, 1 }
 0x230   :  { %v842_v38 = vmul.f32 %v841_v34, %v2236_v60  ;;  %v874_v39 = vadd.f32 %v873_v35, %v872_v32  ;;  %v909_v40 = vadd.f32 %v908_v36, %v907_v33 }
 0x232   :  { %v2289_v41 = vsub.f32 %v830_v12, %v842_v38  ;;  %v875_v42 = vmul.f32 %v874_v39, %v2236_v60  ;;  %v910_v43 = vmul.f32 %v909_v40, %v2236_v60 }
 0x234   :  { %v844_v45 = vmul.f32 %v2289_v41, %v2289_v41  ;;  %v2298_v46 = vsub.f32 %v830_v12, %v875_v42  ;;  %v2300_v47 = vsub.f32 %v830_v12, %v910_v43  ;;  %v1871_v43 = vld [vmem:[%s2471_s9] ss:$0 sm:$0xff] }
 0x236   :  { %v845_v48 = vsel %vm630_vm0, %v844_v45, 0.0  ;;  %v877_v49 = vmul.f32 %v2298_v46, %v2298_v46  ;;  %v912_v50 = vmul.f32 %v2300_v47, %v2300_v47 }
 0x237   :  { %v846_v51 = vrot.slane %v845_v48, 4 }
 0x238   :  { %v879_v53 = vrot.slane %v877_v49, 2  ;;  %v914_v54 = vrot.slane %v912_v50, 4 }
 0x239   :  { %v847_v55 = vadd.f32 %v846_v51, %v845_v48  ;;  %v1872_v48 = vld [vmem:[%s2472_s10] ss:$0 sm:$0xff] }
 0x23a   :  { %v881_v56 = vsel %vm630_vm0, %v879_v53, 0.0  ;;  %v916_v57 = vsel %vm630_vm0, %v914_v54, 0.0 }
 0x23b   :  { %v848_v58 = vrot.slane %v847_v55, 2  ;;  %v882_v59 = vrot.slane %v881_v56, 4  ;;  %v917_v62 = vrot.slane %v916_v57, 4 }
 0x23d   :  { %v849_v63 = vadd.f32 %v848_v58, %v847_v55  ;;  %v883_v0 = vadd.f32 %v882_v59, %v881_v56  ;;  %v918_v1 = vadd.f32 %v917_v62, %v916_v57 }
 0x23f   :  { %v850_v2 = vrot.slane %v849_v63, 1  ;;  %v884_v4 = vrot.slane %v883_v0, 2  ;;  %v919_v6 = vrot.slane %v918_v1, 2 }
 0x241   :  { %v851_v3 = vadd.f32 %v850_v2, %v849_v63  ;;  %v885_v9 = vadd.f32 %v884_v4, %v883_v0  ;;  %v920_v7 = vadd.f32 %v919_v6, %v918_v1  ;;  %v1855_v1 = vld [vmem:[%s2478_s15 + $0x30] sm:$0xff] }
 0x242   :  { %1212 = vmatpush.bf16.msra.mxu1 %v1855_v1 }
 0x243   :  { %v886_v10 = vrot.slane %v885_v9, 1  ;;  %v852_v11 = vmul.f32 %v851_v3, %v2236_v60  ;;  %v921_v12 = vrot.slane %v920_v7, 1 }
 0x245   :  { %v887_v8 = vadd.f32 %v886_v10, %v885_v9  ;;  %v853_v13 = vadd.f32 1e-05, %v852_v11  ;;  %v922_v14 = vadd.f32 %v921_v12, %v920_v7  ;;  %v1854_v10 = vld [vmem:[%s2478_s15 + $0x28] sm:$0xff] }
 0x246   :  { %1213 = vmatpush.bf16.msra.mxu1 %v1854_v10 }
 0x247   :  { %1888 = vrsqrt.f32 %v853_v13  ;;  %v888_v15 = vmul.f32 %v887_v8, %v2236_v60  ;;  %v923_v16 = vmul.f32 %v922_v14, %v2236_v60  ;;  %vm860_vm13 = vweird.f32 %v853_v13 }
 0x249   :  { %v889_v17 = vadd.f32 1e-05, %v888_v15  ;;  %v924_v18 = vadd.f32 1e-05, %v923_v16  ;;  %v1853_v16 = vld [vmem:[%s2478_s15 + $0x20] sm:$0xff] }
 0x24a   :  { %1214 = vmatpush.bf16.msra.mxu1 %v1853_v16 }
 0x24b   :  { %1890 = vrsqrt.f32 %v889_v17  ;;  %vm896_vm2 = vweird.f32 %v889_v17  ;;  %vm931_vm4 = vweird.f32 %v924_v18 }
 0x24c   :  { %1892 = vrsqrt.f32 %v924_v18 }
 0x24d   :  { %v1889_v19 = vpop.eup %1888 }
 0x24e   :  { %v855_v20 = vmul.f32 %v1889_v19, %v853_v13  ;;  %vm861_vm12 = vweird.f32 %v1889_v19 }
 0x24f   :  { %vm862_vm15 = vmor %vm860_vm13, %vm861_vm12 }
 0x250   :  { %v856_v21 = vmul.f32 %v1889_v19, %v855_v20 }
 0x251   :  { %v1891_v22 = vpop.eup %1890 }
 0x252   :  { %v1893_v23 = vpop.eup %1892  ;;  %v857_v24 = vmul.f32 0.5, %v856_v21  ;;  %v891_v25 = vmul.f32 %v1891_v22, %v889_v17  ;;  %vm897_vm14 = vweird.f32 %v1891_v22 }
 0x253   :  { %v926_v26 = vmul.f32 %v1893_v23, %v924_v18  ;;  %vm932_vm1 = vweird.f32 %v1893_v23  ;;  %vm898_vm3 = vmor %vm896_vm2, %vm897_vm14 }
 0x254   :  { %v858_v27 = vsub.f32 1.5, %v857_v24  ;;  %v892_v28 = vmul.f32 %v1891_v22, %v891_v25  ;;  %vm933_vm5 = vmor %vm931_vm4, %vm932_vm1 }
 0x255   :  { %v927_v29 = vmul.f32 %v1893_v23, %v926_v26 }
 0x256   :  { %v859_v30 = vmul.f32 %v1889_v19, %v858_v27  ;;  %v893_v31 = vmul.f32 0.5, %v892_v28 }
 0x257   :  { %v928_v32 = vmul.f32 0.5, %v927_v29 }
 0x258   :  { %v894_v33 = vsub.f32 1.5, %v893_v31  ;;  %v863_v35 = vsel %vm862_vm15, %v1889_v19, %v859_v30  ;;  %v1851_v31 = vld [vmem:[%s2478_s15 + $0x10] sm:$0xff] }
 0x259   :  { %v929_v34 = vsub.f32 1.5, %v928_v32  ;;  %v864_v39 = vmul.f32 %v863_v35, %v2289_v41 }
 0x25a   :  { %v895_v36 = vmul.f32 %v1891_v22, %v894_v33 }
 0x25b   :  { %v930_v37 = vmul.f32 %v1893_v23, %v929_v34 }
 0x25c   :  { %v899_v38 = vsel %vm898_vm3, %v1891_v22, %v895_v36 }
 0x25d   :  { %v900_v40 = vmul.f32 %v899_v38, %v2298_v46  ;;  %v934_v42 = vsel %vm933_vm5, %v1893_v23, %v930_v37  ;;  %v1873_v46 = vld [vmem:[%s2473_s12] ss:$0 sm:$0xff]  ;;  %v1852_v23 = vld [vmem:[%s2478_s15 + $0x18] sm:$0xff] }
 0x25e   :  { %v935_v44 = vmul.f32 %v934_v42, %v2300_v47  ;;  %1215 = vmatpush.bf16.msra.mxu1 %v1852_v23 }
 0x25f   :  { %v936_v45 = vsel %vm630_vm0, %v864_v39, %v900_v40  ;;  %v1850_v39 = vld [vmem:[%s2478_s15 + $0x8] sm:$0xff] }
 0x260   :  { %v937_v49 = vsel %vm740_vm11, %v936_v45, %v935_v44 }
 0x261   :  { %v941_v50 = vmul.f32 %v1871_v43, %v937_v49  ;;  %v1849_v49 = vld [vmem:[%s2478_s15] sm:$0xff] }
 0x262   :  { %1216 = vmatpush.bf16.msra.mxu1 %v1851_v31 }
 0x263   :  { %v945_v51 = vadd.f32 %v1872_v48, %v941_v50 }
 0x265   :  { %v946_v41 = vmax.f32 %v945_v51, 0.0 }
 0x266   :  { %1217 = vmatpush.bf16.msra.mxu1 %v1850_v39 }
 0x267   :  { %v963_v52 = vpack.c.bf16 %v946_v41, %v946_v41 }
 0x269   :  { %1024 = vmatmul.bf16.vlgmr.msra.gmra.mxu0 %v963_v52 }
 0x26a   :  { %1218 = vmatpush.bf16.msra.mxu1 %v1849_v49 }
 0x2e6   :  { %v1025_v53 = vpop.f32.mrf.mxu0 }
 0x2e7   :  { %v1026_v54 = vadd.f32 %v1873_v46, %v1025_v53 }
 0x2e9   :  { %v1031_v47 = vsel %vm630_vm0, %v1026_v54, 0.0  ;;  %v1062_v55 = vrot.slane %v1026_v54, 2  ;;  %v1097_v56 = vrot.slane %v1026_v54, 4 }
 0x2ea   :  { %v1032_v57 = vrot.slane %v1031_v47, 4 }
 0x2eb   :  { %v1064_v58 = vsel %vm630_vm0, %v1062_v55, 0.0  ;;  %v1099_v59 = vsel %vm630_vm0, %v1097_v56, 0.0 }
 0x2ec   :  { %v1033_v62 = vadd.f32 %v1032_v57, %v1031_v47  ;;  %v1065_v63 = vrot.slane %v1064_v58, 4  ;;  %v1100_v0 = vrot.slane %v1099_v59, 4 }
 0x2ee   :  { %v1034_v2 = vrot.slane %v1033_v62, 2  ;;  %v1066_v4 = vadd.f32 %v1065_v63, %v1064_v58  ;;  %v1101_v5 = vadd.f32 %v1100_v0, %v1099_v59  ;;  %v1027_v6 = vpop.f32.mrf.mxu0 }
 0x2f0   :  { %v1035_v3 = vadd.f32 %v1034_v2, %v1033_v62  ;;  %v1067_v9 = vrot.slane %v1066_v4, 2  ;;  %v1102_v7 = vrot.slane %v1101_v5, 2 }
 0x2f2   :  { %v1036_v11 = vrot.slane %v1035_v3, 1  ;;  %v1068_v12 = vadd.f32 %v1067_v9, %v1066_v4  ;;  %v1103_v8 = vadd.f32 %v1102_v7, %v1101_v5 }
 0x2f4   :  { %v1037_v13 = vadd.f32 %v1036_v11, %v1035_v3  ;;  %v1069_v14 = vrot.slane %v1068_v12, 1  ;;  %v1104_v15 = vrot.slane %v1103_v8, 1 }
 0x2f6   :  { %v1038_v17 = vmul.f32 %v1037_v13, %v2236_v60  ;;  %v1070_v18 = vadd.f32 %v1069_v14, %v1068_v12  ;;  %v1105_v19 = vadd.f32 %v1104_v15, %v1103_v8 }
 0x2f8   :  { %v2351_v20 = vsub.f32 %v1026_v54, %v1038_v17  ;;  %v1071_v21 = vmul.f32 %v1070_v18, %v2236_v60  ;;  %v1106_v22 = vmul.f32 %v1105_v19, %v2236_v60 }
 0x2fa   :  { %v1040_v24 = vmul.f32 %v2351_v20, %v2351_v20  ;;  %v2360_v25 = vsub.f32 %v1026_v54, %v1071_v21  ;;  %v2362_v26 = vsub.f32 %v1026_v54, %v1106_v22  ;;  %v1874_v22 = vld [vmem:[%s2475_s13] ss:$0 sm:$0xff] }
 0x2fc   :  { %v1041_v27 = vsel %vm630_vm0, %v1040_v24, 0.0  ;;  %v1073_v28 = vmul.f32 %v2360_v25, %v2360_v25  ;;  %v1108_v29 = vmul.f32 %v2362_v26, %v2362_v26 }
 0x2fd   :  { %v1042_v30 = vrot.slane %v1041_v27, 4 }
 0x2fe   :  { %v1075_v32 = vrot.slane %v1073_v28, 2  ;;  %v1110_v33 = vrot.slane %v1108_v29, 4 }
 0x2ff   :  { %v1043_v34 = vadd.f32 %v1042_v30, %v1041_v27  ;;  %v1875_v27 = vld [vmem:[%s2476_s14] ss:$0 sm:$0xff] }
 0x300   :  { %v1077_v35 = vsel %vm630_vm0, %v1075_v32, 0.0  ;;  %v1112_v36 = vsel %vm630_vm0, %v1110_v33, 0.0 }
 0x301   :  { %v1044_v37 = vrot.slane %v1043_v34, 2  ;;  %v1078_v38 = vrot.slane %v1077_v35, 4  ;;  %v1113_v40 = vrot.slane %v1112_v36, 4 }
 0x303   :  { %v1045_v42 = vadd.f32 %v1044_v37, %v1043_v34  ;;  %v1079_v43 = vadd.f32 %v1078_v38, %v1077_v35  ;;  %v1114_v44 = vadd.f32 %v1113_v40, %v1112_v36  ;;  %v1864_v38 = vld [vmem:[%s2482_s19 + $0x38] sm:$0xff] }
 0x304   :  { %1407 = vmatpush.bf16.msra.mxu2 %v1864_v38 }
 0x305   :  { %v1046_v45 = vrot.slane %v1045_v42, 1  ;;  %v1080_v48 = vrot.slane %v1079_v43, 2  ;;  %v1115_v50 = vrot.slane %v1114_v44, 2 }
 0x307   :  { %v1047_v51 = vadd.f32 %v1046_v45, %v1045_v42  ;;  %v1081_v41 = vadd.f32 %v1080_v48, %v1079_v43  ;;  %v1116_v52 = vadd.f32 %v1115_v50, %v1114_v44  ;;  %v1863_v43 = vld [vmem:[%s2482_s19 + $0x30] sm:$0xff] }
 0x308   :  { %1408 = vmatpush.bf16.msra.mxu2 %v1863_v43 }
 0x309   :  { %v1082_v46 = vrot.slane %v1081_v41, 1  ;;  %v1048_v53 = vmul.f32 %v1047_v51, %v2236_v60  ;;  %v1117_v54 = vrot.slane %v1116_v52, 1 }
 0x30b   :  { %v1083_v47 = vadd.f32 %v1082_v46, %v1081_v41  ;;  %v1049_v55 = vadd.f32 1e-05, %v1048_v53  ;;  %v1118_v56 = vadd.f32 %v1117_v54, %v1116_v52  ;;  %v1862_v52 = vld [vmem:[%s2482_s19 + $0x28] sm:$0xff] }
 0x30c   :  { %1409 = vmatpush.bf16.msra.mxu2 %v1862_v52 }
 0x30d   :  { %1894 = vrsqrt.f32 %v1049_v55  ;;  %v1084_v57 = vmul.f32 %v1083_v47, %v2236_v60  ;;  %v1119_v58 = vmul.f32 %v1118_v56, %v2236_v60  ;;  %vm1056_vm7 = vweird.f32 %v1049_v55 }
 0x30f   :  { %v1085_v59 = vadd.f32 1e-05, %v1084_v57  ;;  %v1120_v61 = vadd.f32 1e-05, %v1119_v58  ;;  %v1861_v57 = vld [vmem:[%s2482_s19 + $0x20] sm:$0xff] }
 0x310   :  { %1410 = vmatpush.bf16.msra.mxu2 %v1861_v57 }
 0x311   :  { %1896 = vrsqrt.f32 %v1085_v59  ;;  %vm1092_vm12 = vweird.f32 %v1085_v59  ;;  %vm1127_vm14 = vweird.f32 %v1120_v61 }
 0x312   :  { %1898 = vrsqrt.f32 %v1120_v61 }
 0x313   :  { %v1895_v62 = vpop.eup %1894 }
 0x314   :  { %v1051_v63 = vmul.f32 %v1895_v62, %v1049_v55  ;;  %vm1057_vm6 = vweird.f32 %v1895_v62 }
 0x315   :  { %vm1058_vm9 = vmor %vm1056_vm7, %vm1057_vm6 }
 0x316   :  { %v1052_v0 = vmul.f32 %v1895_v62, %v1051_v63 }
 0x317   :  { %v1897_v1 = vpop.eup %1896 }
 0x318   :  { %v1899_v2 = vpop.eup %1898  ;;  %v1053_v4 = vmul.f32 0.5, %v1052_v0  ;;  %v1087_v5 = vmul.f32 %v1897_v1, %v1085_v59  ;;  %vm1093_vm8 = vweird.f32 %v1897_v1 }
 0x319   :  { %v1122_v6 = vmul.f32 %v1899_v2, %v1120_v61  ;;  %vm1128_vm10 = vweird.f32 %v1899_v2  ;;  %vm1094_vm13 = vmor %vm1092_vm12, %vm1093_vm8 }
 0x31a   :  { %v1054_v3 = vsub.f32 1.5, %v1053_v4  ;;  %v1088_v9 = vmul.f32 %v1897_v1, %v1087_v5  ;;  %vm1129_vm15 = vmor %vm1127_vm14, %vm1128_vm10 }
 0x31b   :  { %v1123_v7 = vmul.f32 %v1899_v2, %v1122_v6 }
 0x31c   :  { %v1055_v10 = vmul.f32 %v1895_v62, %v1054_v3  ;;  %v1089_v11 = vmul.f32 0.5, %v1088_v9 }
 0x31d   :  { %v1124_v12 = vmul.f32 0.5, %v1123_v7 }
 0x31e   :  { %v1090_v8 = vsub.f32 1.5, %v1089_v11  ;;  %v1059_v14 = vsel %vm1058_vm9, %v1895_v62, %v1055_v10  ;;  %v1859_v10 = vld [vmem:[%s2482_s19 + $0x10] sm:$0xff] }
 0x31f   :  { %v1125_v13 = vsub.f32 1.5, %v1124_v12  ;;  %v1060_v18 = vmul.f32 %v1059_v14, %v2351_v20 }
 0x320   :  { %v1091_v15 = vmul.f32 %v1897_v1, %v1090_v8 }
 0x321   :  { %v1126_v16 = vmul.f32 %v1899_v2, %v1125_v13 }
 0x322   :  { %v1095_v17 = vsel %vm1094_vm13, %v1897_v1, %v1091_v15  ;;  %v1860_v1 = vld [vmem:[%s2482_s19 + $0x18] sm:$0xff] }
 0x323   :  { %v1096_v19 = vmul.f32 %v1095_v17, %v2360_v25  ;;  %v1130_v21 = vsel %vm1129_vm15, %v1899_v2, %v1126_v16  ;;  %v1876_v25 = vld [vmem:[%s2477_s16] ss:$0 sm:$0xff]  ;;  %1411 = vmatpush.bf16.msra.mxu2 %v1860_v1  ;;  %v1858_v17 = vld [vmem:[%s2482_s19 + $0x8] sm:$0xff] }
 0x324   :  { %v1131_v23 = vmul.f32 %v1130_v21, %v2362_v26 }
 0x325   :  { %v1132_v24 = vsel %vm630_vm0, %v1060_v18, %v1096_v19 }
 0x326   :  { %v1133_v28 = vsel %vm740_vm11, %v1132_v24, %v1131_v23 }
 0x327   :  { %v1137_v29 = vmul.f32 %v1874_v22, %v1133_v28  ;;  %1412 = vmatpush.bf16.msra.mxu2 %v1859_v10 }
 0x329   :  { %v1141_v30 = vadd.f32 %v1875_v27, %v1137_v29  ;;  %v1857_v27 = vld [vmem:[%s2482_s19] sm:$0xff] }
 0x32b   :  { %v1158_v20 = vpack.c.bf16 %v1141_v30, %v1141_v30  ;;  %1413 = vmatpush.bf16.msra.mxu2 %v1858_v17 }
 0x32d   :  { %1219 = vmatmul.bf16.vlgmr.msra.gmra.mxu1 %v1158_v20 }
 0x32f   :  { %1414 = vmatpush.bf16.msra.mxu2 %v1857_v27 }
 0x3aa   :  { %v1220_v31 = vpop.f32.mrf.mxu1 }
 0x3ab   :  { %v1221_v32 = vadd.f32 %v1876_v25, %v1220_v31 }
 0x3ad   :  { %v1226_v26 = vsel %vm630_vm0, %v1221_v32, 0.0  ;;  %v1257_v33 = vrot.slane %v1221_v32, 2  ;;  %v1292_v34 = vrot.slane %v1221_v32, 4 }
 0x3ae   :  { %v1227_v35 = vrot.slane %v1226_v26, 4 }
 0x3af   :  { %v1259_v36 = vsel %vm630_vm0, %v1257_v33, 0.0  ;;  %v1294_v37 = vsel %vm630_vm0, %v1292_v34, 0.0 }
 0x3b0   :  { %v1228_v39 = vadd.f32 %v1227_v35, %v1226_v26  ;;  %v1260_v40 = vrot.slane %v1259_v36, 4  ;;  %v1295_v42 = vrot.slane %v1294_v37, 4 }
 0x3b2   :  { %v1229_v44 = vrot.slane %v1228_v39, 2  ;;  %v1261_v45 = vadd.f32 %v1260_v40, %v1259_v36  ;;  %v1296_v48 = vadd.f32 %v1295_v42, %v1294_v37  ;;  %v1222_v49 = vpop.f32.mrf.mxu1 }
 0x3b4   :  { %v1230_v50 = vadd.f32 %v1229_v44, %v1228_v39  ;;  %v1262_v51 = vrot.slane %v1261_v45, 2  ;;  %v1297_v41 = vrot.slane %v1296_v48, 2 }
 0x3b6   :  { %v1231_v46 = vrot.slane %v1230_v50, 1  ;;  %v1263_v53 = vadd.f32 %v1262_v51, %v1261_v45  ;;  %v1298_v54 = vadd.f32 %v1297_v41, %v1296_v48 }
 0x3b8   :  { %v1232_v47 = vadd.f32 %v1231_v46, %v1230_v50  ;;  %v1264_v55 = vrot.slane %v1263_v53, 1  ;;  %v1299_v56 = vrot.slane %v1298_v54, 1 }
 0x3ba   :  { %v1233_v58 = vmul.f32 %v1232_v47, %v2236_v60  ;;  %v1265_v59 = vadd.f32 %v1264_v55, %v1263_v53  ;;  %v1300_v61 = vadd.f32 %v1299_v56, %v1298_v54 }
 0x3bc   :  { %v2413_v62 = vsub.f32 %v1221_v32, %v1233_v58  ;;  %v1266_v63 = vmul.f32 %v1265_v59, %v2236_v60  ;;  %v1301_v0 = vmul.f32 %v1300_v61, %v2236_v60 }
 0x3be   :  { %v1235_v2 = vmul.f32 %v2413_v62, %v2413_v62  ;;  %v2422_v4 = vsub.f32 %v1221_v32, %v1266_v63  ;;  %v2424_v5 = vsub.f32 %v1221_v32, %v1301_v0  ;;  %v1877_v63 = vld [vmem:[%s2479_s17] ss:$0 sm:$0xff] }
 0x3c0   :  { %v1236_v6 = vsel %vm630_vm0, %v1235_v2, 0.0  ;;  %v1268_v3 = vmul.f32 %v2422_v4, %v2422_v4  ;;  %v1303_v9 = vmul.f32 %v2424_v5, %v2424_v5  ;;  %v1878_v2 = vld [vmem:[%s2480_s18] ss:$0 sm:$0xff] }
 0x3c1   :  { %v1237_v7 = vrot.slane %v1236_v6, 4 }
 0x3c2   :  { %v1270_v11 = vrot.slane %v1268_v3, 2  ;;  %v1305_v12 = vrot.slane %v1303_v9, 4 }
 0x3c3   :  { %v1238_v8 = vadd.f32 %v1237_v7, %v1236_v6 }
 0x3c4   :  { %v1272_v13 = vsel %vm630_vm0, %v1270_v11, 0.0  ;;  %v1307_v14 = vsel %vm630_vm0, %v1305_v12, 0.0 }
 0x3c5   :  { %v1239_v15 = vrot.slane %v1238_v8, 2  ;;  %v1273_v16 = vrot.slane %v1272_v13, 4  ;;  %v1308_v18 = vrot.slane %v1307_v14, 4 }
 0x3c7   :  { %v1240_v19 = vadd.f32 %v1239_v15, %v1238_v8  ;;  %v1274_v21 = vadd.f32 %v1273_v16, %v1272_v13  ;;  %v1309_v22 = vadd.f32 %v1308_v18, %v1307_v14 }
 0x3c9   :  { %v1241_v23 = vrot.slane %v1240_v19, 1  ;;  %v1275_v24 = vrot.slane %v1274_v21, 2  ;;  %v1310_v28 = vrot.slane %v1309_v22, 2 }
 0x3cb   :  { %v1242_v29 = vadd.f32 %v1241_v23, %v1240_v19  ;;  %v1276_v30 = vadd.f32 %v1275_v24, %v1274_v21  ;;  %v1311_v20 = vadd.f32 %v1310_v28, %v1309_v22 }
 0x3cd   :  { %v1277_v25 = vrot.slane %v1276_v30, 1  ;;  %v1243_v31 = vmul.f32 %v1242_v29, %v2236_v60  ;;  %v1312_v32 = vrot.slane %v1311_v20, 1 }
 0x3cf   :  { %v1278_v26 = vadd.f32 %v1277_v25, %v1276_v30  ;;  %v1244_v33 = vadd.f32 1e-05, %v1243_v31  ;;  %v1313_v34 = vadd.f32 %v1312_v32, %v1311_v20 }
 0x3d1   :  { %1900 = vrsqrt.f32 %v1244_v33  ;;  %v1279_v35 = vmul.f32 %v1278_v26, %v2236_v60  ;;  %v1314_v36 = vmul.f32 %v1313_v34, %v2236_v60  ;;  %vm1251_vm2 = vweird.f32 %v1244_v33 }
 0x3d3   :  { %v1280_v37 = vadd.f32 1e-05, %v1279_v35  ;;  %v1315_v38 = vadd.f32 1e-05, %v1314_v36 }
 0x3d5   :  { %1902 = vrsqrt.f32 %v1280_v37  ;;  %vm1287_vm6 = vweird.f32 %v1280_v37  ;;  %vm1322_vm8 = vweird.f32 %v1315_v38 }
 0x3d6   :  { %1904 = vrsqrt.f32 %v1315_v38 }
 0x3d7   :  { %v1901_v39 = vpop.eup %1900 }
 0x3d8   :  { %v1246_v40 = vmul.f32 %v1901_v39, %v1244_v33  ;;  %vm1252_vm1 = vweird.f32 %v1901_v39 }
 0x3d9   :  { %vm1253_vm4 = vmor %vm1251_vm2, %vm1252_vm1 }
 0x3da   :  { %v1247_v42 = vmul.f32 %v1901_v39, %v1246_v40 }
 0x3db   :  { %v1903_v43 = vpop.eup %1902 }
 0x3dc   :  { %v1905_v44 = vpop.eup %1904  ;;  %v1248_v45 = vmul.f32 0.5, %v1247_v42  ;;  %v1282_v48 = vmul.f32 %v1903_v43, %v1280_v37  ;;  %vm1288_vm3 = vweird.f32 %v1903_v43 }
 0x3dd   :  { %v1317_v49 = vmul.f32 %v1905_v44, %v1315_v38  ;;  %vm1323_vm5 = vweird.f32 %v1905_v44  ;;  %vm1289_vm7 = vmor %vm1287_vm6, %vm1288_vm3 }
 0x3de   :  { %v1249_v50 = vsub.f32 1.5, %v1248_v45  ;;  %v1283_v51 = vmul.f32 %v1903_v43, %v1282_v48  ;;  %vm1324_vm9 = vmor %vm1322_vm8, %vm1323_vm5 }
 0x3df   :  { %v1318_v41 = vmul.f32 %v1905_v44, %v1317_v49 }
 0x3e0   :  { %v1250_v52 = vmul.f32 %v1901_v39, %v1249_v50  ;;  %v1284_v46 = vmul.f32 0.5, %v1283_v51 }
 0x3e1   :  { %v1319_v53 = vmul.f32 0.5, %v1318_v41 }
 0x3e2   :  { %v1285_v60 = vsub.f32 1.5, %v1284_v46  ;;  %v1254_v47 = vsel %vm1253_vm4, %v1901_v39, %v1250_v52 }
 0x3e3   :  { %v1320_v54 = vsub.f32 1.5, %v1319_v53  ;;  %v1255_v58 = vmul.f32 %v1254_v47, %v2413_v62 }
 0x3e4   :  { %v1286_v55 = vmul.f32 %v1903_v43, %v1285_v60 }
 0x3e5   :  { %v1321_v56 = vmul.f32 %v1905_v44, %v1320_v54 }
 0x3e6   :  { %v1290_v57 = vsel %vm1289_vm7, %v1903_v43, %v1286_v55 }
 0x3e7   :  { %v1291_v59 = vmul.f32 %v1290_v57, %v2422_v4  ;;  %v1325_v61 = vsel %vm1324_vm9, %v1905_v44, %v1321_v56  ;;  %v1879_v4 = vld [vmem:[%s2481_s20] ss:$0 sm:$0xff] }
 0x3e8   :  { %v1326_v0 = vmul.f32 %v1325_v61, %v2424_v5 }
 0x3e9   :  { %v1327_v1 = vsel %vm630_vm0, %v1255_v58, %v1291_v59 }
 0x3ea   :  { %v1328_v6 = vsel %vm740_vm11, %v1327_v1, %v1326_v0 }
 0x3eb   :  { %v1332_v3 = vmul.f32 %v1877_v63, %v1328_v6 }
 0x3ed   :  { %v1336_v9 = vadd.f32 %v1878_v2, %v1332_v3 }
 0x3ef   :  { %v1337_v62 = vmax.f32 %v1336_v9, 0.0 }
 0x3f1   :  { %v1354_v7 = vpack.c.bf16 %v1337_v62, %v1337_v62 }
 0x3f3   :  { %1415 = vmatmul.bf16.vlgmr.msra.gmra.mxu2 %v1354_v7 }
 0x476   :  { %v1416_v10 = vpop.f32.mrf.mxu2 }
 0x477   :  { %v1417_v11 = vadd.f32 %v1879_v4, %v1416_v10 }
 0x479   :  { %1420 = vst [vmem:[%s2483_s21] sm:$0x3f] %v1417_v11 }
 0x47e   :  { %v1418_v5 = vpop.f32.mrf.mxu2 }

// kernel: fastmoco_forward.5
= control target key start
LH: loop header
LB: loop body
LE: loop exit
PB: predicated region body
PF: predicated region fallthrough
CT: control target
= control target key end

     0   :  { %vm635_vm0 = vcmask 1041408   ;;  %s3094_s1 = inlined_call_operand.vmem [shape: bf16[768,128], index: 1, kind: input, shape index: {}]   ;;  %s3095_s0 = inlined_call_operand.vmem [shape: f32[4,768], index: 0, kind: input, shape index: {}]   ;;  %s3096_s2 = inlined_call_operand.vmem [shape: f32[1,128], index: 2, kind: input, shape index: {}]   ;;  %s3097_s4 = inlined_call_operand.vmem [shape: f32[1,128], index: 4, kind: input, shape index: {}]   ;;  %s3098_s3 = inlined_call_operand.vmem [shape: bf16[128,128], index: 3, kind: input, shape index: {}]   ;;  %s3099_s5 = inlined_call_operand.vmem [shape: f32[1,128], index: 5, kind: input, shape index: {}]   ;;  %s3100_s6 = inlined_call_operand.vmem [shape: f32[1,128], index: 6, kind: input, shape index: {}]   ;;  %s3101_s8 = inlined_call_operand.vmem [shape: f32[1,128], index: 8, kind: input, shape index: {}]   ;;  %s3102_s7 = inlined_call_operand.vmem [shape: bf16[128,128], index: 7, kind: input, shape index: {}]   ;;  %s3103_s9 = inlined_call_operand.vmem [shape: f32[1,128], index: 9, kind: input, shape index: {}]   ;;  %s3104_s10 = inlined_call_operand.vmem [shape: f32[1,128], index: 10, kind: input, shape index: {}]   ;;  %s3105_s12 = inlined_call_operand.vmem [shape: f32[1,128], index: 12, kind: input, shape index: {}]   ;;  %s3106_s11 = inlined_call_operand.vmem [shape: bf16[128,128], index: 11, kind: input, shape index: {}]   ;;  %s3107_s13 = inlined_call_operand.vmem [shape: f32[1,128], index: 13, kind: input, shape index: {}]   ;;  %s3108_s14 = inlined_call_operand.vmem [shape: f32[1,128], index: 14, kind: input, shape index: {}]   ;;  %s3109_s15 = inlined_call_operand.vmem [shape: bf16[1024,128], index: 15, kind: input, shape index: {}]   ;;  %s3110_s16 = inlined_call_operand.vmem [shape: f32[1,1024], index: 16, kind: input, shape index: {}]   ;;  %s3111_s17 = inlined_call_operand.vmem [shape: s32[4,1], index: 17, kind: output, shape index: {}]  }
   0x1   :  { %3114 = sst [smem:[#allocation2_spill]] %s3094_s1  ;;  %v2381_v63 = vld [vmem:[%s3098_s3 + $0x38] sm:$0xff] }
   0x2   :  { %3115 = sst [smem:[#allocation3_spill]] %s3095_s0 }
   0x3   :  { %s3116_s26 = sld [smem:[#allocation2_spill]] }
   0x4   :  { %s3117_s27 = sld [smem:[#allocation3_spill]] }
   0x9   :  { %v2333_v0 = vld [vmem:[%s3116_s26 + $0x38] sm:$0xff]  ;;  %v2332_v2 = vld [vmem:[%s3116_s26 + $0x30] sm:$0xff]  ;;  %v2331_v8 = vld [vmem:[%s3116_s26 + $0x28] sm:$0xff] }
   0xa   :  { %v2341_v1 = vld [vmem:[%s3116_s26 + $0x78] sm:$0xff]  ;;  %473 = vmatpush.bf16.msra.mxu0 %v2333_v0  ;;  %v2340_v3 = vld [vmem:[%s3116_s26 + $0x70] sm:$0xff]  ;;  %v2339_v9 = vld [vmem:[%s3116_s26 + $0x68] sm:$0xff] }
   0xb   :  { %486 = vmatpush.bf16.msra.mxu1 %v2341_v1  ;;  %v2349_v4 = vld [vmem:[%s3116_s26 + $0xb8] sm:$0xff]  ;;  %v2348_v6 = vld [vmem:[%s3116_s26 + $0xb0] sm:$0xff]  ;;  %v2347_v10 = vld [vmem:[%s3116_s26 + $0xa8] sm:$0xff] }
   0xc   :  { %v2357_v5 = vld [vmem:[%s3116_s26 + $0xf8] sm:$0xff]  ;;  %499 = vmatpush.bf16.msra.mxu2 %v2349_v4  ;;  %v2356_v7 = vld [vmem:[%s3116_s26 + $0xf0] sm:$0xff]  ;;  %v2355_v11 = vld [vmem:[%s3116_s26 + $0xe8] sm:$0xff] }
   0xd   :  { %512 = vmatpush.bf16.msra.mxu3 %v2357_v5  ;;  %v2330_v12 = vld [vmem:[%s3116_s26 + $0x20] sm:$0xff]  ;;  %v57_v17 = vld [vmem:[%s3117_s27 + $0x8] sm:$0xff]  ;;  %v2329_v18 = vld [vmem:[%s3116_s26 + $0x18] sm:$0xff] }
   0xe   :  { %474 = vmatpush.bf16.msra.mxu0 %v2332_v2  ;;  %v2338_v13 = vld [vmem:[%s3116_s26 + $0x60] sm:$0xff]  ;;  %v2337_v19 = vld [vmem:[%s3116_s26 + $0x58] sm:$0xff]  ;;  %160 = vst [vmem:[#allocation1 + $0x10] ss:$2 sm:$0xff] %v57_v17  ;;  %v2328_v22 = vld [vmem:[%s3116_s26 + $0x10] sm:$0xff] }
   0xf   :  { %487 = vmatpush.bf16.msra.mxu1 %v2340_v3  ;;  %v56_v14 = vld [vmem:[%s3117_s27] sm:$0xff]  ;;  %v2345_v20 = vld [vmem:[%s3116_s26 + $0x98] sm:$0xff]  ;;  %v2336_v23 = vld [vmem:[%s3116_s26 + $0x50] sm:$0xff] }
  0x10   :  { %500 = vmatpush.bf16.msra.mxu2 %v2348_v6  ;;  %v2346_v15 = vld [vmem:[%s3116_s26 + $0xa0] sm:$0xff]  ;;  %158 = vst [vmem:[#allocation1] ss:$2 sm:$0xff] %v56_v14  ;;  %v2353_v21 = vld [vmem:[%s3116_s26 + $0xd8] sm:$0xff]  ;;  %v2344_v24 = vld [vmem:[%s3116_s26 + $0x90] sm:$0xff] }
  0x11   :  { %513 = vmatpush.bf16.msra.mxu3 %v2356_v7  ;;  %v2354_v16 = vld [vmem:[%s3116_s26 + $0xe0] sm:$0xff]  ;;  %v58_v25 = vld [vmem:[%s3117_s27 + $0x10] sm:$0xff]  ;;  %v2327_v27 = vld [vmem:[%s3116_s26 + $0x8] sm:$0xff] }
  0x12   :  { %475 = vmatpush.bf16.msra.mxu0 %v2331_v8  ;;  %v2352_v26 = vld [vmem:[%s3116_s26 + $0xd0] sm:$0xff]  ;;  %v2335_v28 = vld [vmem:[%s3116_s26 + $0x48] sm:$0xff]  ;;  %162 = vst [vmem:[#allocation1 + $0x20] ss:$2 sm:$0xff] %v58_v25  ;;  %v2326_v30 = vld [vmem:[%s3116_s26] sm:$0xff] }
  0x13   :  { %488 = vmatpush.bf16.msra.mxu1 %v2339_v9  ;;  %v2343_v29 = vld [vmem:[%s3116_s26 + $0x88] sm:$0xff]  ;;  %v2334_v31 = vld [vmem:[%s3116_s26 + $0x40] sm:$0xff]  ;;  %v2365_v35 = vld [vmem:[%s3116_s26 + $0x138] sm:$0xff] }
  0x14   :  { %501 = vmatpush.bf16.msra.mxu2 %v2347_v10  ;;  %v2351_v32 = vld [vmem:[%s3116_s26 + $0xc8] sm:$0xff]  ;;  %v2373_v36 = vld [vmem:[%s3116_s26 + $0x178] sm:$0xff]  ;;  %v2342_v37 = vld [vmem:[%s3116_s26 + $0x80] sm:$0xff] }
  0x15   :  { %514 = vmatpush.bf16.msra.mxu3 %v2355_v11  ;;  %v165_v40 = vld.sshfl [vmem:[#allocation1 + $0x10] sm:$0xff pattern:$0x75316420]  ;;  %v2350_v41 = vld [vmem:[%s3116_s26 + $0xc0] sm:$0xff]  ;;  %v2363_v47 = vld [vmem:[%s3116_s26 + $0x128] sm:$0xff] }
  0x16   :  { %476 = vmatpush.bf16.msra.mxu0 %v2330_v12  ;;  %v166_v42 = vld.sshfl [vmem:[#allocation1 + $0x18] sm:$0xff pattern:$0x75316420]  ;;  %v2364_v43 = vld [vmem:[%s3116_s26 + $0x130] sm:$0xff]  ;;  %v177_v45 = vpack.c.bf16 %v165_v40, %v165_v40  ;;  %v2371_v48 = vld [vmem:[%s3116_s26 + $0x168] sm:$0xff] }
  0x17   :  { %489 = vmatpush.bf16.msra.mxu1 %v2338_v13  ;;  %v163_v33 = vld.sshfl [vmem:[#allocation1] sm:$0xff pattern:$0x75316420]  ;;  %v164_v34 = vld.sshfl [vmem:[#allocation1 + $0x8] sm:$0xff pattern:$0x75316420]  ;;  %v178_v46 = vpack.c.bf16 %v166_v42, %v166_v42 }
  0x18   :  { %502 = vmatpush.bf16.msra.mxu2 %v2346_v15  ;;  %v175_v38 = vpack.c.bf16 %v163_v33, %v163_v33  ;;  %v176_v39 = vpack.c.bf16 %v164_v34, %v164_v34  ;;  %v2372_v44 = vld [vmem:[%s3116_s26 + $0x170] sm:$0xff]  ;;  %v2362_v49 = vld [vmem:[%s3116_s26 + $0x120] sm:$0xff]  ;;  %v2361_v51 = vld [vmem:[%s3116_s26 + $0x118] sm:$0xff] }
  0x19   :  { %515 = vmatpush.bf16.msra.mxu3 %v2354_v16  ;;  %v2370_v50 = vld [vmem:[%s3116_s26 + $0x160] sm:$0xff]  ;;  %v2369_v52 = vld [vmem:[%s3116_s26 + $0x158] sm:$0xff]  ;;  %v2360_v53 = vld [vmem:[%s3116_s26 + $0x110] sm:$0xff] }
  0x1a   :  { %477 = vmatpush.bf16.msra.mxu0 %v2329_v18  ;;  %v2368_v54 = vld [vmem:[%s3116_s26 + $0x150] sm:$0xff]  ;;  %v2359_v55 = vld [vmem:[%s3116_s26 + $0x108] sm:$0xff]  ;;  %v2358_v57 = vld [vmem:[%s3116_s26 + $0x100] sm:$0xff] }
  0x1b   :  { %490 = vmatpush.bf16.msra.mxu1 %v2337_v19  ;;  %v2367_v56 = vld [vmem:[%s3116_s26 + $0x148] sm:$0xff]  ;;  %v2366_v58 = vld [vmem:[%s3116_s26 + $0x140] sm:$0xff]  ;;  %v2380_v0 = vld [vmem:[%s3098_s3 + $0x30] sm:$0xff] }
  0x1c   :  { %503 = vmatpush.bf16.msra.mxu2 %v2345_v20  ;;  %v167_v59 = vld.sshfl [vmem:[#allocation1 + $0x20] sm:$0xff pattern:$0x75316420]  ;;  %v168_v60 = vld.sshfl [vmem:[#allocation1 + $0x28] sm:$0xff pattern:$0x75316420] }
  0x1d   :  { %516 = vmatpush.bf16.msra.mxu3 %v2353_v21  ;;  %v179_v61 = vpack.c.bf16 %v167_v59, %v167_v59  ;;  %v180_v62 = vpack.c.bf16 %v168_v60, %v168_v60  ;;  %v2379_v1 = vld [vmem:[%s3098_s3 + $0x28] sm:$0xff]  ;;  %v2378_v2 = vld [vmem:[%s3098_s3 + $0x20] sm:$0xff]  ;;  %v2377_v3 = vld [vmem:[%s3098_s3 + $0x18] sm:$0xff] }
  0x1e   :  { %478 = vmatpush.bf16.msra.mxu0 %v2328_v22  ;;  %v2376_v4 = vld [vmem:[%s3098_s3 + $0x10] sm:$0xff]  ;;  %v2375_v5 = vld [vmem:[%s3098_s3 + $0x8] sm:$0xff]  ;;  %v2374_v6 = vld [vmem:[%s3098_s3] sm:$0xff] }
  0x1f   :  { %491 = vmatpush.bf16.msra.mxu1 %v2336_v23  ;;  %v2463_v13 = vld [vmem:[%s3096_s2] ss:$0 sm:$0xff] }
  0x20   :  { %504 = vmatpush.bf16.msra.mxu2 %v2344_v24  ;;  %v2386_v59 = vld [vmem:[%s3102_s7 + $0x20] sm:$0xff] }
  0x21   :  { %517 = vmatpush.bf16.msra.mxu3 %v2352_v26 }
  0x22   :  { %479 = vmatpush.bf16.msra.mxu0 %v2327_v27  ;;  %v2489_v27 = vmov 2.0  }
  0x23   :  { %492 = vmatpush.bf16.msra.mxu1 %v2335_v28  ;;  %2473 = vrcp.f32 %v2489_v27 }
  0x24   :  { %505 = vmatpush.bf16.msra.mxu2 %v2343_v29  ;;  %v2464_v29 = vld [vmem:[%s3097_s4] ss:$0 sm:$0xff] }
  0x25   :  { %518 = vmatpush.bf16.msra.mxu3 %v2351_v32 }
  0x26   :  { %480 = vmatpush.bf16.msra.mxu0 %v2326_v30 }
  0x27   :  { %493 = vmatpush.bf16.msra.mxu1 %v2334_v31 }
  0x28   :  { %506 = vmatpush.bf16.msra.mxu2 %v2342_v37 }
  0x29   :  { %481 = vmatmul.bf16.vlgmr.msra.gmra.mxu0 %v175_v38  ;;  %519 = vmatpush.bf16.msra.mxu3 %v2350_v41  ;;  %v2474_v28 = vpop.eup %2473  ;;  %v2389_v41 = vld [vmem:[%s3102_s7 + $0x38] sm:$0xff] }
  0x2a   :  { %525 = vmatpush.bf16.msrb.mxu0 %v2365_v35  ;;  %494 = vmatmul.bf16.vlgmr.msra.gmra.mxu1 %v176_v39  ;;  %v644_v30 = vmul.f32 2.0, %v2474_v28  ;;  %vm648_vm1 = vweird.f32 %v2474_v28 }
  0x2b   :  { %538 = vmatpush.bf16.msrb.mxu1 %v2373_v36  ;;  %507 = vmatmul.bf16.vlgmr.msra.gmra.mxu2 %v177_v45 }
  0x2c   :  { %520 = vmatmul.bf16.vlgmr.msra.gmra.mxu3 %v178_v46  ;;  %620 = vmatpush.bf16.msrb.mxu2 %v2381_v63  ;;  %v645_v33 = vsub.f32 1.0, %v644_v30 }
  0x2d   :  { %788 = vmatpush.bf16.msrb.mxu3 %v2389_v41 }
  0x2e   :  { %526 = vmatpush.bf16.msrb.mxu0 %v2364_v43  ;;  %v646_v37 = vmul.f32 %v2474_v28, %v645_v33 }
  0x2f   :  { %539 = vmatpush.bf16.msrb.mxu1 %v2372_v44 }
  0x30   :  { %621 = vmatpush.bf16.msrb.mxu2 %v2380_v0  ;;  %v647_v45 = vadd.f32 %v2474_v28, %v646_v37 }
  0x32   :  { %527 = vmatpush.bf16.msrb.mxu0 %v2363_v47 }
  0x33   :  { %540 = vmatpush.bf16.msrb.mxu1 %v2371_v48  ;;  %v2388_v48 = vld [vmem:[%s3102_s7 + $0x30] sm:$0xff] }
  0x34   :  { %622 = vmatpush.bf16.msrb.mxu2 %v2379_v1  ;;  %789 = vmatpush.bf16.msrb.mxu3 %v2388_v48  ;;  %v2385_v1 = vld [vmem:[%s3102_s7 + $0x18] sm:$0xff] }
  0x36   :  { %528 = vmatpush.bf16.msrb.mxu0 %v2362_v49 }
  0x37   :  { %541 = vmatpush.bf16.msrb.mxu1 %v2370_v50 }
  0x38   :  { %623 = vmatpush.bf16.msrb.mxu2 %v2378_v2 }
  0x3a   :  { %529 = vmatpush.bf16.msrb.mxu0 %v2361_v51  ;;  %v2771_v51 = vsel %vm648_vm1, %v2474_v28, %v647_v45  ;;  %v2467_v45 = vld [vmem:[%s3101_s8] ss:$0 sm:$0xff] }
  0x3b   :  { %542 = vmatpush.bf16.msrb.mxu1 %v2369_v52 }
  0x3c   :  { %624 = vmatpush.bf16.msrb.mxu2 %v2377_v3 }
  0x3e   :  { %530 = vmatpush.bf16.msrb.mxu0 %v2360_v53 }
  0x3f   :  { %543 = vmatpush.bf16.msrb.mxu1 %v2368_v54  ;;  %v2387_v54 = vld [vmem:[%s3102_s7 + $0x28] sm:$0xff] }
  0x40   :  { %625 = vmatpush.bf16.msrb.mxu2 %v2376_v4  ;;  %790 = vmatpush.bf16.msrb.mxu3 %v2387_v54 }
  0x42   :  { %531 = vmatpush.bf16.msrb.mxu0 %v2359_v55 }
  0x43   :  { %544 = vmatpush.bf16.msrb.mxu1 %v2367_v56 }
  0x44   :  { %626 = vmatpush.bf16.msrb.mxu2 %v2375_v5  ;;  %791 = vmatpush.bf16.msrb.mxu3 %v2386_v59 }
  0x46   :  { %532 = vmatpush.bf16.msrb.mxu0 %v2358_v57 }
  0x47   :  { %545 = vmatpush.bf16.msrb.mxu1 %v2366_v58 }
  0x48   :  { %627 = vmatpush.bf16.msrb.mxu2 %v2374_v6  ;;  %792 = vmatpush.bf16.msrb.mxu3 %v2385_v1 }
  0x49   :  { %533 = vmatmul.bf16.vlgmr.msrb.gmra.mxu0 %v179_v61 }
  0x4a   :  { %546 = vmatmul.bf16.vlgmr.msrb.gmra.mxu1 %v180_v62 }
  0xa6   :  { %v482_v7 = vpop.f32.mrf.mxu0 }
  0xa7   :  { %v495_v8 = vpop.f32.mrf.mxu1  ;;  %v483_v14 = vadd.f32 %v2463_v13, %v482_v7  ;;  %v2384_v7 = vld [vmem:[%s3102_s7 + $0x10] sm:$0xff] }
  0xa8   :  { %793 = vmatpush.bf16.msrb.mxu3 %v2384_v7  ;;  %v2394_v7 = vld [vmem:[%s3106_s11 + $0x20] sm:$0xff] }
  0xa9   :  { %v496_v17 = vadd.f32 %v495_v8, %v483_v14 }
  0xae   :  { %v484_v9 = vpop.f32.mrf.mxu0  ;;  %v508_v11 = vpop.f32.mrf.mxu2 }
  0xaf   :  { %v497_v10 = vpop.f32.mrf.mxu1  ;;  %v521_v12 = vpop.f32.mrf.mxu3  ;;  %v509_v18 = vadd.f32 %v508_v11, %v496_v17 }
  0xb0   :  { %v2383_v10 = vld [vmem:[%s3102_s7 + $0x8] sm:$0xff] }
  0xb1   :  { %v522_v19 = vadd.f32 %v521_v12, %v509_v18  ;;  %794 = vmatpush.bf16.msrb.mxu3 %v2383_v10 }
  0xb6   :  { %v510_v15 = vpop.f32.mrf.mxu2 }
  0xb7   :  { %v523_v16 = vpop.f32.mrf.mxu3  ;;  %v2382_v15 = vld [vmem:[%s3102_s7] sm:$0xff] }
  0xb8   :  { %795 = vmatpush.bf16.msrb.mxu3 %v2382_v15 }
  0xc6   :  { %v534_v20 = vpop.f32.mrf.mxu0 }
  0xc7   :  { %v547_v21 = vpop.f32.mrf.mxu1  ;;  %v535_v22 = vadd.f32 %v534_v20, %v522_v19 }
  0xc9   :  { %v548_v23 = vadd.f32 %v547_v21, %v535_v22 }
  0xcb   :  { %v567_v24 = vpack.c.bf16 %v548_v23, %v548_v23 }
  0xcd   :  { %628 = vmatmul.bf16.vlgmr.msrb.gmra.mxu2 %v567_v24 }
  0xce   :  { %v536_v25 = vpop.f32.mrf.mxu0 }
  0xcf   :  { %v549_v26 = vpop.f32.mrf.mxu1 }
 0x150   :  { %v629_v31 = vpop.f32.mrf.mxu2 }
 0x151   :  { %v630_v32 = vadd.f32 %v2464_v29, %v629_v31 }
 0x153   :  { %v636_v34 = vsel %vm635_vm0, %v630_v32, 0.0  ;;  %v674_v35 = vrot.slane %v630_v32, 2 }
 0x154   :  { %v637_v36 = vrot.slane %v636_v34, 4 }
 0x155   :  { %v676_v38 = vsel %vm635_vm0, %v674_v35, 0.0 }
 0x156   :  { %v638_v39 = vadd.f32 %v637_v36, %v636_v34  ;;  %v677_v40 = vrot.slane %v676_v38, 4  ;;  %v2465_v36 = vld [vmem:[%s3099_s5] ss:$0 sm:$0xff] }
 0x158   :  { %v639_v42 = vrot.slane %v638_v39, 2  ;;  %v678_v43 = vadd.f32 %v677_v40, %v676_v38  ;;  %v631_v44 = vpop.f32.mrf.mxu2 }
 0x15a   :  { %v640_v46 = vadd.f32 %v639_v42, %v638_v39  ;;  %v679_v47 = vrot.slane %v678_v43, 2  ;;  %v2466_v39 = vld [vmem:[%s3100_s6] ss:$0 sm:$0xff] }
 0x15c   :  { %v641_v49 = vrot.slane %v640_v46, 1  ;;  %v680_v50 = vadd.f32 %v679_v47, %v678_v43 }
 0x15e   :  { %v642_v52 = vadd.f32 %v641_v49, %v640_v46  ;;  %v681_v53 = vrot.slane %v680_v50, 1 }
 0x160   :  { %v650_v55 = vmul.f32 %v2771_v51, %v642_v52  ;;  %v682_v56 = vadd.f32 %v681_v53, %v680_v50 }
 0x162   :  { %v651_v57 = vsub.f32 %v630_v32, %v650_v55  ;;  %v683_v58 = vmul.f32 %v682_v56, %v2771_v51  ;;  %v2397_v55 = vld [vmem:[%s3106_s11 + $0x38] sm:$0xff] }
 0x163   :  { %948 = vmatpush.bf16.msra.mxu0 %v2397_v55 }
 0x164   :  { %v652_v60 = vmul.f32 %v651_v57, %v651_v57  ;;  %v684_v61 = vsub.f32 %v630_v32, %v683_v58 }
 0x166   :  { %v653_v62 = vsel %vm635_vm0, %v652_v60, 0.0  ;;  %v685_v63 = vmul.f32 %v684_v61, %v684_v61 }
 0x167   :  { %v654_v0 = vrot.slane %v653_v62, 4 }
 0x168   :  { %v687_v2 = vrot.slane %v685_v63, 2 }
 0x169   :  { %v655_v3 = vadd.f32 %v654_v0, %v653_v62 }
 0x16a   :  { %v689_v4 = vsel %vm635_vm0, %v687_v2, 0.0  ;;  %v2395_v2 = vld [vmem:[%s3106_s11 + $0x28] sm:$0xff] }
 0x16b   :  { %v656_v5 = vrot.slane %v655_v3, 2  ;;  %v690_v6 = vrot.slane %v689_v4, 4 }
 0x16d   :  { %v657_v8 = vadd.f32 %v656_v5, %v655_v3  ;;  %v691_v9 = vadd.f32 %v690_v6, %v689_v4 }
 0x16f   :  { %v658_v11 = vrot.slane %v657_v8, 1  ;;  %v692_v12 = vrot.slane %v691_v9, 2 }
 0x171   :  { %v659_v13 = vadd.f32 %v658_v11, %v657_v8  ;;  %v693_v14 = vadd.f32 %v692_v12, %v691_v9 }
 0x173   :  { %v660_v16 = vmul.f32 %v659_v13, %v2771_v51  ;;  %v694_v17 = vrot.slane %v693_v14, 1  ;;  %v2393_v13 = vld [vmem:[%s3106_s11 + $0x18] sm:$0xff] }
 0x175   :  { %v661_v18 = vadd.f32 1e-05, %v660_v16  ;;  %v695_v19 = vadd.f32 %v694_v17, %v693_v14 }
 0x177   :  { %2475 = vrsqrt.f32 %v661_v18  ;;  %v696_v20 = vmul.f32 %v695_v19, %v2771_v51  ;;  %vm668_vm3 = vweird.f32 %v661_v18  ;;  %v2392_v19 = vld [vmem:[%s3106_s11 + $0x10] sm:$0xff] }
 0x179   :  { %v697_v21 = vadd.f32 1e-05, %v696_v20 }
 0x17b   :  { %2477 = vrsqrt.f32 %v697_v21  ;;  %vm704_vm6 = vweird.f32 %v697_v21 }
 0x17d   :  { %v2476_v22 = vpop.eup %2475 }
 0x17e   :  { %v663_v23 = vmul.f32 %v2476_v22, %v661_v18  ;;  %vm669_vm2 = vweird.f32 %v2476_v22 }
 0x17f   :  { %vm670_vm5 = vmor %vm668_vm3, %vm669_vm2 }
 0x180   :  { %v664_v24 = vmul.f32 %v2476_v22, %v663_v23 }
 0x181   :  { %v2478_v25 = vpop.eup %2477 }
 0x182   :  { %v665_v26 = vmul.f32 0.5, %v664_v24  ;;  %v699_v27 = vmul.f32 %v2478_v25, %v697_v21  ;;  %vm705_vm4 = vweird.f32 %v2478_v25 }
 0x183   :  { %vm706_vm7 = vmor %vm704_vm6, %vm705_vm4 }
 0x184   :  { %v666_v28 = vsub.f32 1.5, %v665_v26  ;;  %v700_v29 = vmul.f32 %v2478_v25, %v699_v27  ;;  %v2390_v27 = vld [vmem:[%s3106_s11] sm:$0xff] }
 0x186   :  { %v667_v30 = vmul.f32 %v2476_v22, %v666_v28  ;;  %v701_v31 = vmul.f32 0.5, %v700_v29 }
 0x188   :  { %v702_v32 = vsub.f32 1.5, %v701_v31  ;;  %v671_v33 = vsel %vm670_vm5, %v2476_v22, %v667_v30  ;;  %v2391_v22 = vld [vmem:[%s3106_s11 + $0x8] sm:$0xff]  ;;  %vm1039_vm5 = vcmask 1043456  }
 0x189   :  { %v672_v37 = vmul.f32 %v671_v33, %v651_v57 }
 0x18a   :  { %v703_v34 = vmul.f32 %v2478_v25, %v702_v32 }
 0x18c   :  { %v707_v35 = vsel %vm706_vm7, %v2478_v25, %v703_v34 }
 0x18d   :  { %v708_v38 = vmul.f32 %v707_v35, %v684_v61  ;;  %v2396_v61 = vld [vmem:[%s3106_s11 + $0x30] sm:$0xff] }
 0x18e   :  { %949 = vmatpush.bf16.msra.mxu0 %v2396_v61 }
 0x18f   :  { %v709_v40 = vsel %vm635_vm0, %v672_v37, %v708_v38 }
 0x190   :  { %v713_v41 = vmul.f32 %v2465_v36, %v709_v40 }
 0x192   :  { %v717_v42 = vadd.f32 %v2466_v39, %v713_v41  ;;  %950 = vmatpush.bf16.msra.mxu0 %v2395_v2 }
 0x194   :  { %v718_v43 = vmax.f32 %v717_v42, 0.0 }
 0x196   :  { %v735_v44 = vpack.c.bf16 %v718_v43, %v718_v43  ;;  %951 = vmatpush.bf16.msra.mxu0 %v2394_v7 }
 0x198   :  { %796 = vmatmul.bf16.vlgmr.msrb.gmra.mxu3 %v735_v44 }
 0x19a   :  { %952 = vmatpush.bf16.msra.mxu0 %v2393_v13 }
 0x19e   :  { %953 = vmatpush.bf16.msra.mxu0 %v2392_v19 }
 0x1a2   :  { %954 = vmatpush.bf16.msra.mxu0 %v2391_v22 }
 0x1a6   :  { %955 = vmatpush.bf16.msra.mxu0 %v2390_v27 }
 0x21b   :  { %v797_v46 = vpop.f32.mrf.mxu3 }
 0x21c   :  { %v798_v47 = vadd.f32 %v2467_v45, %v797_v46 }
 0x21e   :  { %v803_v48 = vsel %vm635_vm0, %v798_v47, 0.0  ;;  %v834_v49 = vrot.slane %v798_v47, 2 }
 0x21f   :  { %v804_v50 = vrot.slane %v803_v48, 4 }
 0x220   :  { %v836_v52 = vsel %vm635_vm0, %v834_v49, 0.0 }
 0x221   :  { %v805_v53 = vadd.f32 %v804_v50, %v803_v48  ;;  %v837_v54 = vrot.slane %v836_v52, 4  ;;  %v2468_v48 = vld [vmem:[%s3103_s9] ss:$0 sm:$0xff] }
 0x223   :  { %v806_v56 = vrot.slane %v805_v53, 2  ;;  %v838_v57 = vadd.f32 %v837_v54, %v836_v52  ;;  %v799_v58 = vpop.f32.mrf.mxu3  ;;  %v2469_v52 = vld [vmem:[%s3104_s10] ss:$0 sm:$0xff] }
 0x224   :  { %v2470_v58 = vld [vmem:[%s3105_s12] ss:$0 sm:$0xff] }
 0x225   :  { %v807_v59 = vadd.f32 %v806_v56, %v805_v53  ;;  %v839_v60 = vrot.slane %v838_v57, 2 }
 0x227   :  { %v808_v62 = vrot.slane %v807_v59, 1  ;;  %v840_v63 = vadd.f32 %v839_v60, %v838_v57 }
 0x229   :  { %v809_v0 = vadd.f32 %v808_v62, %v807_v59  ;;  %v841_v1 = vrot.slane %v840_v63, 1 }
 0x22b   :  { %v810_v3 = vmul.f32 %v809_v0, %v2771_v51  ;;  %v842_v4 = vadd.f32 %v841_v1, %v840_v63 }
 0x22d   :  { %v811_v5 = vsub.f32 %v798_v47, %v810_v3  ;;  %v843_v6 = vmul.f32 %v842_v4, %v2771_v51 }
 0x22f   :  { %v812_v8 = vmul.f32 %v811_v5, %v811_v5  ;;  %v844_v9 = vsub.f32 %v798_v47, %v843_v6 }
 0x231   :  { %v813_v10 = vsel %vm635_vm0, %v812_v8, 0.0  ;;  %v845_v11 = vmul.f32 %v844_v9, %v844_v9 }
 0x232   :  { %v814_v12 = vrot.slane %v813_v10, 4 }
 0x233   :  { %v847_v14 = vrot.slane %v845_v11, 2 }
 0x234   :  { %v815_v15 = vadd.f32 %v814_v12, %v813_v10 }
 0x235   :  { %v849_v16 = vsel %vm635_vm0, %v847_v14, 0.0 }
 0x236   :  { %v816_v17 = vrot.slane %v815_v15, 2  ;;  %v850_v18 = vrot.slane %v849_v16, 4 }
 0x238   :  { %v817_v20 = vadd.f32 %v816_v17, %v815_v15  ;;  %v851_v21 = vadd.f32 %v850_v18, %v849_v16 }
 0x23a   :  { %v818_v23 = vrot.slane %v817_v20, 1  ;;  %v852_v24 = vrot.slane %v851_v21, 2 }
 0x23c   :  { %v819_v25 = vadd.f32 %v818_v23, %v817_v20  ;;  %v853_v26 = vadd.f32 %v852_v24, %v851_v21 }
 0x23e   :  { %v820_v28 = vmul.f32 %v819_v25, %v2771_v51  ;;  %v854_v29 = vrot.slane %v853_v26, 1 }
 0x240   :  { %v821_v30 = vadd.f32 1e-05, %v820_v28  ;;  %v855_v31 = vadd.f32 %v854_v29, %v853_v26 }
 0x242   :  { %2479 = vrsqrt.f32 %v821_v30  ;;  %v856_v32 = vmul.f32 %v855_v31, %v2771_v51  ;;  %vm828_vm9 = vweird.f32 %v821_v30 }
 0x244   :  { %v857_v33 = vadd.f32 1e-05, %v856_v32 }
 0x246   :  { %2481 = vrsqrt.f32 %v857_v33  ;;  %vm864_vm12 = vweird.f32 %v857_v33 }
 0x248   :  { %v2480_v34 = vpop.eup %2479 }
 0x249   :  { %v823_v35 = vmul.f32 %v2480_v34, %v821_v30  ;;  %vm829_vm8 = vweird.f32 %v2480_v34 }
 0x24a   :  { %vm830_vm11 = vmor %vm828_vm9, %vm829_vm8 }
 0x24b   :  { %v824_v36 = vmul.f32 %v2480_v34, %v823_v35 }
 0x24c   :  { %v2482_v37 = vpop.eup %2481 }
 0x24d   :  { %v825_v38 = vmul.f32 0.5, %v824_v36  ;;  %v859_v39 = vmul.f32 %v2482_v37, %v857_v33  ;;  %vm865_vm10 = vweird.f32 %v2482_v37 }
 0x24e   :  { %vm866_vm13 = vmor %vm864_vm12, %vm865_vm10 }
 0x24f   :  { %v826_v40 = vsub.f32 1.5, %v825_v38  ;;  %v860_v41 = vmul.f32 %v2482_v37, %v859_v39  ;;  %v2413_v38 = vld [vmem:[%s3109_s15 + $0x78] sm:$0xff] }
 0x250   :  { %v2421_v39 = vld [vmem:[%s3109_s15 + $0xb8] sm:$0xff]  ;;  %1581 = vmatpush.bf16.xpose.msra.mxu2 %v2413_v38  ;;  %v2443_v38 = vld [vmem:[%s3109_s15 + $0x168] sm:$0xff] }
 0x251   :  { %v827_v42 = vmul.f32 %v2480_v34, %v826_v40  ;;  %v861_v43 = vmul.f32 0.5, %v860_v41  ;;  %v2429_v40 = vld [vmem:[%s3109_s15 + $0xf8] sm:$0xff]  ;;  %1594 = vmatpush.bf16.xpose.msra.mxu3 %v2421_v39  ;;  %v2451_v39 = vld [vmem:[%s3109_s15 + $0x1a8] sm:$0xff] }
 0x252   :  { %1607 = vmatpush.bf16.xpose.msrb.mxu0 %v2429_v40  ;;  %v2459_v40 = vld [vmem:[%s3109_s15 + $0x1e8] sm:$0xff] }
 0x253   :  { %v862_v44 = vsub.f32 1.5, %v861_v43  ;;  %v831_v45 = vsel %vm830_vm11, %v2480_v34, %v827_v42  ;;  %v2404_v42 = vld [vmem:[%s3109_s15 + $0x30] sm:$0xff] }
 0x254   :  { %v832_v49 = vmul.f32 %v831_v45, %v811_v5  ;;  %v2412_v43 = vld [vmem:[%s3109_s15 + $0x70] sm:$0xff] }
 0x255   :  { %v863_v46 = vmul.f32 %v2482_v37, %v862_v44  ;;  %v2420_v45 = vld [vmem:[%s3109_s15 + $0xb0] sm:$0xff] }
 0x257   :  { %v867_v47 = vsel %vm866_vm13, %v2482_v37, %v863_v46  ;;  %v2405_v37 = vld [vmem:[%s3109_s15 + $0x38] sm:$0xff]  ;;  %v2428_v46 = vld [vmem:[%s3109_s15 + $0xf0] sm:$0xff] }
 0x258   :  { %v868_v50 = vmul.f32 %v867_v47, %v844_v9  ;;  %1568 = vmatpush.bf16.xpose.msra.mxu1 %v2405_v37  ;;  %1582 = vmatpush.bf16.xpose.msra.mxu2 %v2412_v43  ;;  %v2435_v37 = vld [vmem:[%s3109_s15 + $0x128] sm:$0xff]  ;;  %v2458_v43 = vld [vmem:[%s3109_s15 + $0x1e0] sm:$0xff] }
 0x259   :  { %1595 = vmatpush.bf16.xpose.msra.mxu3 %v2420_v45  ;;  %v2441_v45 = vld [vmem:[%s3109_s15 + $0x158] sm:$0xff] }
 0x25a   :  { %v869_v53 = vsel %vm635_vm0, %v832_v49, %v868_v50  ;;  %1608 = vmatpush.bf16.xpose.msrb.mxu0 %v2428_v46  ;;  %v2449_v46 = vld [vmem:[%s3109_s15 + $0x198] sm:$0xff] }
 0x25b   :  { %v873_v54 = vmul.f32 %v2468_v48, %v869_v53 }
 0x25d   :  { %v877_v55 = vadd.f32 %v2469_v52, %v873_v54  ;;  %v2403_v54 = vld [vmem:[%s3109_s15 + $0x28] sm:$0xff] }
 0x25f   :  { %v878_v56 = vmax.f32 %v877_v55, 0.0  ;;  %v2411_v55 = vld [vmem:[%s3109_s15 + $0x68] sm:$0xff] }
 0x260   :  { %1569 = vmatpush.bf16.xpose.msra.mxu1 %v2404_v42  ;;  %1583 = vmatpush.bf16.xpose.msra.mxu2 %v2411_v55  ;;  %v2450_v42 = vld [vmem:[%s3109_s15 + $0x1a0] sm:$0xff]  ;;  %v2447_v55 = vld [vmem:[%s3109_s15 + $0x188] sm:$0xff] }
 0x261   :  { %v895_v57 = vpack.c.bf16 %v878_v56, %v878_v56 }
 0x263   :  { %956 = vmatmul.bf16.vlgmr.msra.gmra.mxu0 %v895_v57 }
 0x268   :  { %1570 = vmatpush.bf16.xpose.msra.mxu1 %v2403_v54  ;;  %v2439_v54 = vld [vmem:[%s3109_s15 + $0x148] sm:$0xff] }
 0x2e0   :  { %v957_v59 = vpop.f32.mrf.mxu0 }
 0x2e1   :  { %v958_v60 = vadd.f32 %v2470_v58, %v957_v59  ;;  %v2419_v58 = vld [vmem:[%s3109_s15 + $0xa8] sm:$0xff] }
 0x2e2   :  { %v2427_v59 = vld [vmem:[%s3109_s15 + $0xe8] sm:$0xff]  ;;  %1596 = vmatpush.bf16.xpose.msra.mxu3 %v2419_v58  ;;  %v2438_v58 = vld [vmem:[%s3109_s15 + $0x140] sm:$0xff] }
 0x2e3   :  { %v963_v61 = vsel %vm635_vm0, %v958_v60, 0.0  ;;  %v994_v62 = vrot.slane %v958_v60, 2  ;;  %1609 = vmatpush.bf16.xpose.msrb.mxu0 %v2427_v59 }
 0x2e4   :  { %v964_v63 = vrot.slane %v963_v61, 4 }
 0x2e5   :  { %v996_v0 = vsel %vm635_vm0, %v994_v62, 0.0 }
 0x2e6   :  { %v965_v1 = vadd.f32 %v964_v63, %v963_v61  ;;  %v997_v2 = vrot.slane %v996_v0, 4 }
 0x2e8   :  { %v966_v3 = vrot.slane %v965_v1, 2  ;;  %v998_v4 = vadd.f32 %v997_v2, %v996_v0  ;;  %v959_v5 = vpop.f32.mrf.mxu0  ;;  %v2471_v0 = vld [vmem:[%s3107_s13] ss:$0 sm:$0xff] }
 0x2e9   :  { %v2472_v5 = vld [vmem:[%s3108_s14] ss:$0 sm:$0xff] }
 0x2ea   :  { %v967_v6 = vadd.f32 %v966_v3, %v965_v1  ;;  %v999_v7 = vrot.slane %v998_v4, 2  ;;  %v2402_v3 = vld [vmem:[%s3109_s15 + $0x20] sm:$0xff] }
 0x2eb   :  { %1571 = vmatpush.bf16.xpose.msra.mxu1 %v2402_v3 }
 0x2ec   :  { %v968_v8 = vrot.slane %v967_v6, 1  ;;  %v1000_v9 = vadd.f32 %v999_v7, %v998_v4  ;;  %v2410_v4 = vld [vmem:[%s3109_s15 + $0x60] sm:$0xff] }
 0x2ed   :  { %v2426_v7 = vld [vmem:[%s3109_s15 + $0xe0] sm:$0xff]  ;;  %1584 = vmatpush.bf16.xpose.msra.mxu2 %v2410_v4 }
 0x2ee   :  { %v969_v10 = vadd.f32 %v968_v8, %v967_v6  ;;  %v1001_v11 = vrot.slane %v1000_v9, 1  ;;  %v2418_v6 = vld [vmem:[%s3109_s15 + $0xa0] sm:$0xff]  ;;  %1610 = vmatpush.bf16.xpose.msrb.mxu0 %v2426_v7 }
 0x2ef   :  { %1597 = vmatpush.bf16.xpose.msra.mxu3 %v2418_v6 }
 0x2f0   :  { %v970_v12 = vmul.f32 %v969_v10, %v2771_v51  ;;  %v1002_v13 = vadd.f32 %v1001_v11, %v1000_v9 }
 0x2f2   :  { %v2852_v14 = vsub.f32 %v958_v60, %v970_v12  ;;  %v1003_v15 = vmul.f32 %v1002_v13, %v2771_v51  ;;  %v2401_v12 = vld [vmem:[%s3109_s15 + $0x18] sm:$0xff] }
 0x2f3   :  { %v2409_v13 = vld [vmem:[%s3109_s15 + $0x58] sm:$0xff]  ;;  %1572 = vmatpush.bf16.xpose.msra.mxu1 %v2401_v12 }
 0x2f4   :  { %v972_v16 = vmul.f32 %v2852_v14, %v2852_v14  ;;  %v2857_v17 = vsub.f32 %v958_v60, %v1003_v15  ;;  %v2417_v15 = vld [vmem:[%s3109_s15 + $0x98] sm:$0xff] }
 0x2f5   :  { %1585 = vmatpush.bf16.xpose.msra.mxu2 %v2409_v13 }
 0x2f6   :  { %v973_v18 = vsel %vm635_vm0, %v972_v16, 0.0  ;;  %v1005_v19 = vmul.f32 %v2857_v17, %v2857_v17  ;;  %v2425_v16 = vld [vmem:[%s3109_s15 + $0xd8] sm:$0xff] }
 0x2f7   :  { %v974_v20 = vrot.slane %v973_v18, 4  ;;  %1598 = vmatpush.bf16.xpose.msra.mxu3 %v2417_v15  ;;  %1611 = vmatpush.bf16.xpose.msrb.mxu0 %v2425_v16  ;;  %v1672_v15 = vld [vmem:[%s3110_s16] sm:$0xff] }
 0x2f8   :  { %v1007_v21 = vrot.slane %v1005_v19, 2  ;;  %v2416_v19 = vld [vmem:[%s3109_s15 + $0x90] sm:$0xff] }
 0x2f9   :  { %v975_v22 = vadd.f32 %v974_v20, %v973_v18  ;;  %v2408_v18 = vld [vmem:[%s3109_s15 + $0x50] sm:$0xff] }
 0x2fa   :  { %v1009_v23 = vsel %vm635_vm0, %v1007_v21, 0.0  ;;  %v2424_v20 = vld [vmem:[%s3109_s15 + $0xd0] sm:$0xff]  ;;  %v2399_v21 = vld [vmem:[%s3109_s15 + $0x8] sm:$0xff] }
 0x2fb   :  { %v976_v24 = vrot.slane %v975_v22, 2  ;;  %v1010_v25 = vrot.slane %v1009_v23, 4 }
 0x2fd   :  { %v977_v26 = vadd.f32 %v976_v24, %v975_v22  ;;  %v1011_v27 = vadd.f32 %v1010_v25, %v1009_v23  ;;  %1586 = vmatpush.bf16.xpose.msra.mxu2 %v2408_v18  ;;  %v2407_v22 = vld [vmem:[%s3109_s15 + $0x48] sm:$0xff]  ;;  %v2398_v25 = vld [vmem:[%s3109_s15] sm:$0xff] }
 0x2fe   :  { %v2415_v23 = vld [vmem:[%s3109_s15 + $0x88] sm:$0xff] }
 0x2ff   :  { %v978_v28 = vrot.slane %v977_v26, 1  ;;  %v1012_v29 = vrot.slane %v1011_v27, 2  ;;  %1599 = vmatpush.bf16.xpose.msra.mxu3 %v2416_v19  ;;  %1612 = vmatpush.bf16.xpose.msrb.mxu0 %v2424_v20  ;;  %v2423_v24 = vld [vmem:[%s3109_s15 + $0xc8] sm:$0xff]  ;;  %v1681_v19 = vperm.slane %v1672_v15, 7  ;;  %v1674_v20 = vperm.slane %v1672_v15, 0 }
 0x301   :  { %v979_v30 = vadd.f32 %v978_v28, %v977_v26  ;;  %v1013_v31 = vadd.f32 %v1012_v29, %v1011_v27  ;;  %v2406_v26 = vld [vmem:[%s3109_s15 + $0x40] sm:$0xff]  ;;  %v2437_v29 = vld [vmem:[%s3109_s15 + $0x138] sm:$0xff] }
 0x302   :  { %v2414_v27 = vld [vmem:[%s3109_s15 + $0x80] sm:$0xff] }
 0x303   :  { %v980_v32 = vmul.f32 %v979_v30, %v2771_v51  ;;  %v1014_v33 = vrot.slane %v1013_v31, 1  ;;  %v2422_v28 = vld [vmem:[%s3109_s15 + $0xc0] sm:$0xff]  ;;  %v2445_v30 = vld [vmem:[%s3109_s15 + $0x178] sm:$0xff] }
 0x305   :  { %v981_v34 = vadd.f32 1e-05, %v980_v32  ;;  %v1015_v35 = vadd.f32 %v1014_v33, %v1013_v31  ;;  %1587 = vmatpush.bf16.xpose.msra.mxu2 %v2407_v22  ;;  %v2453_v31 = vld [vmem:[%s3109_s15 + $0x1b8] sm:$0xff]  ;;  %v2436_v33 = vld [vmem:[%s3109_s15 + $0x130] sm:$0xff]  ;;  %v1675_v22 = vperm.slane %v1672_v15, 1 }
 0x306   :  { %v2461_v32 = vld [vmem:[%s3109_s15 + $0x1f8] sm:$0xff] }
 0x307   :  { %2483 = vrsqrt.f32 %v981_v34  ;;  %v1016_v36 = vmul.f32 %v1015_v35, %v2771_v51  ;;  %vm988_vm15 = vweird.f32 %v981_v34  ;;  %1600 = vmatpush.bf16.xpose.msra.mxu3 %v2415_v23  ;;  %1613 = vmatpush.bf16.xpose.msrb.mxu0 %v2423_v24  ;;  %v2452_v35 = vld [vmem:[%s3109_s15 + $0x1b0] sm:$0xff]  ;;  %v1676_v24 = vperm.slane %v1672_v15, 2 }
 0x309   :  { %v1017_v41 = vadd.f32 1e-05, %v1016_v36  ;;  %v2460_v36 = vld [vmem:[%s3109_s15 + $0x1f0] sm:$0xff] }
 0x30b   :  { %2485 = vrsqrt.f32 %v1017_v41  ;;  %vm1024_vm3 = vweird.f32 %v1017_v41 }
 0x30d   :  { %v2484_v51 = vpop.eup %2483  ;;  %1588 = vmatpush.bf16.xpose.msra.mxu2 %v2406_v26  ;;  %v1679_v26 = vperm.slane %v1672_v15, 5 }
 0x30e   :  { %v983_v44 = vmul.f32 %v2484_v51, %v981_v34  ;;  %vm989_vm14 = vweird.f32 %v2484_v51  ;;  %v2444_v34 = vld [vmem:[%s3109_s15 + $0x170] sm:$0xff] }
 0x30f   :  { %vm990_vm2 = vmor %vm988_vm15, %vm989_vm14  ;;  %1601 = vmatpush.bf16.xpose.msra.mxu3 %v2414_v27  ;;  %1614 = vmatpush.bf16.xpose.msrb.mxu0 %v2422_v28  ;;  %v1680_v28 = vperm.slane %v1672_v15, 6 }
 0x310   :  { %v984_v47 = vmul.f32 %v2484_v51, %v983_v44  ;;  %v2433_v44 = vld [vmem:[%s3109_s15 + $0x118] sm:$0xff] }
 0x311   :  { %v2486_v48 = vpop.eup %2485 }
 0x312   :  { %v985_v49 = vmul.f32 0.5, %v984_v47  ;;  %v1019_v50 = vmul.f32 %v2486_v48, %v1017_v41  ;;  %vm1025_vm1 = vweird.f32 %v2486_v48  ;;  %v2434_v41 = vld [vmem:[%s3109_s15 + $0x120] sm:$0xff]  ;;  %v2457_v47 = vld [vmem:[%s3109_s15 + $0x1d8] sm:$0xff] }
 0x313   :  { %vm1026_vm4 = vmor %vm1024_vm3, %vm1025_vm1 }
 0x314   :  { %v986_v52 = vsub.f32 1.5, %v985_v49  ;;  %v1020_v53 = vmul.f32 %v2486_v48, %v1019_v50  ;;  %v2440_v49 = vld [vmem:[%s3109_s15 + $0x150] sm:$0xff] }
 0x315   :  { %1633 = vmatpush.bf16.xpose.msrb.mxu2 %v2445_v30  ;;  %v2448_v50 = vld [vmem:[%s3109_s15 + $0x190] sm:$0xff] }
 0x316   :  { %v987_v56 = vmul.f32 %v2484_v51, %v986_v52  ;;  %v1021_v57 = vmul.f32 0.5, %v1020_v53  ;;  %v2456_v52 = vld [vmem:[%s3109_s15 + $0x1d0] sm:$0xff]  ;;  %v2431_v53 = vld [vmem:[%s3109_s15 + $0x108] sm:$0xff] }
 0x317   :  { %1646 = vmatpush.bf16.xpose.msrb.mxu3 %v2453_v31  ;;  %1659 = vmatpush.bf16.xpose.msra.mxu0 %v2461_v32 }
 0x318   :  { %v1022_v60 = vsub.f32 1.5, %v1021_v57  ;;  %v991_v61 = vsel %vm990_vm2, %v2484_v51, %v987_v56  ;;  %v2442_v51 = vld [vmem:[%s3109_s15 + $0x160] sm:$0xff]  ;;  %v2455_v56 = vld [vmem:[%s3109_s15 + $0x1c8] sm:$0xff] }
 0x319   :  { %v992_v1 = vmul.f32 %v991_v61, %v2852_v14  ;;  %v2430_v57 = vld [vmem:[%s3109_s15 + $0x100] sm:$0xff] }
 0x31a   :  { %v1023_v62 = vmul.f32 %v2486_v48, %v1022_v60  ;;  %v2446_v60 = vld [vmem:[%s3109_s15 + $0x180] sm:$0xff] }
 0x31b   :  { %v2454_v61 = vld [vmem:[%s3109_s15 + $0x1c0] sm:$0xff] }
 0x31c   :  { %v1027_v63 = vsel %vm1026_vm4, %v2486_v48, %v1023_v62  ;;  %v2432_v48 = vld [vmem:[%s3109_s15 + $0x110] sm:$0xff] }
 0x31d   :  { %v1028_v2 = vmul.f32 %v1027_v63, %v2857_v17  ;;  %v2400_v17 = vld [vmem:[%s3109_s15 + $0x10] sm:$0xff]  ;;  %1634 = vmatpush.bf16.xpose.msrb.mxu2 %v2444_v34 }
 0x31e   :  { %1573 = vmatpush.bf16.xpose.msra.mxu1 %v2400_v17  ;;  %v1678_v17 = vperm.slane %v1672_v15, 4 }
 0x31f   :  { %v1029_v8 = vsel %vm635_vm0, %v992_v1, %v1028_v2  ;;  %1647 = vmatpush.bf16.xpose.msrb.mxu3 %v2452_v35  ;;  %1660 = vmatpush.bf16.xpose.msra.mxu0 %v2460_v36 }
 0x320   :  { %v1033_v9 = vmul.f32 %v2471_v0, %v1029_v8 }
 0x322   :  { %v2922_v10 = vadd.f32 %v2472_v5, %v1033_v9 }
 0x324   :  { %v1038_v11 = vmul.f32 %v2922_v10, %v2922_v10 }
 0x325   :  { %1635 = vmatpush.bf16.xpose.msrb.mxu2 %v2443_v38 }
 0x326   :  { %v1040_v14 = vsel %vm1039_vm5, %v1038_v11, 0.0  ;;  %1574 = vmatpush.bf16.xpose.msra.mxu1 %v2399_v21  ;;  %v1677_v21 = vperm.slane %v1672_v15, 3 }
 0x327   :  { %1041 = vadd.xlane.f32.xlu0 %v1040_v14  ;;  %1648 = vmatpush.bf16.xpose.msrb.mxu3 %v2451_v39 }
 0x328   :  { %1661 = vmatpush.bf16.xpose.msra.mxu0 %v2459_v40 }
 0x32d   :  { %1636 = vmatpush.bf16.xpose.msrb.mxu2 %v2442_v51 }
 0x32e   :  { %1575 = vmatpush.bf16.xpose.msra.mxu1 %v2398_v25 }
 0x32f   :  { %1649 = vmatpush.bf16.xpose.msrb.mxu3 %v2450_v42 }
 0x330   :  { %1662 = vmatpush.bf16.xpose.msra.mxu0 %v2458_v43 }
 0x335   :  { %1637 = vmatpush.bf16.xpose.msrb.mxu2 %v2441_v45 }
 0x336   :  { %1620 = vmatpush.bf16.xpose.msrb.mxu1 %v2437_v29 }
 0x337   :  { %1650 = vmatpush.bf16.xpose.msrb.mxu3 %v2449_v46 }
 0x338   :  { %1663 = vmatpush.bf16.xpose.msra.mxu0 %v2457_v47 }
 0x33d   :  { %1638 = vmatpush.bf16.xpose.msrb.mxu2 %v2440_v49 }
 0x33e   :  { %1621 = vmatpush.bf16.xpose.msrb.mxu1 %v2436_v33 }
 0x33f   :  { %1651 = vmatpush.bf16.xpose.msrb.mxu3 %v2448_v50 }
 0x340   :  { %1664 = vmatpush.bf16.xpose.msra.mxu0 %v2456_v52 }
 0x345   :  { %1639 = vmatpush.bf16.xpose.msrb.mxu2 %v2439_v54 }
 0x346   :  { %1622 = vmatpush.bf16.xpose.msrb.mxu1 %v2435_v37 }
 0x347   :  { %1652 = vmatpush.bf16.xpose.msrb.mxu3 %v2447_v55 }
 0x348   :  { %1665 = vmatpush.bf16.xpose.msra.mxu0 %v2455_v56  ;;  %v1715_v56 = vlaneseq }
 0x34d   :  { %1640 = vmatpush.bf16.xpose.msrb.mxu2 %v2438_v58 }
 0x34e   :  { %1623 = vmatpush.bf16.xpose.msrb.mxu1 %v2434_v41 }
 0x34f   :  { %1653 = vmatpush.bf16.xpose.msrb.mxu3 %v2446_v60 }
 0x350   :  { %1666 = vmatpush.bf16.xpose.msra.mxu0 %v2454_v61 }
 0x356   :  { %1624 = vmatpush.bf16.xpose.msrb.mxu1 %v2433_v44 }
 0x35e   :  { %1625 = vmatpush.bf16.xpose.msrb.mxu1 %v2432_v48 }
 0x366   :  { %1626 = vmatpush.bf16.xpose.msrb.mxu1 %v2431_v53 }
 0x36e   :  { %1627 = vmatpush.bf16.xpose.msrb.mxu1 %v2430_v57  ;;  %v1716_v57 = vand.u32 127, %v1715_v56 }
 0x370   :  { %v1717_v58 = vadd.s32 128, %v1716_v57  ;;  %v1719_v60 = vadd.s32 384, %v1716_v57 }
 0x39a   :  { %v1042_v59 = vpop.xlane.xlu0 %1041 }
 0x39b   :  { %v1043_v62 = vadd.f32 1e-12, %v1042_v59  ;;  %v1718_v59 = vadd.s32 256, %v1716_v57 }
 0x39d   :  { %2487 = vrsqrt.f32 %v1043_v62  ;;  %vm1050_vm6 = vweird.f32 %v1043_v62 }
 0x3a3   :  { %v2488_v63 = vpop.eup %2487 }
 0x3a4   :  { %v1045_v0 = vmul.f32 %v2488_v63, %v1043_v62  ;;  %vm1051_vm0 = vweird.f32 %v2488_v63  ;;  %v1720_v62 = vadd.s32 512, %v1716_v57 }
 0x3a5   :  { %vm1052_vm7 = vmor %vm1050_vm6, %vm1051_vm0 }
 0x3a6   :  { %v1046_v1 = vmul.f32 %v2488_v63, %v1045_v0  ;;  %v1722_v0 = vadd.s32 768, %v1716_v57 }
 0x3a8   :  { %v1047_v2 = vmul.f32 0.5, %v1046_v1  ;;  %v1723_v1 = vadd.s32 896, %v1716_v57 }
 0x3aa   :  { %v1048_v3 = vsub.f32 1.5, %v1047_v2 }
 0x3ac   :  { %v1049_v4 = vmul.f32 %v2488_v63, %v1048_v3 }
 0x3ae   :  { %v1053_v5 = vsel %vm1052_vm7, %v2488_v63, %v1049_v4  ;;  %v1721_v63 = vadd.s32 640, %v1716_v57 }
 0x3af   :  { %v1054_v6 = vmul.f32 %v1053_v5, %v2922_v10 }
 0x3b1   :  { %v1055_v7 = vpack.c.bf16 %v1054_v6, %v1054_v6 }
 0x3b3   :  { %1576 = vmatmul.bf16.vlgmr.msra.gmra.mxu1 %v1055_v7  ;;  %1589 = vmatmul.bf16.vlgmr.msra.gmra.mxu2 %v1055_v7 }
 0x3b4   :  { %1602 = vmatmul.bf16.vlgmr.msra.gmra.mxu3 %v1055_v7  ;;  %1615 = vmatmul.bf16.vlgmr.msrb.gmra.mxu0 %v1055_v7 }
 0x3c3   :  { %1628 = vmatmul.bf16.vlgmr.msrb.gmra.mxu1 %v1055_v7  ;;  %1641 = vmatmul.bf16.vlgmr.msrb.gmra.mxu2 %v1055_v7 }
 0x3c4   :  { %1654 = vmatmul.bf16.vlgmr.msrb.gmra.mxu3 %v1055_v7  ;;  %1667 = vmatmul.bf16.vlgmr.msra.gmra.mxu0 %v1055_v7 }
 0x430   :  { %v1577_v8 = vpop.f32.mrf.mxu1 }
 0x431   :  { %v1616_v9 = vpop.f32.mrf.mxu0  ;;  %v1690_v29 = vmul.f32 %v1674_v20, %v1577_v8 }
 0x432   :  { %v1693_v30 = vmul.f32 %v1677_v21, %v1616_v9 }
 0x433   :  { %v1698_v40 = vsel %vm1039_vm5, %v1690_v29, -inf }
 0x434   :  { %v1701_v41 = vsel %vm1039_vm5, %v1693_v30, -inf }
 0x436   :  { %v1590_v11 = vpop.f32.mrf.mxu2 }
 0x437   :  { %v1603_v12 = vpop.f32.mrf.mxu3  ;;  %v1691_v31 = vmul.f32 %v1675_v22, %v1590_v11 }
 0x438   :  { %v1579_v13 = vpop.f32.mrf.mxu1  ;;  %v1692_v32 = vmul.f32 %v1676_v24, %v1603_v12 }
 0x439   :  { %v1618_v14 = vpop.f32.mrf.mxu0  ;;  %v1699_v51 = vsel %vm1039_vm5, %v1691_v31, -inf }
 0x43a   :  { %v1700_v44 = vsel %vm1039_vm5, %v1692_v32, -inf }
 0x43e   :  { %v1592_v10 = vpop.f32.mrf.mxu2 }
 0x43f   :  { %v1605_v16 = vpop.f32.mrf.mxu3 }
 0x440   :  { %v1629_v18 = vpop.f32.mrf.mxu1 }
 0x441   :  { %v1668_v23 = vpop.f32.mrf.mxu0  ;;  %v1694_v25 = vmul.f32 %v1678_v17, %v1629_v18 }
 0x442   :  { %v1697_v27 = vmul.f32 %v1681_v19, %v1668_v23 }
 0x443   :  { %v1702_v34 = vsel %vm1039_vm5, %v1694_v25, -inf }
 0x444   :  { %v1708_v37 = vsel %vm1039_vm5, %v1697_v27, -inf  ;;  %v1703_v45 = vmax.f32 %v1698_v40, %v1702_v34 }
 0x445   :  { %v1709_v48 = vmax.f32 %v1701_v41, %v1708_v37 }
 0x446   :  { %v1642_v33 = vpop.f32.mrf.mxu2 }
 0x447   :  { %v1695_v35 = vmul.f32 %v1679_v26, %v1642_v33  ;;  %v1655_v36 = vpop.f32.mrf.mxu3 }
 0x448   :  { %v1696_v38 = vmul.f32 %v1680_v28, %v1655_v36  ;;  %v1631_v39 = vpop.f32.mrf.mxu1 }
 0x449   :  { %v1704_v42 = vsel %vm1039_vm5, %v1695_v35, -inf  ;;  %v1670_v43 = vpop.f32.mrf.mxu0 }
 0x44a   :  { %v1705_v46 = vmax.f32 %v1699_v51, %v1704_v42  ;;  %v1706_v47 = vsel %vm1039_vm5, %v1696_v38, -inf }
 0x44b   :  { %v1707_v49 = vmax.f32 %v1700_v44, %v1706_v47 }
 0x44c   :  { %v1710_v50 = vmax.f32 %v1703_v45, %v1705_v46 }
 0x44d   :  { %v1711_v52 = vmax.f32 %v1707_v49, %v1709_v48 }
 0x44e   :  { %v1644_v53 = vpop.f32.mrf.mxu2 }
 0x44f   :  { %v1657_v54 = vpop.f32.mrf.mxu3  ;;  %v1712_v55 = vmax.f32 %v1710_v50, %v1711_v52 }
 0x451   :  { %1713 = vmax.xlane.f32.xlu0 %v1712_v55 }
 0x4c4   :  { %v1714_v61 = vpop.xlane.xlu0 %1713 }
 0x4c5   :  { %vm1724_vm8 = vcmp.ge.f32.partialorder %v1690_v29, %v1714_v61  ;;  %vm1725_vm9 = vcmp.ge.f32.partialorder %v1691_v31, %v1714_v61  ;;  %vm1726_vm10 = vcmp.ge.f32.partialorder %v1692_v32, %v1714_v61  ;;  %vm1727_vm11 = vcmp.ge.f32.partialorder %v1693_v30, %v1714_v61 }
 0x4c6   :  { %vm1728_vm12 = vcmp.ge.f32.partialorder %v1694_v25, %v1714_v61  ;;  %vm1729_vm13 = vcmp.ge.f32.partialorder %v1695_v35, %v1714_v61  ;;  %vm1730_vm14 = vcmp.ge.f32.partialorder %v1696_v38, %v1714_v61  ;;  %vm1731_vm15 = vcmp.ge.f32.partialorder %v1697_v27, %v1714_v61 }
 0x4c7   :  { %v1732_v2 = vsel %vm1724_vm8, %v1716_v57, 1024  ;;  %v1733_v3 = vsel %vm1725_vm9, %v1717_v58, 1024  ;;  %v1734_v4 = vsel %vm1726_vm10, %v1718_v59, 1024  ;;  %v1735_v5 = vsel %vm1727_vm11, %v1719_v60, 1024 }
 0x4c8   :  { %v1736_v6 = vsel %vm1728_vm12, %v1720_v62, 1024  ;;  %v1737_v7 = vsel %vm1729_vm13, %v1721_v63, 1024  ;;  %v1738_v8 = vsel %vm1730_vm14, %v1722_v0, 1024  ;;  %v1739_v9 = vsel %vm1731_vm15, %v1723_v1, 1024 }
 0x4c9   :  { %v1740_v11 = vsel %vm1039_vm5, %v1732_v2, 2147483647  ;;  %v1741_v12 = vsel %vm1039_vm5, %v1733_v3, 2147483647  ;;  %v1742_v13 = vsel %vm1039_vm5, %v1734_v4, 2147483647 }
 0x4ca   :  { %v1743_v14 = vsel %vm1039_vm5, %v1735_v5, 2147483647  ;;  %v1744_v15 = vsel %vm1039_vm5, %v1736_v6, 2147483647  ;;  %v1747_v10 = vsel %vm1039_vm5, %v1737_v7, 2147483647 }
 0x4cb   :  { %vm1745_vm1 = vcmp.lt.s32.totalorder %v1740_v11, %v1744_v15  ;;  %vm1748_vm2 = vcmp.lt.s32.totalorder %v1741_v12, %v1747_v10  ;;  %v1750_v16 = vsel %vm1039_vm5, %v1738_v8, 2147483647  ;;  %v1753_v17 = vsel %vm1039_vm5, %v1739_v9, 2147483647 }
 0x4cc   :  { %v1746_v18 = vsel %vm1745_vm1, %v1740_v11, %v1744_v15  ;;  %v1749_v19 = vsel %vm1748_vm2, %v1741_v12, %v1747_v10  ;;  %vm1751_vm3 = vcmp.lt.s32.totalorder %v1742_v13, %v1750_v16  ;;  %vm1754_vm4 = vcmp.lt.s32.totalorder %v1743_v14, %v1753_v17 }
 0x4cd   :  { %v1752_v20 = vsel %vm1751_vm3, %v1742_v13, %v1750_v16  ;;  %v1755_v21 = vsel %vm1754_vm4, %v1743_v14, %v1753_v17  ;;  %vm1756_vm0 = vcmp.lt.s32.totalorder %v1746_v18, %v1749_v19  ;;  %vm1776_vm5 = vcmask 3072  }
 0x4ce   :  { %v1757_v22 = vsel %vm1756_vm0, %v1746_v18, %v1749_v19  ;;  %vm1758_vm6 = vcmp.lt.s32.totalorder %v1752_v20, %v1755_v21 }
 0x4cf   :  { %v1759_v23 = vsel %vm1758_vm6, %v1752_v20, %v1755_v21 }
 0x4d0   :  { %vm1760_vm7 = vcmp.lt.s32.totalorder %v1757_v22, %v1759_v23 }
 0x4d1   :  { %v1761_v24 = vsel %vm1760_vm7, %v1757_v22, %v1759_v23 }
 0x4d2   :  { %v1763_v25 = vshra.s32 %v1761_v24, 16  ;;  %v1762_v27 = vand.u32 65535, %v1761_v24 }
 0x4d4   :  { %v1765_v26 = vcvt.s32.f32 %v1763_v25  ;;  %v1764_v29 = vcvt.s32.f32 %v1762_v27 }
 0x4d6   :  { %1766 = vmin.xlane.f32.xlu1 %v1765_v26 }
 0x549   :  { %v1767_v28 = vpop.xlane.xlu1 %1766 }
 0x54a   :  { %vm1768_vm8 = vcmp.eq.f32.partialorder %v1765_v26, %v1767_v28  ;;  %v1773_v31 = vcvt.f32.s32 %v1767_v28 }
 0x54b   :  { %v1769_v30 = vsel %vm1768_vm8, %v1764_v29, inf }
 0x54c   :  { %1770 = vmin.xlane.f32.xlu1 %v1769_v30  ;;  %v1774_v33 = vshll.u32 %v1773_v31, 16 }
 0x5bf   :  { %v1771_v32 = vpop.xlane.xlu1 %1770 }
 0x5c0   :  { %v1772_v34 = vcvt.f32.s32 %v1771_v32 }
 0x5c2   :  { %v1775_v35 = vadd.s32 %v1774_v33, %v1772_v34 }
 0x5c4   :  { %1777 = vst.msk [vmem:[%s3111_s17] sm:$0xf] %vm1776_vm5, %v1775_v35 }

</bundles_post_ra>
